<compile_context>
chip_gen: v7x
topology: tpu7x:2x2x1
jax: 0.10.0
libtpu: 0.0.40
codegen_flags: <defaults>
</compile_context>

<pallas_src>
import functools

import jax
import jax.numpy as jnp
from jax.experimental import pallas as pl
from jax.experimental.pallas import tpu as pltpu

LANE = 128  # lane padding for all head matmuls / outputs


def _round_up(x, m):
    return ((x + m - 1) // m) * m


# ----------------------------------------------------------------------------
# Single fused kernel: stem + residual tower + all heads
# ----------------------------------------------------------------------------
def _fused_kernel(x_ref, cmask_ref, wt_ref, bt_ref, wh_ref, bh_ref,
                  polb0_ref, polb1_ref, vald_ref, sel_ref, pfcb_ref,
                  madd_ref, vb1_ref, vw2_ref, vb2_ref,
                  pol_ref, val_ref,
                  hpad_ref, stage_ref, xim_ref,
                  *, num_res_blocks, mpad, chan, halo, width, ch0):
    """Whole network in one kernel, activation resident in VMEM.

    x_ref:       (mpad, chan)           f32   NHWC-flattened input, zero padded
    cmask_ref:   (mpad, 9*chan)         f32   pre-broadcast per-tap validity mask
    wt_ref:      (L, 9*chan, chan)      bf16  folded conv weights (im2col layout)
    bt_ref:      (L, 1, chan)           f32   folded BN biases
    wh_ref:      (chan, 128)            bf16  packed 1x1 head-conv weights
    bh_ref:      (1, 128)               f32   packed head BN biases
    polb0/1_ref: (mpad, 128)            f32   policy-FC blend matrices (per phase)
    vald_ref:    (mpad, 128)            f32   value-fc1 blend matrix
    sel_ref:     (bpad, mpad)           bf16  board-membership selection matrix
    pfcb_ref:    (1, 128)               f32   policy FC bias (-1e9 on pad lanes)
    madd_ref:    (bpad, 128)            f32   legal-move additive mask
    vb1/vw2/vb2:                              value MLP params (lane padded)
    pol_ref:     (bpad, 128)            f32   output: log-softmax policy
    val_ref:     (bpad, 128)            f32   output: tanh value (col 0 valid)
    hpad_ref:    (mpad + 2*halo, chan)  f32   shift scratch with zero halo rows
    stage_ref:   (mpad, 9*chan)         f32   im2col staging scratch
    xim_ref:     (mpad, 9*chan)         bf16  masked im2col matmul operand
    """
    # Zero only the halo rows once; the interior is rewritten every layer.
    hpad_ref[0:halo, :] = jnp.zeros((halo, chan), jnp.float32)
    hpad_ref[halo + mpad:halo + mpad + halo, :] = jnp.zeros((halo, chan),
                                                            jnp.float32)

    def conv3x3(h, layer):
        # Stage the 9 statically shifted taps (im2col) into VMEM; out-of-range
        # taps read the zero halo rows, in-image boundary taps are handled by
        # the precomputed mask.
        hpad_ref[halo:halo + mpad, :] = h
        for t in range(9):
            dy, dx = t // 3, t % 3
            s = (dy - 1) * width + (dx - 1)
            stage_ref[:, t * chan:(t + 1) * chan] = (
                hpad_ref[halo + s:halo + s + mpad, :])
        # ONE mask multiply + ONE bf16 cast + ONE K=9*chan MXU matmul per layer.
        xim_ref[...] = (stage_ref[...] * cmask_ref[...]).astype(jnp.bfloat16)
        return jnp.dot(xim_ref[...], wt_ref[layer],
                       preferred_element_type=jnp.float32) + bt_ref[layer]

    # stem conv + folded BN + relu
    h = jnp.maximum(conv3x3(x_ref[...], 0), 0.0)

    # residual blocks under fori_loop (bounded code size / vreg live ranges)
    def block(b, h):
        out = jnp.maximum(conv3x3(h, 1 + 2 * b), 0.0)
        out = conv3x3(out, 2 + 2 * b)
        return jnp.maximum(out + h, 0.0)

    h = jax.lax.fori_loop(0, num_res_blocks, block, h)

    # packed placement/movement/value 1x1 convs (+ folded BN + relu), 128 lanes
    P = jnp.dot(h.astype(jnp.bfloat16), wh_ref[...],
                preferred_element_type=jnp.float32)
    P = jnp.maximum(P + bh_ref[...], 0.0)                       # (mpad, 128)

    # policy FC / value fc1 folded into per-row blends + one board-sum matmul
    sel = sel_ref[...]                                          # (bpad, mpad)
    t_pol = (P[:, ch0:ch0 + 1] * polb0_ref[...]
             + P[:, ch0 + 1:ch0 + 2] * polb1_ref[...])          # (mpad, 128)
    t_val = P[:, 4:5] * vald_ref[...]                           # (mpad, 128)

    logits = jnp.dot(sel, t_pol.astype(jnp.bfloat16),
                     preferred_element_type=jnp.float32)
    logits = logits + pfcb_ref[...] + madd_ref[...]
    mx = jnp.max(logits, axis=-1, keepdims=True)
    sh = logits - mx
    lse = jnp.log(jnp.sum(jnp.exp(sh), axis=-1, keepdims=True))
    pol_ref[...] = sh - lse                                     # log_softmax

    v = jnp.dot(sel, t_val.astype(jnp.bfloat16),
                preferred_element_type=jnp.float32) + vb1_ref[...]
    v = jnp.maximum(v, 0.0)                                     # value fc1+relu
    v = jnp.dot(v.astype(jnp.bfloat16), vw2_ref[...],
                preferred_element_type=jnp.float32) + vb2_ref[...]
    val_ref[...] = jnp.tanh(v)                                  # value fc2+tanh


def fused_forward(params, x_pad, polb0, polb1, pfcb, mask_add, *, ch0,
                  board_size):
    mpad, chan = x_pad.shape
    bpad = mask_add.shape[0]
    L = params["w_tower"].shape[0]
    num_res_blocks = (L - 1) // 2
    halo = _round_up(board_size + 1, 8)
    k9 = 9 * chan

    kernel = functools.partial(
        _fused_kernel, num_res_blocks=num_res_blocks, mpad=mpad, chan=chan,
        halo=halo, width=board_size, ch0=ch0)

    flops = int(2 * mpad * k9 * chan * L + 2 * mpad * chan * LANE
                + 2 * 2 * bpad * mpad * LANE + 2 * bpad * LANE * LANE)
    bytes_accessed = int(
        x_pad.size * 4 + params["conv_mask"].size * 4
        + params["w_tower"].size * 2 + params["b_tower"].size * 4
        + params["w_heads"].size * 2 + params["b_heads"].size * 4
        + polb0.size * 4 + polb1.size * 4 + params["val_d"].size * 4
        + params["sel"].size * 2 + pfcb.size * 4 + mask_add.size * 4
        + params["b_vfc1"].size * 4 + params["w_vfc2"].size * 2
        + params["b_vfc2"].size * 4 + 2 * bpad * LANE * 4)

    full = lambda a: pl.BlockSpec(a.shape, lambda i: (0,) * a.ndim)
    out_spec = pl.BlockSpec((bpad, LANE), lambda i: (0, 0))

    return pl.pallas_call(
        kernel,
        out_shape=(jax.ShapeDtypeStruct((bpad, LANE), jnp.float32),
                   jax.ShapeDtypeStruct((bpad, LANE), jnp.float32)),
        grid=(1,),
        in_specs=[full(x_pad), full(params["conv_mask"]), full(params["w_tower"]),
                  full(params["b_tower"]), full(params["w_heads"]),
                  full(params["b_heads"]), full(polb0), full(polb1),
                  full(params["val_d"]), full(params["sel"]), full(pfcb),
                  full(mask_add), full(params["b_vfc1"]), full(params["w_vfc2"]),
                  full(params["b_vfc2"])],
        out_specs=(out_spec, out_spec),
        scratch_shapes=[pltpu.VMEM((mpad + 2 * halo, chan), jnp.float32),
                        pltpu.VMEM((mpad, k9), jnp.float32),
                        pltpu.VMEM((mpad, k9), jnp.bfloat16)],
        compiler_params=pltpu.CompilerParams(
            dimension_semantics=("arbitrary",),
            vmem_limit_bytes=32 * 1024 * 1024),
        cost_estimate=pl.CostEstimate(flops=flops,
                                      transcendentals=2 * bpad * LANE,
                                      bytes_accessed=bytes_accessed),
    )(x_pad, params["conv_mask"], params["w_tower"], params["b_tower"],
      params["w_heads"], params["b_heads"], polb0, polb1, params["val_d"],
      params["sel"], pfcb, mask_add, params["b_vfc1"], params["w_vfc2"],
      params["b_vfc2"])


# ----------------------------------------------------------------------------
# Parameters: PyTorch-layout random init -> folded, padded, bf16 kernel layout
# ----------------------------------------------------------------------------
def init_params(key, board_size=7, in_channels=2, num_res_blocks=3,
                num_filters=64, batch=2):
    assert in_channels <= num_filters
    H = W = board_size
    bb = H * W
    M = batch * bb
    mpad = _round_up(M, 16)           # bf16 sublane tile = 16
    bpad = _round_up(batch, 16)
    C = num_filters
    L = 1 + 2 * num_res_blocks

    keys = iter(jax.random.split(key, 64))
    nxt = lambda: next(keys)

    def conv_w(cout, cin, k):
        return jax.random.normal(nxt(), (cout, cin, k, k), jnp.float32) * 0.05

    def bn_affine(c):
        gamma = 1.0 + 0.1 * jax.random.normal(nxt(), (c,), jnp.float32)
        beta = 0.1 * jax.random.normal(nxt(), (c,), jnp.float32)
        mean = 0.1 * jax.random.normal(nxt(), (c,), jnp.float32)
        var = 0.5 + jax.random.uniform(nxt(), (c,), jnp.float32)
        scale = gamma / jnp.sqrt(var + 1e-5)       # inference-mode BN fold
        bias = beta - mean * scale
        return scale, bias

    def fc(cout, cin):
        w = jax.random.normal(nxt(), (cout, cin), jnp.float32) * 0.05
        b = jax.random.normal(nxt(), (cout,), jnp.float32) * 0.05
        return w, b

    # tower conv3x3 weights: per-tap (cin->C padded, cout) blocks, BN scale folded
    def pack_conv3x3(w_oihw, scale):
        cout, cin = w_oihw.shape[0], w_oihw.shape[1]
        taps = []
        for dy in range(3):
            for dx in range(3):
                wt = w_oihw[:, :, dy, dx].T * scale[None, :]       # (cin, cout)
                taps.append(jnp.pad(wt, ((0, C - cin), (0, 0))))   # pad cin->C
        return jnp.concatenate(taps, axis=0)                        # (9*C, cout)

    tower_w, tower_b = [], []
    scale, bias = bn_affine(C)
    tower_w.append(pack_conv3x3(conv_w(C, in_channels, 3), scale))
    tower_b.append(bias)
    for _ in range(num_res_blocks):
        for _conv in range(2):
            scale, bias = bn_affine(C)
            tower_w.append(pack_conv3x3(conv_w(C, C, 3), scale))
            tower_b.append(bias)
    params = {
        "w_tower": jnp.stack(tower_w, axis=0).astype(jnp.bfloat16),  # (L,9C,C)
        "b_tower": jnp.stack(tower_b, axis=0)[:, None, :],           # (L,1,C)
    }

    # packed 1x1 head convs: cols 0:2 placement, 2:4 movement, 4 value
    def conv1x1_cols(w, s):
        return w[:, :, 0, 0].T * s[None, :]

    s_pl, b_pl = bn_affine(2)
    s_mv, b_mv = bn_affine(2)
    s_v, b_v = bn_affine(1)
    w_heads = jnp.zeros((C, LANE), jnp.float32)
    w_heads = w_heads.at[:, 0:2].set(conv1x1_cols(conv_w(2, C, 1), s_pl))
    w_heads = w_heads.at[:, 2:4].set(conv1x1_cols(conv_w(2, C, 1), s_mv))
    w_heads = w_heads.at[:, 4:5].set(conv1x1_cols(conv_w(1, C, 1), s_v))
    b_heads = jnp.zeros((1, LANE), jnp.float32)
    b_heads = b_heads.at[0, 0:2].set(b_pl).at[0, 2:4].set(b_mv).at[0, 4:5].set(b_v)
    params["w_heads"] = w_heads.astype(jnp.bfloat16)
    params["b_heads"] = b_heads

    # per-row helpers used by the fused heads
    r = jnp.arange(mpad)
    p = r % bb
    valid = (r < M).astype(jnp.float32)[:, None]

    # policy FC (NCHW flatten index = c*bb + p) as per-row blend matrices
    def policy_blend(w_fc, b_fc, n_out):
        wT = w_fc.T                                      # (2*bb, n_out)
        b0 = wT[p, :] * valid                            # channel 0 weights
        b1 = wT[bb + p, :] * valid                       # channel 1 weights
        b0p = jnp.zeros((mpad, LANE), jnp.float32).at[:, :n_out].set(b0)
        b1p = jnp.zeros((mpad, LANE), jnp.float32).at[:, :n_out].set(b1)
        bfc = jnp.full((1, LANE), -1e9, jnp.float32).at[0, :n_out].set(b_fc)
        return b0p, b1p, bfc

    pw, pb = fc(bb, 2 * bb)
    params["polb0_pl"], params["polb1_pl"], params["pfcb_pl"] = policy_blend(pw, pb, bb)
    mw, mb = fc(24, 2 * bb)
    params["polb0_mv"], params["polb1_mv"], params["pfcb_mv"] = policy_blend(mw, mb, 24)

    # value MLP: fc1 as per-row blend, fc2 lane padded
    v1w, v1b = fc(32, bb)
    vald = v1w.T[p, :] * valid                            # (mpad, 32)
    params["val_d"] = jnp.zeros((mpad, LANE), jnp.float32).at[:, :32].set(vald)
    params["b_vfc1"] = jnp.zeros((1, LANE), jnp.float32).at[0, :32].set(v1b)
    v2w, v2b = fc(1, 32)
    params["w_vfc2"] = (jnp.zeros((LANE, LANE), jnp.float32)
                        .at[:32, :1].set(v2w.T).astype(jnp.bfloat16))
    params["b_vfc2"] = jnp.zeros((1, LANE), jnp.float32).at[0, :1].set(v2b)

    # board-membership selection matrix: sums rows of each board in one matmul
    n_idx = jnp.arange(bpad)[:, None]
    r_idx = jnp.arange(mpad)[None, :]
    sel = (r_idx // bb == n_idx) & (r_idx < M) & (n_idx < batch)
    params["sel"] = sel.astype(jnp.bfloat16)              # (bpad, mpad)

    # per-tap conv validity masks, pre-broadcast to (mpad, 9*C)
    y = p // W
    x = p % W
    cols = []
    for dy in range(3):
        for dx in range(3):
            yy, xx = y + dy - 1, x + dx - 1
            cols.append((r < M) & (yy >= 0) & (yy < H) & (xx >= 0) & (xx < W))
    mask9 = jnp.stack(cols, axis=1).astype(jnp.float32)    # (mpad, 9)
    params["conv_mask"] = jnp.repeat(mask9, C, axis=1)     # (mpad, 9*C)
    return params


# ----------------------------------------------------------------------------
# Forward pass
# ----------------------------------------------------------------------------
def alphazero_forward(params, x_nchw, legal_moves_mask=None, phase="placement",
                      board_size=7):
    N = x_nchw.shape[0]
    H = W = board_size
    bb = H * W
    C = params["w_heads"].shape[0]
    mpad = params["conv_mask"].shape[0]
    bpad = params["sel"].shape[0]

    # NCHW -> NHWC -> (N*H*W, Cin), zero-pad rows to mpad and channels to C
    x = jnp.transpose(x_nchw.astype(jnp.float32), (0, 2, 3, 1)).reshape(N * bb, -1)
    x = jnp.pad(x, ((0, mpad - N * bb), (0, C - x.shape[1])))

    if phase == "placement":
        ch0, n_out = 0, bb
        polb0, polb1, pfcb = params["polb0_pl"], params["polb1_pl"], params["pfcb_pl"]
    elif phase == "movement":
        ch0, n_out = 2, 24
        polb0, polb1, pfcb = params["polb0_mv"], params["polb1_mv"], params["pfcb_mv"]
    else:
        raise ValueError("Unknown phase: " + phase)

    mask_add = jnp.zeros((bpad, LANE), jnp.float32)
    if legal_moves_mask is not None:
        add = jnp.where(legal_moves_mask, 0.0, -10000.0).astype(jnp.float32)
        mask_add = mask_add.at[:N, :n_out].set(add)

    # one fused pallas_call for the whole network
    pol_pad, val_pad = fused_forward(params, x, polb0, polb1, pfcb, mask_add,
                                     ch0=ch0, board_size=board_size)
    return pol_pad[:N, :n_out], val_pad[:N, :1]


# ----------------------------------------------------------------------------
# Main
# ----------------------------------------------------------------------------
if __name__ == "__main__":
    key = jax.random.PRNGKey(0)
    pkey, xkey = jax.random.split(key)

    params = init_params(pkey, board_size=7, in_channels=2,
                         num_res_blocks=3, num_filters=64, batch=2)

    # NCHW input, as the PyTorch module expects: (batch=2, channels=2, 7, 7)
    x = jax.random.normal(xkey, (2, 2, 7, 7), jnp.float32)

    fwd = jax.jit(functools.partial(alphazero_forward, phase="placement"))
    policy, value = fwd(params, x)
    policy, value = jax.block_until_ready((policy, value))

    # sanity checks: log_softmax normalizes, tanh bounds the value
    assert policy.shape == (2, 49) and value.shape == (2, 1)
    assert bool(jnp.all(jnp.isfinite(policy))) and bool(jnp.all(jnp.isfinite(value)))
    assert bool(jnp.allclose(jnp.sum(jnp.exp(policy), axis=1), 1.0, atol=1e-3))
    assert bool(jnp.all(jnp.abs(value) <= 1.0 + 1e-6))

    print("KERNEL_OK")
</pallas_src>

<mosaic_0001>
module attributes {stable_mosaic.version = 11 : i64} {
  func.func @_fused_kernel(%arg0: i32, %arg1: memref<112x64xf32, #tpu.memory_space<vmem>>, %arg2: memref<112x576xf32, #tpu.memory_space<vmem>>, %arg3: memref<7x576x64xbf16, #tpu.memory_space<vmem>>, %arg4: memref<7x1x64xf32, #tpu.memory_space<vmem>>, %arg5: memref<64x128xbf16, #tpu.memory_space<vmem>>, %arg6: memref<1x128xf32, #tpu.memory_space<vmem>>, %arg7: memref<112x128xf32, #tpu.memory_space<vmem>>, %arg8: memref<112x128xf32, #tpu.memory_space<vmem>>, %arg9: memref<112x128xf32, #tpu.memory_space<vmem>>, %arg10: memref<16x112xbf16, #tpu.memory_space<vmem>>, %arg11: memref<1x128xf32, #tpu.memory_space<vmem>>, %arg12: memref<16x128xf32, #tpu.memory_space<vmem>>, %arg13: memref<1x128xf32, #tpu.memory_space<vmem>>, %arg14: memref<128x128xbf16, #tpu.memory_space<vmem>>, %arg15: memref<1x128xf32, #tpu.memory_space<vmem>>, %arg16: memref<16x128xf32, #tpu.memory_space<vmem>>, %arg17: memref<16x128xf32, #tpu.memory_space<vmem>>, %arg18: memref<128x64xf32, #tpu.memory_space<vmem>>, %arg19: memref<112x576xf32, #tpu.memory_space<vmem>>, %arg20: memref<112x576xbf16, #tpu.memory_space<vmem>>) attributes {dimension_semantics = [#tpu.dimension_semantics<arbitrary>], iteration_bounds = array<i64: 1>, scalar_prefetch = 0 : i64, scratch_operands = 3 : i64, tpu.core_type = #tpu.core_type<tc>, window_params = [{pipeline_mode = #tpu.pipeline_mode<synchronous>, transform_indices = @transform_0, window_bounds = array<i64: 112, 64>}, {pipeline_mode = #tpu.pipeline_mode<synchronous>, transform_indices = @transform_1, window_bounds = array<i64: 112, 576>}, {pipeline_mode = #tpu.pipeline_mode<synchronous>, transform_indices = @transform_2, window_bounds = array<i64: 7, 576, 64>}, {pipeline_mode = #tpu.pipeline_mode<synchronous>, transform_indices = @transform_3, window_bounds = array<i64: 7, 1, 64>}, {pipeline_mode = #tpu.pipeline_mode<synchronous>, transform_indices = @transform_4, window_bounds = array<i64: 64, 128>}, {pipeline_mode = #tpu.pipeline_mode<synchronous>, transform_indices = @transform_5, window_bounds = array<i64: 1, 128>}, {pipeline_mode = #tpu.pipeline_mode<synchronous>, transform_indices = @transform_6, window_bounds = array<i64: 112, 128>}, {pipeline_mode = #tpu.pipeline_mode<synchronous>, transform_indices = @transform_7, window_bounds = array<i64: 112, 128>}, {pipeline_mode = #tpu.pipeline_mode<synchronous>, transform_indices = @transform_8, window_bounds = array<i64: 112, 128>}, {pipeline_mode = #tpu.pipeline_mode<synchronous>, transform_indices = @transform_9, window_bounds = array<i64: 16, 112>}, {pipeline_mode = #tpu.pipeline_mode<synchronous>, transform_indices = @transform_10, window_bounds = array<i64: 1, 128>}, {pipeline_mode = #tpu.pipeline_mode<synchronous>, transform_indices = @transform_11, window_bounds = array<i64: 16, 128>}, {pipeline_mode = #tpu.pipeline_mode<synchronous>, transform_indices = @transform_12, window_bounds = array<i64: 1, 128>}, {pipeline_mode = #tpu.pipeline_mode<synchronous>, transform_indices = @transform_13, window_bounds = array<i64: 128, 128>}, {pipeline_mode = #tpu.pipeline_mode<synchronous>, transform_indices = @transform_14, window_bounds = array<i64: 1, 128>}, {pipeline_mode = #tpu.pipeline_mode<synchronous>, transform_indices = @transform_15, window_bounds = array<i64: 16, 128>}, {pipeline_mode = #tpu.pipeline_mode<synchronous>, transform_indices = @transform_16, window_bounds = array<i64: 16, 128>}]} {
    %cst = arith.constant 0.000000e+00 : f32
    %0 = vector.broadcast %cst : f32 to vector<8x64xf32>
    %c0 = arith.constant 0 : index
    %c0_0 = arith.constant 0 : index
    %1 = vector.load %arg18[%c0, %c0_0] : memref<128x64xf32, #tpu.memory_space<vmem>>, vector<8x64xf32>
    tpu.vector_store %arg18[%c0, %c0_0], %0 {strides = array<i32>} : memref<128x64xf32, #tpu.memory_space<vmem>>, vector<8x64xf32>,
    %cst_1 = arith.constant 0.000000e+00 : f32
    %2 = vector.broadcast %cst_1 : f32 to vector<8x64xf32>
    %c120 = arith.constant 120 : index
    %c0_2 = arith.constant 0 : index
    %3 = vector.load %arg18[%c120, %c0_2] : memref<128x64xf32, #tpu.memory_space<vmem>>, vector<8x64xf32>
    tpu.vector_store %arg18[%c120, %c0_2], %2 {strides = array<i32>} : memref<128x64xf32, #tpu.memory_space<vmem>>, vector<8x64xf32>,
    %c0_3 = arith.constant 0 : index
    %c0_4 = arith.constant 0 : index
    %4 = vector.load %arg1[%c0_3, %c0_4] : memref<112x64xf32, #tpu.memory_space<vmem>>, vector<112x64xf32>
    %c8 = arith.constant 8 : index
    %c0_5 = arith.constant 0 : index
    %5 = vector.load %arg18[%c8, %c0_5] : memref<128x64xf32, #tpu.memory_space<vmem>>, vector<112x64xf32>
    tpu.vector_store %arg18[%c8, %c0_5], %4 {strides = array<i32>} : memref<128x64xf32, #tpu.memory_space<vmem>>, vector<112x64xf32>,
    %c0_6 = arith.constant 0 : index
    %c0_7 = arith.constant 0 : index
    %6 = vector.load %arg18[%c0_6, %c0_7] : memref<128x64xf32, #tpu.memory_space<vmem>>, vector<112x64xf32>
    %c0_8 = arith.constant 0 : index
    %c0_9 = arith.constant 0 : index
    %7 = vector.load %arg19[%c0_8, %c0_9] : memref<112x576xf32, #tpu.memory_space<vmem>>, vector<112x64xf32>
    tpu.vector_store %arg19[%c0_8, %c0_9], %6 {strides = array<i32>} : memref<112x576xf32, #tpu.memory_space<vmem>>, vector<112x64xf32>,
    %c1 = arith.constant 1 : index
    %c0_10 = arith.constant 0 : index
    %8 = vector.load %arg18[%c1, %c0_10] : memref<128x64xf32, #tpu.memory_space<vmem>>, vector<112x64xf32>
    %c0_11 = arith.constant 0 : index
    %c64 = arith.constant 64 : index
    %9 = vector.load %arg19[%c0_11, %c64] : memref<112x576xf32, #tpu.memory_space<vmem>>, vector<112x64xf32>
    tpu.vector_store %arg19[%c0_11, %c64], %8 {strides = array<i32>} : memref<112x576xf32, #tpu.memory_space<vmem>>, vector<112x64xf32>,
    %c2 = arith.constant 2 : index
    %c0_12 = arith.constant 0 : index
    %10 = vector.load %arg18[%c2, %c0_12] : memref<128x64xf32, #tpu.memory_space<vmem>>, vector<112x64xf32>
    %c0_13 = arith.constant 0 : index
    %c128 = arith.constant 128 : index
    %11 = vector.load %arg19[%c0_13, %c128] : memref<112x576xf32, #tpu.memory_space<vmem>>, vector<112x64xf32>
    tpu.vector_store %arg19[%c0_13, %c128], %10 {strides = array<i32>} : memref<112x576xf32, #tpu.memory_space<vmem>>, vector<112x64xf32>,
    %c7 = arith.constant 7 : index
    %c0_14 = arith.constant 0 : index
    %12 = vector.load %arg18[%c7, %c0_14] : memref<128x64xf32, #tpu.memory_space<vmem>>, vector<112x64xf32>
    %c0_15 = arith.constant 0 : index
    %c192 = arith.constant 192 : index
    %13 = vector.load %arg19[%c0_15, %c192] : memref<112x576xf32, #tpu.memory_space<vmem>>, vector<112x64xf32>
    tpu.vector_store %arg19[%c0_15, %c192], %12 {strides = array<i32>} : memref<112x576xf32, #tpu.memory_space<vmem>>, vector<112x64xf32>,
    %c8_16 = arith.constant 8 : index
    %c0_17 = arith.constant 0 : index
    %14 = vector.load %arg18[%c8_16, %c0_17] : memref<128x64xf32, #tpu.memory_space<vmem>>, vector<112x64xf32>
    %c0_18 = arith.constant 0 : index
    %c256 = arith.constant 256 : index
    %15 = vector.load %arg19[%c0_18, %c256] : memref<112x576xf32, #tpu.memory_space<vmem>>, vector<112x64xf32>
    tpu.vector_store %arg19[%c0_18, %c256], %14 {strides = array<i32>} : memref<112x576xf32, #tpu.memory_space<vmem>>, vector<112x64xf32>,
    %c9 = arith.constant 9 : index
    %c0_19 = arith.constant 0 : index
    %16 = vector.load %arg18[%c9, %c0_19] : memref<128x64xf32, #tpu.memory_space<vmem>>, vector<112x64xf32>
    %c0_20 = arith.constant 0 : index
    %c320 = arith.constant 320 : index
    %17 = vector.load %arg19[%c0_20, %c320] : memref<112x576xf32, #tpu.memory_space<vmem>>, vector<112x64xf32>
    tpu.vector_store %arg19[%c0_20, %c320], %16 {strides = array<i32>} : memref<112x576xf32, #tpu.memory_space<vmem>>, vector<112x64xf32>,
    %c14 = arith.constant 14 : index
    %c0_21 = arith.constant 0 : index
    %18 = vector.load %arg18[%c14, %c0_21] : memref<128x64xf32, #tpu.memory_space<vmem>>, vector<112x64xf32>
    %c0_22 = arith.constant 0 : index
    %c384 = arith.constant 384 : index
    %19 = vector.load %arg19[%c0_22, %c384] : memref<112x576xf32, #tpu.memory_space<vmem>>, vector<112x64xf32>
    tpu.vector_store %arg19[%c0_22, %c384], %18 {strides = array<i32>} : memref<112x576xf32, #tpu.memory_space<vmem>>, vector<112x64xf32>,
    %c15 = arith.constant 15 : index
    %c0_23 = arith.constant 0 : index
    %20 = vector.load %arg18[%c15, %c0_23] : memref<128x64xf32, #tpu.memory_space<vmem>>, vector<112x64xf32>
    %c0_24 = arith.constant 0 : index
    %c448 = arith.constant 448 : index
    %21 = vector.load %arg19[%c0_24, %c448] : memref<112x576xf32, #tpu.memory_space<vmem>>, vector<112x64xf32>
    tpu.vector_store %arg19[%c0_24, %c448], %20 {strides = array<i32>} : memref<112x576xf32, #tpu.memory_space<vmem>>, vector<112x64xf32>,
    %c16 = arith.constant 16 : index
    %c0_25 = arith.constant 0 : index
    %22 = vector.load %arg18[%c16, %c0_25] : memref<128x64xf32, #tpu.memory_space<vmem>>, vector<112x64xf32>
    %c0_26 = arith.constant 0 : index
    %c512 = arith.constant 512 : index
    %23 = vector.load %arg19[%c0_26, %c512] : memref<112x576xf32, #tpu.memory_space<vmem>>, vector<112x64xf32>
    tpu.vector_store %arg19[%c0_26, %c512], %22 {strides = array<i32>} : memref<112x576xf32, #tpu.memory_space<vmem>>, vector<112x64xf32>,
    %c0_27 = arith.constant 0 : index
    %c0_28 = arith.constant 0 : index
    %24 = vector.load %arg19[%c0_27, %c0_28] : memref<112x576xf32, #tpu.memory_space<vmem>>, vector<112x576xf32>
    %c0_29 = arith.constant 0 : index
    %c0_30 = arith.constant 0 : index
    %25 = vector.load %arg2[%c0_29, %c0_30] : memref<112x576xf32, #tpu.memory_space<vmem>>, vector<112x576xf32>
    %26 = arith.mulf %24, %25 : vector<112x576xf32>
    %27 = arith.truncf %26 : vector<112x576xf32> to vector<112x576xbf16>
    %c0_31 = arith.constant 0 : index
    %c0_32 = arith.constant 0 : index
    %28 = vector.load %arg20[%c0_31, %c0_32] : memref<112x576xbf16, #tpu.memory_space<vmem>>, vector<112x576xbf16>
    tpu.vector_store %arg20[%c0_31, %c0_32], %27 {strides = array<i32>} : memref<112x576xbf16, #tpu.memory_space<vmem>>, vector<112x576xbf16>,
    %c0_33 = arith.constant 0 : index
    %c0_34 = arith.constant 0 : index
    %29 = vector.load %arg20[%c0_33, %c0_34] : memref<112x576xbf16, #tpu.memory_space<vmem>>, vector<112x576xbf16>
    %c0_35 = arith.constant 0 : index
    %c0_36 = arith.constant 0 : index
    %c0_37 = arith.constant 0 : index
    %30 = vector.load %arg3[%c0_35, %c0_36, %c0_37] : memref<7x576x64xbf16, #tpu.memory_space<vmem>>, vector<1x576x64xbf16>
    %31 = vector.shape_cast %30 : vector<1x576x64xbf16> to vector<576x64xbf16>
    %cst_38 = arith.constant dense<0.000000e+00> : vector<112x64xf32>
    %32 = tpu.matmul %29, %31, %cst_38 {dimension_numbers = #tpu.dot_dimension_numbers<[1], [0], [0], [1], [0, 0, 1, 1], [], []>} : vector<112x576xbf16>, vector<576x64xbf16>, vector<112x64xf32> -> vector<112x64xf32>
    %c0_39 = arith.constant 0 : index
    %c0_40 = arith.constant 0 : index
    %c0_41 = arith.constant 0 : index
    %33 = vector.load %arg4[%c0_39, %c0_40, %c0_41] : memref<7x1x64xf32, #tpu.memory_space<vmem>>, vector<1x1x64xf32>
    %34 = vector.shape_cast %33 : vector<1x1x64xf32> to vector<1x64xf32>
    %35 = vector.broadcast %34 : vector<1x64xf32> to vector<112x64xf32>
    %36 = arith.addf %32, %35 : vector<112x64xf32>
    %cst_42 = arith.constant 0.000000e+00 : f32
    %37 = vector.broadcast %cst_42 : f32 to vector<112x64xf32>
    %38 = arith.maximumf %36, %37 : vector<112x64xf32>
    %c0_i32 = arith.constant 0 : i32
    %c3_i32 = arith.constant 3 : i32
    %39 = arith.addi %c0_i32, %c3_i32 : i32
    %c1_i32 = arith.constant 1 : i32
    %40 = scf.for %arg21 = %c0_i32 to %39 step %c1_i32 iter_args(%arg22 = %38) -> (vector<112x64xf32>)  : i32 {
      %c2_i32 = arith.constant 2 : i32
      %96 = arith.muli %c2_i32, %arg21 : i32
      %c1_i32_78 = arith.constant 1 : i32
      %97 = arith.addi %c1_i32_78, %96 : i32
      %c8_79 = arith.constant 8 : index
      %c0_80 = arith.constant 0 : index
      %98 = vector.load %arg18[%c8_79, %c0_80] : memref<128x64xf32, #tpu.memory_space<vmem>>, vector<112x64xf32>
      tpu.vector_store %arg18[%c8_79, %c0_80], %arg22 {strides = array<i32>} : memref<128x64xf32, #tpu.memory_space<vmem>>, vector<112x64xf32>,
      %c0_81 = arith.constant 0 : index
      %c0_82 = arith.constant 0 : index
      %99 = vector.load %arg18[%c0_81, %c0_82] : memref<128x64xf32, #tpu.memory_space<vmem>>, vector<112x64xf32>
      %c0_83 = arith.constant 0 : index
      %c0_84 = arith.constant 0 : index
      %100 = vector.load %arg19[%c0_83, %c0_84] : memref<112x576xf32, #tpu.memory_space<vmem>>, vector<112x64xf32>
      tpu.vector_store %arg19[%c0_83, %c0_84], %99 {strides = array<i32>} : memref<112x576xf32, #tpu.memory_space<vmem>>, vector<112x64xf32>,
      %c1_85 = arith.constant 1 : index
      %c0_86 = arith.constant 0 : index
      %101 = vector.load %arg18[%c1_85, %c0_86] : memref<128x64xf32, #tpu.memory_space<vmem>>, vector<112x64xf32>
      %c0_87 = arith.constant 0 : index
      %c64_88 = arith.constant 64 : index
      %102 = vector.load %arg19[%c0_87, %c64_88] : memref<112x576xf32, #tpu.memory_space<vmem>>, vector<112x64xf32>
      tpu.vector_store %arg19[%c0_87, %c64_88], %101 {strides = array<i32>} : memref<112x576xf32, #tpu.memory_space<vmem>>, vector<112x64xf32>,
      %c2_89 = arith.constant 2 : index
      %c0_90 = arith.constant 0 : index
      %103 = vector.load %arg18[%c2_89, %c0_90] : memref<128x64xf32, #tpu.memory_space<vmem>>, vector<112x64xf32>
      %c0_91 = arith.constant 0 : index
      %c128_92 = arith.constant 128 : index
      %104 = vector.load %arg19[%c0_91, %c128_92] : memref<112x576xf32, #tpu.memory_space<vmem>>, vector<112x64xf32>
      tpu.vector_store %arg19[%c0_91, %c128_92], %103 {strides = array<i32>} : memref<112x576xf32, #tpu.memory_space<vmem>>, vector<112x64xf32>,
      %c7_93 = arith.constant 7 : index
      %c0_94 = arith.constant 0 : index
      %105 = vector.load %arg18[%c7_93, %c0_94] : memref<128x64xf32, #tpu.memory_space<vmem>>, vector<112x64xf32>
      %c0_95 = arith.constant 0 : index
      %c192_96 = arith.constant 192 : index
      %106 = vector.load %arg19[%c0_95, %c192_96] : memref<112x576xf32, #tpu.memory_space<vmem>>, vector<112x64xf32>
      tpu.vector_store %arg19[%c0_95, %c192_96], %105 {strides = array<i32>} : memref<112x576xf32, #tpu.memory_space<vmem>>, vector<112x64xf32>,
      %c8_97 = arith.constant 8 : index
      %c0_98 = arith.constant 0 : index
      %107 = vector.load %arg18[%c8_97, %c0_98] : memref<128x64xf32, #tpu.memory_space<vmem>>, vector<112x64xf32>
      %c0_99 = arith.constant 0 : index
      %c256_100 = arith.constant 256 : index
      %108 = vector.load %arg19[%c0_99, %c256_100] : memref<112x576xf32, #tpu.memory_space<vmem>>, vector<112x64xf32>
      tpu.vector_store %arg19[%c0_99, %c256_100], %107 {strides = array<i32>} : memref<112x576xf32, #tpu.memory_space<vmem>>, vector<112x64xf32>,
      %c9_101 = arith.constant 9 : index
      %c0_102 = arith.constant 0 : index
      %109 = vector.load %arg18[%c9_101, %c0_102] : memref<128x64xf32, #tpu.memory_space<vmem>>, vector<112x64xf32>
      %c0_103 = arith.constant 0 : index
      %c320_104 = arith.constant 320 : index
      %110 = vector.load %arg19[%c0_103, %c320_104] : memref<112x576xf32, #tpu.memory_space<vmem>>, vector<112x64xf32>
      tpu.vector_store %arg19[%c0_103, %c320_104], %109 {strides = array<i32>} : memref<112x576xf32, #tpu.memory_space<vmem>>, vector<112x64xf32>,
      %c14_105 = arith.constant 14 : index
      %c0_106 = arith.constant 0 : index
      %111 = vector.load %arg18[%c14_105, %c0_106] : memref<128x64xf32, #tpu.memory_space<vmem>>, vector<112x64xf32>
      %c0_107 = arith.constant 0 : index
      %c384_108 = arith.constant 384 : index
      %112 = vector.load %arg19[%c0_107, %c384_108] : memref<112x576xf32, #tpu.memory_space<vmem>>, vector<112x64xf32>
      tpu.vector_store %arg19[%c0_107, %c384_108], %111 {strides = array<i32>} : memref<112x576xf32, #tpu.memory_space<vmem>>, vector<112x64xf32>,
      %c15_109 = arith.constant 15 : index
      %c0_110 = arith.constant 0 : index
      %113 = vector.load %arg18[%c15_109, %c0_110] : memref<128x64xf32, #tpu.memory_space<vmem>>, vector<112x64xf32>
      %c0_111 = arith.constant 0 : index
      %c448_112 = arith.constant 448 : index
      %114 = vector.load %arg19[%c0_111, %c448_112] : memref<112x576xf32, #tpu.memory_space<vmem>>, vector<112x64xf32>
      tpu.vector_store %arg19[%c0_111, %c448_112], %113 {strides = array<i32>} : memref<112x576xf32, #tpu.memory_space<vmem>>, vector<112x64xf32>,
      %c16_113 = arith.constant 16 : index
      %c0_114 = arith.constant 0 : index
      %115 = vector.load %arg18[%c16_113, %c0_114] : memref<128x64xf32, #tpu.memory_space<vmem>>, vector<112x64xf32>
      %c0_115 = arith.constant 0 : index
      %c512_116 = arith.constant 512 : index
      %116 = vector.load %arg19[%c0_115, %c512_116] : memref<112x576xf32, #tpu.memory_space<vmem>>, vector<112x64xf32>
      tpu.vector_store %arg19[%c0_115, %c512_116], %115 {strides = array<i32>} : memref<112x576xf32, #tpu.memory_space<vmem>>, vector<112x64xf32>,
      %c0_117 = arith.constant 0 : index
      %c0_118 = arith.constant 0 : index
      %117 = vector.load %arg19[%c0_117, %c0_118] : memref<112x576xf32, #tpu.memory_space<vmem>>, vector<112x576xf32>
      %c0_119 = arith.constant 0 : index
      %c0_120 = arith.constant 0 : index
      %118 = vector.load %arg2[%c0_119, %c0_120] : memref<112x576xf32, #tpu.memory_space<vmem>>, vector<112x576xf32>
      %119 = arith.mulf %117, %118 : vector<112x576xf32>
      %120 = arith.truncf %119 : vector<112x576xf32> to vector<112x576xbf16>
      %c0_121 = arith.constant 0 : index
      %c0_122 = arith.constant 0 : index
      %121 = vector.load %arg20[%c0_121, %c0_122] : memref<112x576xbf16, #tpu.memory_space<vmem>>, vector<112x576xbf16>
      tpu.vector_store %arg20[%c0_121, %c0_122], %120 {strides = array<i32>} : memref<112x576xbf16, #tpu.memory_space<vmem>>, vector<112x576xbf16>,
      %c0_123 = arith.constant 0 : index
      %c0_124 = arith.constant 0 : index
      %122 = vector.load %arg20[%c0_123, %c0_124] : memref<112x576xbf16, #tpu.memory_space<vmem>>, vector<112x576xbf16>
      %123 = arith.index_cast %97 : i32 to index
      %c0_125 = arith.constant 0 : index
      %c0_126 = arith.constant 0 : index
      %124 = vector.load %arg3[%123, %c0_125, %c0_126] : memref<7x576x64xbf16, #tpu.memory_space<vmem>>, vector<1x576x64xbf16>
      %125 = vector.shape_cast %124 : vector<1x576x64xbf16> to vector<576x64xbf16>
      %cst_127 = arith.constant dense<0.000000e+00> : vector<112x64xf32>
      %126 = tpu.matmul %122, %125, %cst_127 {dimension_numbers = #tpu.dot_dimension_numbers<[1], [0], [0], [1], [0, 0, 1, 1], [], []>} : vector<112x576xbf16>, vector<576x64xbf16>, vector<112x64xf32> -> vector<112x64xf32>
      %127 = arith.index_cast %97 : i32 to index
      %c0_128 = arith.constant 0 : index
      %c0_129 = arith.constant 0 : index
      %128 = vector.load %arg4[%127, %c0_128, %c0_129] : memref<7x1x64xf32, #tpu.memory_space<vmem>>, vector<1x1x64xf32>
      %129 = vector.shape_cast %128 : vector<1x1x64xf32> to vector<1x64xf32>
      %130 = vector.broadcast %129 : vector<1x64xf32> to vector<112x64xf32>
      %131 = arith.addf %126, %130 : vector<112x64xf32>
      %cst_130 = arith.constant 0.000000e+00 : f32
      %132 = vector.broadcast %cst_130 : f32 to vector<112x64xf32>
      %133 = arith.maximumf %131, %132 : vector<112x64xf32>
      %c2_i32_131 = arith.constant 2 : i32
      %134 = arith.muli %c2_i32_131, %arg21 : i32
      %c2_i32_132 = arith.constant 2 : i32
      %135 = arith.addi %c2_i32_132, %134 : i32
      %c8_133 = arith.constant 8 : index
      %c0_134 = arith.constant 0 : index
      %136 = vector.load %arg18[%c8_133, %c0_134] : memref<128x64xf32, #tpu.memory_space<vmem>>, vector<112x64xf32>
      tpu.vector_store %arg18[%c8_133, %c0_134], %133 {strides = array<i32>} : memref<128x64xf32, #tpu.memory_space<vmem>>, vector<112x64xf32>,
      %c0_135 = arith.constant 0 : index
      %c0_136 = arith.constant 0 : index
      %137 = vector.load %arg18[%c0_135, %c0_136] : memref<128x64xf32, #tpu.memory_space<vmem>>, vector<112x64xf32>
      %c0_137 = arith.constant 0 : index
      %c0_138 = arith.constant 0 : index
      %138 = vector.load %arg19[%c0_137, %c0_138] : memref<112x576xf32, #tpu.memory_space<vmem>>, vector<112x64xf32>
      tpu.vector_store %arg19[%c0_137, %c0_138], %137 {strides = array<i32>} : memref<112x576xf32, #tpu.memory_space<vmem>>, vector<112x64xf32>,
      %c1_139 = arith.constant 1 : index
      %c0_140 = arith.constant 0 : index
      %139 = vector.load %arg18[%c1_139, %c0_140] : memref<128x64xf32, #tpu.memory_space<vmem>>, vector<112x64xf32>
      %c0_141 = arith.constant 0 : index
      %c64_142 = arith.constant 64 : index
      %140 = vector.load %arg19[%c0_141, %c64_142] : memref<112x576xf32, #tpu.memory_space<vmem>>, vector<112x64xf32>
      tpu.vector_store %arg19[%c0_141, %c64_142], %139 {strides = array<i32>} : memref<112x576xf32, #tpu.memory_space<vmem>>, vector<112x64xf32>,
      %c2_143 = arith.constant 2 : index
      %c0_144 = arith.constant 0 : index
      %141 = vector.load %arg18[%c2_143, %c0_144] : memref<128x64xf32, #tpu.memory_space<vmem>>, vector<112x64xf32>
      %c0_145 = arith.constant 0 : index
      %c128_146 = arith.constant 128 : index
      %142 = vector.load %arg19[%c0_145, %c128_146] : memref<112x576xf32, #tpu.memory_space<vmem>>, vector<112x64xf32>
      tpu.vector_store %arg19[%c0_145, %c128_146], %141 {strides = array<i32>} : memref<112x576xf32, #tpu.memory_space<vmem>>, vector<112x64xf32>,
      %c7_147 = arith.constant 7 : index
      %c0_148 = arith.constant 0 : index
      %143 = vector.load %arg18[%c7_147, %c0_148] : memref<128x64xf32, #tpu.memory_space<vmem>>, vector<112x64xf32>
      %c0_149 = arith.constant 0 : index
      %c192_150 = arith.constant 192 : index
      %144 = vector.load %arg19[%c0_149, %c192_150] : memref<112x576xf32, #tpu.memory_space<vmem>>, vector<112x64xf32>
      tpu.vector_store %arg19[%c0_149, %c192_150], %143 {strides = array<i32>} : memref<112x576xf32, #tpu.memory_space<vmem>>, vector<112x64xf32>,
      %c8_151 = arith.constant 8 : index
      %c0_152 = arith.constant 0 : index
      %145 = vector.load %arg18[%c8_151, %c0_152] : memref<128x64xf32, #tpu.memory_space<vmem>>, vector<112x64xf32>
      %c0_153 = arith.constant 0 : index
      %c256_154 = arith.constant 256 : index
      %146 = vector.load %arg19[%c0_153, %c256_154] : memref<112x576xf32, #tpu.memory_space<vmem>>, vector<112x64xf32>
      tpu.vector_store %arg19[%c0_153, %c256_154], %145 {strides = array<i32>} : memref<112x576xf32, #tpu.memory_space<vmem>>, vector<112x64xf32>,
      %c9_155 = arith.constant 9 : index
      %c0_156 = arith.constant 0 : index
      %147 = vector.load %arg18[%c9_155, %c0_156] : memref<128x64xf32, #tpu.memory_space<vmem>>, vector<112x64xf32>
      %c0_157 = arith.constant 0 : index
      %c320_158 = arith.constant 320 : index
      %148 = vector.load %arg19[%c0_157, %c320_158] : memref<112x576xf32, #tpu.memory_space<vmem>>, vector<112x64xf32>
      tpu.vector_store %arg19[%c0_157, %c320_158], %147 {strides = array<i32>} : memref<112x576xf32, #tpu.memory_space<vmem>>, vector<112x64xf32>,
      %c14_159 = arith.constant 14 : index
      %c0_160 = arith.constant 0 : index
      %149 = vector.load %arg18[%c14_159, %c0_160] : memref<128x64xf32, #tpu.memory_space<vmem>>, vector<112x64xf32>
      %c0_161 = arith.constant 0 : index
      %c384_162 = arith.constant 384 : index
      %150 = vector.load %arg19[%c0_161, %c384_162] : memref<112x576xf32, #tpu.memory_space<vmem>>, vector<112x64xf32>
      tpu.vector_store %arg19[%c0_161, %c384_162], %149 {strides = array<i32>} : memref<112x576xf32, #tpu.memory_space<vmem>>, vector<112x64xf32>,
      %c15_163 = arith.constant 15 : index
      %c0_164 = arith.constant 0 : index
      %151 = vector.load %arg18[%c15_163, %c0_164] : memref<128x64xf32, #tpu.memory_space<vmem>>, vector<112x64xf32>
      %c0_165 = arith.constant 0 : index
      %c448_166 = arith.constant 448 : index
      %152 = vector.load %arg19[%c0_165, %c448_166] : memref<112x576xf32, #tpu.memory_space<vmem>>, vector<112x64xf32>
      tpu.vector_store %arg19[%c0_165, %c448_166], %151 {strides = array<i32>} : memref<112x576xf32, #tpu.memory_space<vmem>>, vector<112x64xf32>,
      %c16_167 = arith.constant 16 : index
      %c0_168 = arith.constant 0 : index
      %153 = vector.load %arg18[%c16_167, %c0_168] : memref<128x64xf32, #tpu.memory_space<vmem>>, vector<112x64xf32>
      %c0_169 = arith.constant 0 : index
      %c512_170 = arith.constant 512 : index
      %154 = vector.load %arg19[%c0_169, %c512_170] : memref<112x576xf32, #tpu.memory_space<vmem>>, vector<112x64xf32>
      tpu.vector_store %arg19[%c0_169, %c512_170], %153 {strides = array<i32>} : memref<112x576xf32, #tpu.memory_space<vmem>>, vector<112x64xf32>,
      %c0_171 = arith.constant 0 : index
      %c0_172 = arith.constant 0 : index
      %155 = vector.load %arg19[%c0_171, %c0_172] : memref<112x576xf32, #tpu.memory_space<vmem>>, vector<112x576xf32>
      %c0_173 = arith.constant 0 : index
      %c0_174 = arith.constant 0 : index
      %156 = vector.load %arg2[%c0_173, %c0_174] : memref<112x576xf32, #tpu.memory_space<vmem>>, vector<112x576xf32>
      %157 = arith.mulf %155, %156 : vector<112x576xf32>
      %158 = arith.truncf %157 : vector<112x576xf32> to vector<112x576xbf16>
      %c0_175 = arith.constant 0 : index
      %c0_176 = arith.constant 0 : index
      %159 = vector.load %arg20[%c0_175, %c0_176] : memref<112x576xbf16, #tpu.memory_space<vmem>>, vector<112x576xbf16>
      tpu.vector_store %arg20[%c0_175, %c0_176], %158 {strides = array<i32>} : memref<112x576xbf16, #tpu.memory_space<vmem>>, vector<112x576xbf16>,
      %c0_177 = arith.constant 0 : index
      %c0_178 = arith.constant 0 : index
      %160 = vector.load %arg20[%c0_177, %c0_178] : memref<112x576xbf16, #tpu.memory_space<vmem>>, vector<112x576xbf16>
      %161 = arith.index_cast %135 : i32 to index
      %c0_179 = arith.constant 0 : index
      %c0_180 = arith.constant 0 : index
      %162 = vector.load %arg3[%161, %c0_179, %c0_180] : memref<7x576x64xbf16, #tpu.memory_space<vmem>>, vector<1x576x64xbf16>
      %163 = vector.shape_cast %162 : vector<1x576x64xbf16> to vector<576x64xbf16>
      %cst_181 = arith.constant dense<0.000000e+00> : vector<112x64xf32>
      %164 = tpu.matmul %160, %163, %cst_181 {dimension_numbers = #tpu.dot_dimension_numbers<[1], [0], [0], [1], [0, 0, 1, 1], [], []>} : vector<112x576xbf16>, vector<576x64xbf16>, vector<112x64xf32> -> vector<112x64xf32>
      %165 = arith.index_cast %135 : i32 to index
      %c0_182 = arith.constant 0 : index
      %c0_183 = arith.constant 0 : index
      %166 = vector.load %arg4[%165, %c0_182, %c0_183] : memref<7x1x64xf32, #tpu.memory_space<vmem>>, vector<1x1x64xf32>
      %167 = vector.shape_cast %166 : vector<1x1x64xf32> to vector<1x64xf32>
      %168 = vector.broadcast %167 : vector<1x64xf32> to vector<112x64xf32>
      %169 = arith.addf %164, %168 : vector<112x64xf32>
      %170 = arith.addf %169, %arg22 : vector<112x64xf32>
      %cst_184 = arith.constant 0.000000e+00 : f32
      %171 = vector.broadcast %cst_184 : f32 to vector<112x64xf32>
      %172 = arith.maximumf %170, %171 : vector<112x64xf32>
      scf.yield %172 : vector<112x64xf32>
    }
    %c3_i32_43 = arith.constant 3 : i32
    %41 = arith.truncf %40 : vector<112x64xf32> to vector<112x64xbf16>
    %c0_44 = arith.constant 0 : index
    %c0_45 = arith.constant 0 : index
    %42 = vector.load %arg5[%c0_44, %c0_45] : memref<64x128xbf16, #tpu.memory_space<vmem>>, vector<64x128xbf16>
    %cst_46 = arith.constant dense<0.000000e+00> : vector<112x128xf32>
    %43 = tpu.matmul %41, %42, %cst_46 {dimension_numbers = #tpu.dot_dimension_numbers<[1], [0], [0], [1], [0, 0, 1, 1], [], []>} : vector<112x64xbf16>, vector<64x128xbf16>, vector<112x128xf32> -> vector<112x128xf32>
    %c0_47 = arith.constant 0 : index
    %c0_48 = arith.constant 0 : index
    %44 = vector.load %arg6[%c0_47, %c0_48] : memref<1x128xf32, #tpu.memory_space<vmem>>, vector<1x128xf32>
    %45 = vector.broadcast %44 : vector<1x128xf32> to vector<112x128xf32>
    %46 = arith.addf %43, %45 : vector<112x128xf32>
    %cst_49 = arith.constant 0.000000e+00 : f32
    %47 = vector.broadcast %cst_49 : f32 to vector<112x128xf32>
    %48 = arith.maximumf %46, %47 : vector<112x128xf32>
    %c0_50 = arith.constant 0 : index
    %c0_51 = arith.constant 0 : index
    %49 = vector.load %arg10[%c0_50, %c0_51] : memref<16x112xbf16, #tpu.memory_space<vmem>>, vector<16x112xbf16>
    %50 = vector.extract_strided_slice %48 {offsets = [0, 0], sizes = [112, 1], strides = [1, 1]} : vector<112x128xf32> to vector<112x1xf32>
    %c0_52 = arith.constant 0 : index
    %c0_53 = arith.constant 0 : index
    %51 = vector.load %arg7[%c0_52, %c0_53] : memref<112x128xf32, #tpu.memory_space<vmem>>, vector<112x128xf32>
    %52 = vector.broadcast %50 : vector<112x1xf32> to vector<112x128xf32>
    %53 = arith.mulf %52, %51 : vector<112x128xf32>
    %54 = vector.extract_strided_slice %48 {offsets = [0, 1], sizes = [112, 1], strides = [1, 1]} : vector<112x128xf32> to vector<112x1xf32>
    %c0_54 = arith.constant 0 : index
    %c0_55 = arith.constant 0 : index
    %55 = vector.load %arg8[%c0_54, %c0_55] : memref<112x128xf32, #tpu.memory_space<vmem>>, vector<112x128xf32>
    %56 = vector.broadcast %54 : vector<112x1xf32> to vector<112x128xf32>
    %57 = arith.mulf %56, %55 : vector<112x128xf32>
    %58 = arith.addf %53, %57 : vector<112x128xf32>
    %59 = vector.extract_strided_slice %48 {offsets = [0, 4], sizes = [112, 1], strides = [1, 1]} : vector<112x128xf32> to vector<112x1xf32>
    %c0_56 = arith.constant 0 : index
    %c0_57 = arith.constant 0 : index
    %60 = vector.load %arg9[%c0_56, %c0_57] : memref<112x128xf32, #tpu.memory_space<vmem>>, vector<112x128xf32>
    %61 = vector.broadcast %59 : vector<112x1xf32> to vector<112x128xf32>
    %62 = arith.mulf %61, %60 : vector<112x128xf32>
    %63 = arith.truncf %58 : vector<112x128xf32> to vector<112x128xbf16>
    %cst_58 = arith.constant dense<0.000000e+00> : vector<16x128xf32>
    %64 = tpu.matmul %49, %63, %cst_58 {dimension_numbers = #tpu.dot_dimension_numbers<[1], [0], [0], [1], [0, 0, 1, 1], [], []>} : vector<16x112xbf16>, vector<112x128xbf16>, vector<16x128xf32> -> vector<16x128xf32>
    %c0_59 = arith.constant 0 : index
    %c0_60 = arith.constant 0 : index
    %65 = vector.load %arg11[%c0_59, %c0_60] : memref<1x128xf32, #tpu.memory_space<vmem>>, vector<1x128xf32>
    %66 = vector.broadcast %65 : vector<1x128xf32> to vector<16x128xf32>
    %67 = arith.addf %64, %66 : vector<16x128xf32>
    %c0_61 = arith.constant 0 : index
    %c0_62 = arith.constant 0 : index
    %68 = vector.load %arg12[%c0_61, %c0_62] : memref<16x128xf32, #tpu.memory_space<vmem>>, vector<16x128xf32>
    %69 = arith.addf %67, %68 : vector<16x128xf32>
    %cst_63 = arith.constant dense<0xFF800000> : vector<16xf32>
    %70 = vector.multi_reduction <maximumf>, %69, %cst_63 [1] : vector<16x128xf32> to vector<16xf32>
    %71 = vector.shape_cast %70 : vector<16xf32> to vector<16x1xf32>
    %72 = vector.broadcast %71 : vector<16x1xf32> to vector<16x128xf32>
    %73 = arith.subf %69, %72 : vector<16x128xf32>
    %74 = math.exp %73 : vector<16x128xf32>
    %cst_64 = arith.constant dense<0.000000e+00> : vector<16xf32>
    %75 = vector.multi_reduction <add>, %74, %cst_64 [1] : vector<16x128xf32> to vector<16xf32>
    %76 = vector.shape_cast %75 : vector<16xf32> to vector<16x1xf32>
    %77 = math.log %76 : vector<16x1xf32>
    %78 = vector.broadcast %77 : vector<16x1xf32> to vector<16x128xf32>
    %79 = arith.subf %73, %78 : vector<16x128xf32>
    %c0_65 = arith.constant 0 : index
    %c0_66 = arith.constant 0 : index
    %80 = vector.load %arg16[%c0_65, %c0_66] : memref<16x128xf32, #tpu.memory_space<vmem>>, vector<16x128xf32>
    tpu.vector_store %arg16[%c0_65, %c0_66], %79 {strides = array<i32>} : memref<16x128xf32, #tpu.memory_space<vmem>>, vector<16x128xf32>,
    %81 = arith.truncf %62 : vector<112x128xf32> to vector<112x128xbf16>
    %cst_67 = arith.constant dense<0.000000e+00> : vector<16x128xf32>
    %82 = tpu.matmul %49, %81, %cst_67 {dimension_numbers = #tpu.dot_dimension_numbers<[1], [0], [0], [1], [0, 0, 1, 1], [], []>} : vector<16x112xbf16>, vector<112x128xbf16>, vector<16x128xf32> -> vector<16x128xf32>
    %c0_68 = arith.constant 0 : index
    %c0_69 = arith.constant 0 : index
    %83 = vector.load %arg13[%c0_68, %c0_69] : memref<1x128xf32, #tpu.memory_space<vmem>>, vector<1x128xf32>
    %84 = vector.broadcast %83 : vector<1x128xf32> to vector<16x128xf32>
    %85 = arith.addf %82, %84 : vector<16x128xf32>
    %cst_70 = arith.constant 0.000000e+00 : f32
    %86 = vector.broadcast %cst_70 : f32 to vector<16x128xf32>
    %87 = arith.maximumf %85, %86 : vector<16x128xf32>
    %88 = arith.truncf %87 : vector<16x128xf32> to vector<16x128xbf16>
    %c0_71 = arith.constant 0 : index
    %c0_72 = arith.constant 0 : index
    %89 = vector.load %arg14[%c0_71, %c0_72] : memref<128x128xbf16, #tpu.memory_space<vmem>>, vector<128x128xbf16>
    %cst_73 = arith.constant dense<0.000000e+00> : vector<16x128xf32>
    %90 = tpu.matmul %88, %89, %cst_73 {dimension_numbers = #tpu.dot_dimension_numbers<[1], [0], [0], [1], [0, 0, 1, 1], [], []>} : vector<16x128xbf16>, vector<128x128xbf16>, vector<16x128xf32> -> vector<16x128xf32>
    %c0_74 = arith.constant 0 : index
    %c0_75 = arith.constant 0 : index
    %91 = vector.load %arg15[%c0_74, %c0_75] : memref<1x128xf32, #tpu.memory_space<vmem>>, vector<1x128xf32>
    %92 = vector.broadcast %91 : vector<1x128xf32> to vector<16x128xf32>
    %93 = arith.addf %90, %92 : vector<16x128xf32>
    %94 = math.tanh %93 : vector<16x128xf32>
    %c0_76 = arith.constant 0 : index
    %c0_77 = arith.constant 0 : index
    %95 = vector.load %arg17[%c0_76, %c0_77] : memref<16x128xf32, #tpu.memory_space<vmem>>, vector<16x128xf32>
    tpu.vector_store %arg17[%c0_76, %c0_77], %94 {strides = array<i32>} : memref<16x128xf32, #tpu.memory_space<vmem>>, vector<16x128xf32>,
    return
  }
  func.func @transform_0(%arg0: i32) -> (i32, i32) {
    %c0_i32 = arith.constant 0 : i32
    %c0_i32_0 = arith.constant 0 : i32
    %c0_i32_1 = arith.constant 0 : i32
    return %c0_i32, %c0_i32_0 : i32, i32
  }
  func.func @transform_1(%arg0: i32) -> (i32, i32) {
    %c0_i32 = arith.constant 0 : i32
    %c0_i32_0 = arith.constant 0 : i32
    %c0_i32_1 = arith.constant 0 : i32
    return %c0_i32, %c0_i32_0 : i32, i32
  }
  func.func @transform_2(%arg0: i32) -> (i32, i32, i32) {
    %c0_i32 = arith.constant 0 : i32
    %c0_i32_0 = arith.constant 0 : i32
    %c0_i32_1 = arith.constant 0 : i32
    %c0_i32_2 = arith.constant 0 : i32
    return %c0_i32, %c0_i32_0, %c0_i32_1 : i32, i32, i32
  }
  func.func @transform_3(%arg0: i32) -> (i32, i32, i32) {
    %c0_i32 = arith.constant 0 : i32
    %c0_i32_0 = arith.constant 0 : i32
    %c0_i32_1 = arith.constant 0 : i32
    %c0_i32_2 = arith.constant 0 : i32
    return %c0_i32, %c0_i32_0, %c0_i32_1 : i32, i32, i32
  }
  func.func @transform_4(%arg0: i32) -> (i32, i32) {
    %c0_i32 = arith.constant 0 : i32
    %c0_i32_0 = arith.constant 0 : i32
    %c0_i32_1 = arith.constant 0 : i32
    return %c0_i32, %c0_i32_0 : i32, i32
  }
  func.func @transform_5(%arg0: i32) -> (i32, i32) {
    %c0_i32 = arith.constant 0 : i32
    %c0_i32_0 = arith.constant 0 : i32
    %c0_i32_1 = arith.constant 0 : i32
    return %c0_i32, %c0_i32_0 : i32, i32
  }
  func.func @transform_6(%arg0: i32) -> (i32, i32) {
    %c0_i32 = arith.constant 0 : i32
    %c0_i32_0 = arith.constant 0 : i32
    %c0_i32_1 = arith.constant 0 : i32
    return %c0_i32, %c0_i32_0 : i32, i32
  }
  func.func @transform_7(%arg0: i32) -> (i32, i32) {
    %c0_i32 = arith.constant 0 : i32
    %c0_i32_0 = arith.constant 0 : i32
    %c0_i32_1 = arith.constant 0 : i32
    return %c0_i32, %c0_i32_0 : i32, i32
  }
  func.func @transform_8(%arg0: i32) -> (i32, i32) {
    %c0_i32 = arith.constant 0 : i32
    %c0_i32_0 = arith.constant 0 : i32
    %c0_i32_1 = arith.constant 0 : i32
    return %c0_i32, %c0_i32_0 : i32, i32
  }
  func.func @transform_9(%arg0: i32) -> (i32, i32) {
    %c0_i32 = arith.constant 0 : i32
    %c0_i32_0 = arith.constant 0 : i32
    %c0_i32_1 = arith.constant 0 : i32
    return %c0_i32, %c0_i32_0 : i32, i32
  }
  func.func @transform_10(%arg0: i32) -> (i32, i32) {
    %c0_i32 = arith.constant 0 : i32
    %c0_i32_0 = arith.constant 0 : i32
    %c0_i32_1 = arith.constant 0 : i32
    return %c0_i32, %c0_i32_0 : i32, i32
  }
  func.func @transform_11(%arg0: i32) -> (i32, i32) {
    %c0_i32 = arith.constant 0 : i32
    %c0_i32_0 = arith.constant 0 : i32
    %c0_i32_1 = arith.constant 0 : i32
    return %c0_i32, %c0_i32_0 : i32, i32
  }
  func.func @transform_12(%arg0: i32) -> (i32, i32) {
    %c0_i32 = arith.constant 0 : i32
    %c0_i32_0 = arith.constant 0 : i32
    %c0_i32_1 = arith.constant 0 : i32
    return %c0_i32, %c0_i32_0 : i32, i32
  }
  func.func @transform_13(%arg0: i32) -> (i32, i32) {
    %c0_i32 = arith.constant 0 : i32
    %c0_i32_0 = arith.constant 0 : i32
    %c0_i32_1 = arith.constant 0 : i32
    return %c0_i32, %c0_i32_0 : i32, i32
  }
  func.func @transform_14(%arg0: i32) -> (i32, i32) {
    %c0_i32 = arith.constant 0 : i32
    %c0_i32_0 = arith.constant 0 : i32
    %c0_i32_1 = arith.constant 0 : i32
    return %c0_i32, %c0_i32_0 : i32, i32
  }
  func.func @transform_15(%arg0: i32) -> (i32, i32) {
    %c0_i32 = arith.constant 0 : i32
    %c0_i32_0 = arith.constant 0 : i32
    %c0_i32_1 = arith.constant 0 : i32
    return %c0_i32, %c0_i32_0 : i32, i32
  }
  func.func @transform_16(%arg0: i32) -> (i32, i32) {
    %c0_i32 = arith.constant 0 : i32
    %c0_i32_0 = arith.constant 0 : i32
    %c0_i32_1 = arith.constant 0 : i32
    return %c0_i32, %c0_i32_0 : i32, i32
  }
}

</mosaic_0001>

<bundles_post_ra>
// kernel: alphazero_forward.1
= control target key start
LH: loop header
LB: loop body
LE: loop exit
PB: predicated region body
PF: predicated region fallthrough
CT: control target
= control target key end

     0   :  { %vm53_vm0 = vcmask 523264   ;;  %v6446_v0 = vmov 0.0   ;;  %vm182_vm1 = vcmask 1048064   ;;  %vm6448_vm2 = vmmov 0   ;;  %s9025_s0 = inlined_call_operand.vmem [shape: f32[112,64], index: 0, kind: input, shape index: {}]   ;;  %s9026_s4 = inlined_call_operand.vmem [shape: bf16[64,128], index: 4, kind: input, shape index: {}]   ;;  %s9027_s5 = inlined_call_operand.vmem [shape: f32[1,128], index: 5, kind: input, shape index: {}]   ;;  %s9028_s6 = inlined_call_operand.vmem [shape: f32[112,128], index: 6, kind: input, shape index: {}]   ;;  %s9029_s7 = inlined_call_operand.vmem [shape: f32[112,128], index: 7, kind: input, shape index: {}]   ;;  %s9030_s8 = inlined_call_operand.vmem [shape: f32[112,128], index: 8, kind: input, shape index: {}]   ;;  %s9031_s9 = inlined_call_operand.vmem [shape: bf16[16,112], index: 9, kind: input, shape index: {}]   ;;  %s9032_s10 = inlined_call_operand.vmem [shape: f32[1,128], index: 10, kind: input, shape index: {}]   ;;  %s9033_s11 = inlined_call_operand.vmem [shape: f32[16,128], index: 11, kind: input, shape index: {}]   ;;  %s9034_s12 = inlined_call_operand.vmem [shape: f32[1,128], index: 12, kind: input, shape index: {}]   ;;  %s9035_s13 = inlined_call_operand.vmem [shape: bf16[128,128], index: 13, kind: input, shape index: {}]   ;;  %s9036_s14 = inlined_call_operand.vmem [shape: f32[1,128], index: 14, kind: input, shape index: {}]   ;;  %s9037_s15 = inlined_call_operand.vmem [shape: f32[16,128], index: 15, kind: output, shape index: {0}]   ;;  %s9038_s16 = inlined_call_operand.vmem [shape: f32[16,128], index: 16, kind: output, shape index: {1}]   ;;  %s9039_s2 = inlined_call_operand.vmem [shape: bf16[7,576,64], index: 2, kind: input, shape index: {}]   ;;  %s9040_s1 = inlined_call_operand.vmem [shape: f32[112,576], index: 1, kind: input, shape index: {}]   ;;  %s9041_s3 = inlined_call_operand.vmem [shape: f32[7,1,64], index: 3, kind: input, shape index: {}]  }
   0x1   :  { %9043 = sst [smem:[#allocation5_spill]] %s9025_s0  ;;  %54 = vst.msk [vmem:[#allocation2] sm:$0xff] %vm53_vm0, %v6446_v0  ;;  %55 = vst.msk [vmem:[#allocation2 + $0x78] sm:$0xff] %vm53_vm0, %v6446_v0  ;;  %v6171_v15 = vld [vmem:[%s9039_s2 + $0x40] sm:$0xff]   ;;  %v6173_v18 = vld [vmem:[%s9039_s2 + $0x48] sm:$0xff]   ;;  %s7257_s0 = smov 0  }
   0x2   :  { %s9044_s23 = sld [smem:[#allocation5_spill]]  ;;  %v6172_v16 = vld [vmem:[%s9039_s2] sm:$0xff]   ;;  %5417 = vmatprep.subr.bf16.mxu0 %v6171_v15  ;;  %v6174_v40 = vld [vmem:[%s9039_s2 + $0x8] sm:$0xff]   ;;  %v6175_v43 = vld [vmem:[%s9039_s2 + $0x50] sm:$0xff]  }
   0x3   :  { %5418 = vmatpush3.bf16.msra.mxu0 %v6172_v16  ;;  %v6176_v45 = vld [vmem:[%s9039_s2 + $0x10] sm:$0xff]   ;;  %v6177_v47 = vld [vmem:[%s9039_s2 + $0x58] sm:$0xff]   ;;  %v6179_v53 = vld [vmem:[%s9039_s2 + $0xc0] sm:$0xff]  }
   0x4   :  { %5419 = vmatprep.subr.bf16.mxu0 %v6173_v18  ;;  %v6178_v51 = vld [vmem:[%s9039_s2 + $0x18] sm:$0xff]   ;;  %v6180_v54 = vld [vmem:[%s9039_s2 + $0x60] sm:$0xff]   ;;  %5475 = vmatprep.subr.bf16.mxu1 %v6179_v53  ;;  %v6183_v61 = vld [vmem:[%s9039_s2 + $0xc8] sm:$0xff]  }
   0x5   :  { %v6181_v55 = vld [vmem:[%s9039_s2 + $0x80] sm:$0xff]   ;;  %v6184_v62 = vld [vmem:[%s9039_s2 + $0x68] sm:$0xff]  }
   0x6   :  { %v6182_v57 = vld [vmem:[%s9039_s2 + $0x20] sm:$0xff]   ;;  %5476 = vmatpush3.bf16.msra.mxu1 %v6181_v55 }
   0x7   :  { %5420 = vmatpush3.bf16.msra.mxu0 %v6174_v40  ;;  %5477 = vmatprep.subr.bf16.mxu1 %v6183_v61  ;;  %v6195_v16 = vld [vmem:[%s9039_s2 + $0xe0] sm:$0xff]  }
   0x8   :  { %v56_v1 = vld [vmem:[%s9044_s23] sm:$0xff]  ;;  %v57_v2 = vld [vmem:[%s9044_s23 + $0x8] sm:$0xff]  ;;  %v58_v3 = vld [vmem:[%s9044_s23 + $0x10] sm:$0xff]  ;;  %5421 = vmatprep.subr.bf16.mxu0 %v6175_v43 }
   0x9   :  { %70 = vst.msk [vmem:[#allocation2 + $0x8] sm:$0xff] %vm53_vm0, %v56_v1  ;;  %71 = vst.msk [vmem:[#allocation2 + $0x10] sm:$0xff] %vm53_vm0, %v57_v2  ;;  %v59_v4 = vld [vmem:[%s9044_s23 + $0x18] sm:$0xff]  ;;  %v60_v5 = vld [vmem:[%s9044_s23 + $0x20] sm:$0xff] }
   0xa   :  { %72 = vst.msk [vmem:[#allocation2 + $0x18] sm:$0xff] %vm53_vm0, %v58_v3  ;;  %v61_v6 = vld [vmem:[%s9044_s23 + $0x28] sm:$0xff]  ;;  %73 = vst.msk [vmem:[#allocation2 + $0x20] sm:$0xff] %vm53_vm0, %v59_v4  ;;  %v62_v7 = vld [vmem:[%s9044_s23 + $0x30] sm:$0xff] }
   0xb   :  { %74 = vst.msk [vmem:[#allocation2 + $0x28] sm:$0xff] %vm53_vm0, %v60_v5  ;;  %75 = vst.msk [vmem:[#allocation2 + $0x30] sm:$0xff] %vm53_vm0, %v61_v6  ;;  %v63_v8 = vld [vmem:[%s9044_s23 + $0x38] sm:$0xff]  ;;  %v64_v9 = vld [vmem:[%s9044_s23 + $0x40] sm:$0xff]  ;;  %5422 = vmatpush3.bf16.msra.mxu0 %v6176_v45 }
   0xc   :  { %76 = vst.msk [vmem:[#allocation2 + $0x38] sm:$0xff] %vm53_vm0, %v62_v7  ;;  %77 = vst.msk [vmem:[#allocation2 + $0x40] sm:$0xff] %vm53_vm0, %v63_v8  ;;  %v65_v10 = vld [vmem:[%s9044_s23 + $0x48] sm:$0xff]  ;;  %v66_v11 = vld [vmem:[%s9044_s23 + $0x50] sm:$0xff]  ;;  %5423 = vmatprep.subr.bf16.mxu0 %v6177_v47 }
   0xd   :  { %78 = vst.msk [vmem:[#allocation2 + $0x48] sm:$0xff] %vm53_vm0, %v64_v9  ;;  %v67_v12 = vld [vmem:[%s9044_s23 + $0x58] sm:$0xff]  ;;  %79 = vst.msk [vmem:[#allocation2 + $0x50] sm:$0xff] %vm53_vm0, %v65_v10  ;;  %v68_v13 = vld [vmem:[%s9044_s23 + $0x60] sm:$0xff] }
   0xe   :  { %80 = vst.msk [vmem:[#allocation2 + $0x58] sm:$0xff] %vm53_vm0, %v66_v11  ;;  %81 = vst.msk [vmem:[#allocation2 + $0x60] sm:$0xff] %vm53_vm0, %v67_v12  ;;  %v69_v14 = vld [vmem:[%s9044_s23 + $0x68] sm:$0xff]  ;;  %v546_v17 = vld [vmem:[#allocation2 + $0x78] sm:$0xff]  ;;  %s6447_s23 = smov 64  }
   0xf   :  { %82 = vst.msk [vmem:[#allocation2 + $0x68] sm:$0xff] %vm53_vm0, %v68_v13  ;;  %83 = vst.msk [vmem:[#allocation2 + $0x70] sm:$0xff] %vm53_vm0, %v69_v14  ;;  %v84_v42 = vld [vmem:[#allocation2] sm:$0xff]  ;;  %5424 = vmatpush3.bf16.msra.mxu0 %v6178_v51  ;;  %v6185_v1 = vld [vmem:[%s9039_s2 + $0x88] sm:$0xff]  }
  0x10   :  { %v225_v19 = vld [vmem:[#allocation2 + $0x7] sm:$0xff]  ;;  %560 = vst.msk [vmem:[#allocation3 + $0x228] sm:$0xff] %vm53_vm0, %v546_v17  ;;  %v226_v21 = vld [vmem:[#allocation2 + $0xf] sm:$0xff]  ;;  %98 = vst.msk [vmem:[#allocation3] sm:$0xff] %vm53_vm0, %v84_v42  ;;  %5425 = vmatprep.subr.bf16.mxu0 %v6180_v54  ;;  %5478 = vmatpush3.bf16.msra.mxu1 %v6185_v1 }
  0x11   :  { %v112_v20 = vld [vmem:[#allocation2 + $0x1] sm:$0xff]  ;;  %253 = vrot.lane.b32.xlu0 %v225_v19, %s6447_s23  ;;  %v533_v22 = vld [vmem:[#allocation2 + $0x10] sm:$0xff]  ;;  %v534_v24 = vld [vmem:[#allocation2 + $0x18] sm:$0xff] }
  0x12   :  { %140 = vrot.lane.b32.xlu1 %v112_v20, %s6447_s23  ;;  %547 = vst.msk [vmem:[#allocation3 + $0x20] sm:$0xff] %vm53_vm0, %v533_v22  ;;  %v6613_v23 = vld [vmem:[#allocation2 + $0x9] sm:$0xff]  ;;  %v535_v25 = vld [vmem:[#allocation2 + $0x20] sm:$0xff]  ;;  %100 = vst.msk [vmem:[#allocation3 + $0x50] sm:$0xff] %vm53_vm0, %v533_v22 }
  0x13   :  { %324 = vst.msk [vmem:[#allocation3 + $0x38] sm:$0xff] %vm53_vm0, %v533_v22  ;;  %548 = vst.msk [vmem:[#allocation3 + $0x48] sm:$0xff] %vm53_vm0, %v534_v24  ;;  %v536_v26 = vld [vmem:[#allocation2 + $0x28] sm:$0xff]  ;;  %v537_v27 = vld [vmem:[#allocation2 + $0x30] sm:$0xff]  ;;  %5426 = vmatpush3.bf16.msra.mxu0 %v6182_v57 }
  0x14   :  { %549 = vst.msk [vmem:[#allocation3 + $0x70] sm:$0xff] %vm53_vm0, %v535_v25  ;;  %101 = vst.msk [vmem:[#allocation3 + $0x78] sm:$0xff] %vm53_vm0, %v534_v24  ;;  %v227_v28 = vld [vmem:[#allocation2 + $0x17] sm:$0xff]  ;;  %v6632_v29 = vld [vmem:[#allocation2 + $0x1f] sm:$0xff]  ;;  %5427 = vmatprep.subr.bf16.mxu0 %v6184_v62 }
  0x15   :  { %102 = vst.msk [vmem:[#allocation3 + $0xa0] sm:$0xff] %vm53_vm0, %v535_v25  ;;  %325 = vst.msk [vmem:[#allocation3 + $0x60] sm:$0xff] %vm53_vm0, %v534_v24  ;;  %255 = vrot.lane.b32.xlu0 %v226_v21, %s6447_s23  ;;  %v538_v30 = vld [vmem:[#allocation2 + $0x38] sm:$0xff]  ;;  %v539_v31 = vld [vmem:[#allocation2 + $0x40] sm:$0xff] }
  0x16   :  { %326 = vst.msk [vmem:[#allocation3 + $0x88] sm:$0xff] %vm53_vm0, %v535_v25  ;;  %142 = vrot.lane.b32.xlu1 %v6613_v23, %s6447_s23  ;;  %550 = vst.msk [vmem:[#allocation3 + $0x98] sm:$0xff] %vm53_vm0, %v536_v26  ;;  %v540_v32 = vld [vmem:[#allocation2 + $0x48] sm:$0xff]  ;;  %v541_v33 = vld [vmem:[#allocation2 + $0x50] sm:$0xff] }
  0x17   :  { %551 = vst.msk [vmem:[#allocation3 + $0xc0] sm:$0xff] %vm53_vm0, %v537_v27  ;;  %103 = vst.msk [vmem:[#allocation3 + $0xc8] sm:$0xff] %vm53_vm0, %v536_v26  ;;  %v542_v34 = vld [vmem:[#allocation2 + $0x58] sm:$0xff]  ;;  %v543_v35 = vld [vmem:[#allocation2 + $0x60] sm:$0xff] }
  0x18   :  { %104 = vst.msk [vmem:[#allocation3 + $0xf0] sm:$0xff] %vm53_vm0, %v537_v27  ;;  %327 = vst.msk [vmem:[#allocation3 + $0xb0] sm:$0xff] %vm53_vm0, %v536_v26  ;;  %v544_v36 = vld [vmem:[#allocation2 + $0x68] sm:$0xff]  ;;  %v545_v37 = vld [vmem:[#allocation2 + $0x70] sm:$0xff] }
  0x19   :  { %328 = vst.msk [vmem:[#allocation3 + $0xd8] sm:$0xff] %vm53_vm0, %v537_v27  ;;  %552 = vst.msk [vmem:[#allocation3 + $0xe8] sm:$0xff] %vm53_vm0, %v538_v30  ;;  %257 = vrot.lane.b32.xlu0 %v227_v28, %s6447_s23  ;;  %v114_v38 = vld [vmem:[#allocation2 + $0x11] sm:$0xff]  ;;  %v6650_v39 = vld [vmem:[#allocation2 + $0x19] sm:$0xff] }
  0x1a   :  { %553 = vst.msk [vmem:[#allocation3 + $0x110] sm:$0xff] %vm53_vm0, %v539_v31  ;;  %105 = vst.msk [vmem:[#allocation3 + $0x118] sm:$0xff] %vm53_vm0, %v538_v30  ;;  %259 = vrot.lane.b32.xlu1 %v6632_v29, %s6447_s23  ;;  %v197_v41 = vld [vmem:[#allocation2 + $0x2] sm:$0xff]  ;;  %v198_v44 = vld [vmem:[#allocation2 + $0xa] sm:$0xff] }
  0x1b   :  { %106 = vst.msk [vmem:[#allocation3 + $0x140] sm:$0xff] %vm53_vm0, %v539_v31  ;;  %554 = vst.msk [vmem:[#allocation3 + $0x138] sm:$0xff] %vm53_vm0, %v540_v32  ;;  %v85_v46 = vld [vmem:[#allocation2 + $0x8] sm:$0xff]  ;;  %v199_v50 = vld [vmem:[#allocation2 + $0x12] sm:$0xff] }
  0x1c   :  { %555 = vst.msk [vmem:[#allocation3 + $0x160] sm:$0xff] %vm53_vm0, %v541_v33  ;;  %107 = vst.msk [vmem:[#allocation3 + $0x168] sm:$0xff] %vm53_vm0, %v540_v32  ;;  %v229_v48 = vld [vmem:[#allocation2 + $0x27] sm:$0xff]  ;;  %v6675_v49 = vld [vmem:[#allocation2 + $0x2f] sm:$0xff] }
  0x1d   :  { %556 = vst.msk [vmem:[#allocation3 + $0x188] sm:$0xff] %vm53_vm0, %v542_v34  ;;  %557 = vst.msk [vmem:[#allocation3 + $0x1b0] sm:$0xff] %vm53_vm0, %v543_v35  ;;  %477 = vrot.lane.b32.xlu0 %v226_v21, %s6447_s23  ;;  %v200_v52 = vld [vmem:[#allocation2 + $0x1a] sm:$0xff]  ;;  %v421_v56 = vld [vmem:[#allocation2 + $0xe] sm:$0xff] }
  0x1e   :  { %479 = vrot.lane.b32.xlu1 %v227_v28, %s6447_s23  ;;  %558 = vst.msk [vmem:[#allocation3 + $0x1d8] sm:$0xff] %vm53_vm0, %v544_v36  ;;  %559 = vst.msk [vmem:[#allocation3 + $0x200] sm:$0xff] %vm53_vm0, %v545_v37  ;;  %v422_v58 = vld [vmem:[#allocation2 + $0x16] sm:$0xff]  ;;  %v116_v59 = vld [vmem:[#allocation2 + $0x21] sm:$0xff] }
  0x1f   :  { %211 = vst.msk [vmem:[#allocation3 + $0x8] sm:$0xff] %vm53_vm0, %v197_v41  ;;  %212 = vst.msk [vmem:[#allocation3 + $0x30] sm:$0xff] %vm53_vm0, %v198_v44  ;;  %v6698_v60 = vld [vmem:[#allocation2 + $0x29] sm:$0xff]  ;;  %v231_v7 = vld [vmem:[#allocation2 + $0x37] sm:$0xff] }
  0x20   :  { %99 = vst.msk [vmem:[#allocation3 + $0x28] sm:$0xff] %vm53_vm0, %v85_v46  ;;  %323 = vst.msk [vmem:[#allocation3 + $0x10] sm:$0xff] %vm53_vm0, %v85_v46  ;;  %v201_v63 = vld [vmem:[#allocation2 + $0x22] sm:$0xff]  ;;  %v6187_v3 = vld [vmem:[%s9039_s2 + $0xd0] sm:$0xff]  }
  0x21   :  { %144 = vrot.lane.b32.xlu0 %v114_v38, %s6447_s23  ;;  %213 = vst.msk [vmem:[#allocation3 + $0x58] sm:$0xff] %vm53_vm0, %v199_v50  ;;  %214 = vst.msk [vmem:[#allocation3 + $0x80] sm:$0xff] %vm53_vm0, %v200_v52  ;;  %v6186_v2 = vld [vmem:[%s9039_s2 + $0x28] sm:$0xff]   ;;  %v6188_v5 = vld [vmem:[%s9039_s2 + $0x70] sm:$0xff]   ;;  %5479 = vmatprep.subr.bf16.mxu1 %v6187_v3 }
  0x22   :  { %146 = vrot.lane.b32.xlu1 %v6650_v39, %s6447_s23  ;;  %435 = vst.msk [vmem:[#allocation3 + $0x18] sm:$0xff] %vm53_vm0, %v421_v56  ;;  %436 = vst.msk [vmem:[#allocation3 + $0x40] sm:$0xff] %vm53_vm0, %v422_v58  ;;  %v202_v4 = vld [vmem:[#allocation2 + $0x2a] sm:$0xff]  ;;  %5428 = vmatpush3.bf16.msra.mxu0 %v6186_v2  ;;  %v232_v9 = vld [vmem:[#allocation2 + $0x3f] sm:$0xff] }
  0x23   :  { %215 = vst.msk [vmem:[#allocation3 + $0xa8] sm:$0xff] %vm53_vm0, %v201_v63  ;;  %216 = vst.msk [vmem:[#allocation3 + $0xd0] sm:$0xff] %vm53_vm0, %v202_v4  ;;  %v6189_v6 = vld [vmem:[%s9039_s2 + $0x90] sm:$0xff]   ;;  %5429 = vmatprep.subr.bf16.mxu0 %v6188_v5  ;;  %v423_v10 = vld [vmem:[#allocation2 + $0x1e] sm:$0xff] }
  0x24   :  { %v6190_v8 = vld [vmem:[%s9039_s2 + $0x30] sm:$0xff]   ;;  %5480 = vmatpush3.bf16.msra.mxu1 %v6189_v6  ;;  %v6191_v11 = vld [vmem:[%s9039_s2 + $0xd8] sm:$0xff]   ;;  %437 = vst.msk [vmem:[#allocation3 + $0x68] sm:$0xff] %vm53_vm0, %v423_v10  ;;  %v424_v15 = vld [vmem:[#allocation2 + $0x26] sm:$0xff] }
  0x25   :  { %365 = vrot.lane.b32.xlu0 %v6613_v23, %s6447_s23  ;;  %v6192_v12 = vld [vmem:[%s9039_s2 + $0x78] sm:$0xff]   ;;  %5481 = vmatprep.subr.bf16.mxu1 %v6191_v11  ;;  %438 = vst.msk [vmem:[#allocation3 + $0x90] sm:$0xff] %vm53_vm0, %v424_v15  ;;  %v6196_v18 = vld [vmem:[%s9039_s2 + $0xa0] sm:$0xff]   ;;  %v6197_v21 = vld [vmem:[%s9039_s2 + $0xe8] sm:$0xff]  }
  0x26   :  { %367 = vrot.lane.b32.xlu1 %v114_v38, %s6447_s23  ;;  %5430 = vmatpush3.bf16.msra.mxu0 %v6190_v8  ;;  %v6193_v13 = vld [vmem:[%s9039_s2 + $0x98] sm:$0xff]   ;;  %v6198_v22 = vld [vmem:[%s9039_s2 + $0xa8] sm:$0xff]   ;;  %v6199_v24 = vld [vmem:[%s9039_s2 + $0xf0] sm:$0xff]  }
  0x27   :  { %v6194_v14 = vld [vmem:[%s9039_s2 + $0x38] sm:$0xff]   ;;  %5431 = vmatprep.subr.bf16.mxu0 %v6192_v12  ;;  %v6200_v25 = vld [vmem:[%s9039_s2 + $0xb0] sm:$0xff]   ;;  %v233_v26 = vld [vmem:[#allocation2 + $0x47] sm:$0xff] }
  0x28   :  { %5482 = vmatpush3.bf16.msra.mxu1 %v6193_v13  ;;  %v118_v17 = vld [vmem:[#allocation2 + $0x31] sm:$0xff]  ;;  %v6762_v20 = vld [vmem:[#allocation2 + $0x39] sm:$0xff]  ;;  %v205_v32 = vld [vmem:[#allocation2 + $0x42] sm:$0xff] }
  0x29   :  { %261 = vrot.lane.b32.xlu0 %v229_v48, %s6447_s23  ;;  %v203_v19 = vld [vmem:[#allocation2 + $0x32] sm:$0xff]  ;;  %5483 = vmatprep.subr.bf16.mxu1 %v6195_v16  ;;  %v204_v23 = vld [vmem:[#allocation2 + $0x3a] sm:$0xff]  ;;  %219 = vst.msk [vmem:[#allocation3 + $0x148] sm:$0xff] %vm53_vm0, %v205_v32  ;;  %v206_v33 = vld [vmem:[#allocation2 + $0x4a] sm:$0xff] }
  0x2a   :  { %263 = vrot.lane.b32.xlu1 %v6675_v49, %s6447_s23  ;;  %5432 = vmatpush3.bf16.msra.mxu0 %v6194_v14  ;;  %217 = vst.msk [vmem:[#allocation3 + $0xf8] sm:$0xff] %vm53_vm0, %v203_v19  ;;  %218 = vst.msk [vmem:[#allocation3 + $0x120] sm:$0xff] %vm53_vm0, %v204_v23  ;;  %v6201_v27 = vld [vmem:[%s9039_s2 + $0xf8] sm:$0xff]   ;;  %v425_v28 = vld [vmem:[#allocation2 + $0x2e] sm:$0xff] }
  0x2b   :  { %5834 = vmatprep.subr.bf16.mxu0 %v6446_v0  ;;  %439 = vst.msk [vmem:[#allocation3 + $0xb8] sm:$0xff] %vm53_vm0, %v425_v28  ;;  %v6202_v30 = vld [vmem:[%s9039_s2 + $0xb8] sm:$0xff]   ;;  %220 = vst.msk [vmem:[#allocation3 + $0x170] sm:$0xff] %vm53_vm0, %v206_v33  ;;  %v428_v35 = vld [vmem:[#allocation2 + $0x46] sm:$0xff] }
  0x2c   :  { %5484 = vmatpush3.bf16.msra.mxu1 %v6196_v18  ;;  %v426_v31 = vld [vmem:[#allocation2 + $0x36] sm:$0xff]  ;;  %v427_v34 = vld [vmem:[#allocation2 + $0x3e] sm:$0xff]  ;;  %v121_v37 = vld [vmem:[#allocation2 + $0x49] sm:$0xff]  ;;  %442 = vst.msk [vmem:[#allocation3 + $0x130] sm:$0xff] %vm53_vm0, %v428_v35 }
  0x2d   :  { %481 = vrot.lane.b32.xlu0 %v6632_v29, %s6447_s23  ;;  %5485 = vmatprep.subr.bf16.mxu1 %v6197_v21  ;;  %v234_v29 = vld [vmem:[#allocation2 + $0x4f] sm:$0xff]  ;;  %440 = vst.msk [vmem:[#allocation3 + $0xe0] sm:$0xff] %vm53_vm0, %v426_v31  ;;  %441 = vst.msk [vmem:[#allocation3 + $0x108] sm:$0xff] %vm53_vm0, %v427_v34  ;;  %v120_v36 = vld [vmem:[#allocation2 + $0x41] sm:$0xff] }
  0x2e   :  { %483 = vrot.lane.b32.xlu1 %v229_v48, %s6447_s23  ;;  %v315_v38 = vld [vmem:[#allocation2 + $0x38] sm:$0xff]  ;;  %v429_v42 = vld [vmem:[#allocation2 + $0x4e] sm:$0xff]  ;;  %v432_v54 = vld [vmem:[#allocation2 + $0x66] sm:$0xff] }
  0x2f   :  { %329 = vst.msk [vmem:[#allocation3 + $0x100] sm:$0xff] %vm53_vm0, %v315_v38  ;;  %v207_v40 = vld [vmem:[#allocation2 + $0x52] sm:$0xff]  ;;  %v208_v41 = vld [vmem:[#allocation2 + $0x5a] sm:$0xff]  ;;  %443 = vst.msk [vmem:[#allocation3 + $0x158] sm:$0xff] %vm53_vm0, %v429_v42 }
  0x30   :  { %5486 = vmatpush3.bf16.msra.mxu1 %v6198_v22  ;;  %221 = vst.msk [vmem:[#allocation3 + $0x198] sm:$0xff] %vm53_vm0, %v207_v40  ;;  %222 = vst.msk [vmem:[#allocation3 + $0x1c0] sm:$0xff] %vm53_vm0, %v208_v41  ;;  %v430_v43 = vld [vmem:[#allocation2 + $0x56] sm:$0xff]  ;;  %v236_v47 = vld [vmem:[#allocation2 + $0x5f] sm:$0xff] }
  0x31   :  { %148 = vrot.lane.b32.xlu0 %v116_v59, %s6447_s23  ;;  %5487 = vmatprep.subr.bf16.mxu1 %v6199_v24  ;;  %444 = vst.msk [vmem:[#allocation3 + $0x180] sm:$0xff] %vm53_vm0, %v430_v43  ;;  %v94_v44 = vld [vmem:[#allocation2 + $0x50] sm:$0xff]  ;;  %v95_v45 = vld [vmem:[#allocation2 + $0x58] sm:$0xff]  ;;  %v317_v48 = vld [vmem:[#allocation2 + $0x48] sm:$0xff] }
  0x32   :  { %150 = vrot.lane.b32.xlu1 %v6698_v60, %s6447_s23  ;;  %108 = vst.msk [vmem:[#allocation3 + $0x190] sm:$0xff] %vm53_vm0, %v94_v44  ;;  %109 = vst.msk [vmem:[#allocation3 + $0x1b8] sm:$0xff] %vm53_vm0, %v95_v45  ;;  %v235_v46 = vld [vmem:[#allocation2 + $0x57] sm:$0xff]  ;;  %v210_v50 = vld [vmem:[#allocation2 + $0x6a] sm:$0xff] }
  0x33   :  { %332 = vst.msk [vmem:[#allocation3 + $0x178] sm:$0xff] %vm53_vm0, %v94_v44  ;;  %333 = vst.msk [vmem:[#allocation3 + $0x1a0] sm:$0xff] %vm53_vm0, %v95_v45  ;;  %v122_v51 = vld [vmem:[#allocation2 + $0x51] sm:$0xff]  ;;  %v123_v52 = vld [vmem:[#allocation2 + $0x59] sm:$0xff] }
  0x34   :  { %5488 = vmatpush3.bf16.msra.mxu1 %v6200_v25  ;;  %331 = vst.msk [vmem:[#allocation3 + $0x150] sm:$0xff] %vm53_vm0, %v317_v48  ;;  %224 = vst.msk [vmem:[#allocation3 + $0x210] sm:$0xff] %vm53_vm0, %v210_v50  ;;  %v431_v53 = vld [vmem:[#allocation2 + $0x5e] sm:$0xff]  ;;  %v97_v56 = vld [vmem:[#allocation2 + $0x68] sm:$0xff] }
  0x35   :  { %369 = vrot.lane.b32.xlu0 %v6650_v39, %s6447_s23  ;;  %5489 = vmatprep.subr.bf16.mxu1 %v6201_v27  ;;  %v316_v39 = vld [vmem:[#allocation2 + $0x40] sm:$0xff]  ;;  %445 = vst.msk [vmem:[#allocation3 + $0x1a8] sm:$0xff] %vm53_vm0, %v431_v53  ;;  %446 = vst.msk [vmem:[#allocation3 + $0x1d0] sm:$0xff] %vm53_vm0, %v432_v54  ;;  %v238_v58 = vld [vmem:[#allocation2 + $0x6f] sm:$0xff] }
  0x36   :  { %371 = vrot.lane.b32.xlu1 %v116_v59, %s6447_s23  ;;  %330 = vst.msk [vmem:[#allocation3 + $0x128] sm:$0xff] %vm53_vm0, %v316_v39  ;;  %v96_v55 = vld [vmem:[#allocation2 + $0x60] sm:$0xff]  ;;  %111 = vst.msk [vmem:[#allocation3 + $0x208] sm:$0xff] %vm53_vm0, %v97_v56  ;;  %v433_v59 = vld [vmem:[#allocation2 + $0x6e] sm:$0xff] }
  0x37   :  { %110 = vst.msk [vmem:[#allocation3 + $0x1e0] sm:$0xff] %vm53_vm0, %v96_v55  ;;  %334 = vst.msk [vmem:[#allocation3 + $0x1c8] sm:$0xff] %vm53_vm0, %v96_v55  ;;  %v237_v57 = vld [vmem:[#allocation2 + $0x67] sm:$0xff]  ;;  %v322_v6 = vld [vmem:[#allocation2 + $0x70] sm:$0xff] }
  0x38   :  { %5490 = vmatpush3.bf16.msra.mxu1 %v6202_v30  ;;  %335 = vst.msk [vmem:[#allocation3 + $0x1f0] sm:$0xff] %vm53_vm0, %v97_v56  ;;  %447 = vst.msk [vmem:[#allocation3 + $0x1f8] sm:$0xff] %vm53_vm0, %v433_v59  ;;  %v565_v61 = vld [vmem:[#allocation3 + $0x20] sm:$0xff]  ;;  %v570_v62 = vld [vmem:[#allocation3 + $0x48] sm:$0xff] }
  0x39   :  { %265 = vrot.lane.b32.xlu0 %v231_v7, %s6447_s23  ;;  %6034 = vmatprep.subr.bf16.mxu1 %v6446_v0  ;;  %v635_v63 = vld [vmem:[%s9040_s1 + $0x20] sm:$0xff]  ;;  %v640_v1 = vld [vmem:[%s9040_s1 + $0x48] sm:$0xff]  ;;  %336 = vst.msk [vmem:[#allocation3 + $0x218] sm:$0xff] %vm53_vm0, %v322_v6  ;;  %v575_v8 = vld [vmem:[#allocation3 + $0x70] sm:$0xff] }
  0x3a   :  { %267 = vrot.lane.b32.xlu1 %v232_v9, %s6447_s23  ;;  %v705_v2 = vmul.f32 %v635_v63, %v565_v61  ;;  %v710_v3 = vmul.f32 %v640_v1, %v570_v62  ;;  %v124_v4 = vld [vmem:[#allocation2 + $0x61] sm:$0xff]  ;;  %v125_v5 = vld [vmem:[#allocation2 + $0x69] sm:$0xff]  ;;  %v650_v11 = vld [vmem:[%s9040_s1 + $0x98] sm:$0xff] }
  0x3b   :  { %v645_v10 = vld [vmem:[%s9040_s1 + $0x70] sm:$0xff]  ;;  %v605_v15 = vld [vmem:[#allocation3 + $0x160] sm:$0xff]  ;;  %v610_v16 = vld [vmem:[#allocation3 + $0x188] sm:$0xff] }
  0x3c   :  { %v715_v12 = vmul.f32 %v645_v10, %v575_v8  ;;  %v462_v13 = vld [vmem:[#allocation2 + $0x77] sm:$0xff]  ;;  %v675_v18 = vld [vmem:[%s9040_s1 + $0x160] sm:$0xff]  ;;  %v680_v19 = vld [vmem:[%s9040_s1 + $0x188] sm:$0xff] }
  0x3d   :  { %485 = vrot.lane.b32.xlu0 %v6675_v49, %s6447_s23  ;;  %v209_v49 = vld [vmem:[#allocation2 + $0x62] sm:$0xff]  ;;  %v750_v21 = vmul.f32 %v680_v19, %v610_v16  ;;  %v350_v22 = vld [vmem:[#allocation2 + $0x71] sm:$0xff] }
  0x3e   :  { %487 = vrot.lane.b32.xlu1 %v231_v7, %s6447_s23  ;;  %223 = vst.msk [vmem:[#allocation3 + $0x1e8] sm:$0xff] %vm53_vm0, %v209_v49  ;;  %v775_v7 = vpack.c.bf16 %v710_v3, %v705_v2  ;;  %v585_v24 = vld [vmem:[#allocation3 + $0xc0] sm:$0xff]  ;;  %v590_v25 = vld [vmem:[#allocation3 + $0xe8] sm:$0xff]  ;;  %v615_v31 = vld [vmem:[#allocation3 + $0x1b0] sm:$0xff] }
  0x3f   :  { %v660_v27 = vld [vmem:[%s9040_s1 + $0xe8] sm:$0xff]  ;;  %v620_v32 = vld [vmem:[#allocation3 + $0x1d8] sm:$0xff]  ;;  %v685_v33 = vld [vmem:[%s9040_s1 + $0x1b0] sm:$0xff] }
  0x40   :  { %810 = vst.msk [vmem:[#allocation4 + $0x20] sm:$0xff] %vm53_vm0, %v775_v7  ;;  %v690_v34 = vld [vmem:[%s9040_s1 + $0x1d8] sm:$0xff]  ;;  %v755_v35 = vmul.f32 %v685_v33, %v615_v31  ;;  %v595_v40 = vld [vmem:[#allocation3 + $0x110] sm:$0xff]  ;;  %v625_v49 = vld [vmem:[#allocation3 + $0x200] sm:$0xff] }
  0x41   :  { %152 = vrot.lane.b32.xlu0 %v118_v17, %s6447_s23  ;;  %v600_v41 = vld [vmem:[#allocation3 + $0x138] sm:$0xff]  ;;  %v665_v42 = vld [vmem:[%s9040_s1 + $0x110] sm:$0xff]  ;;  %v630_v50 = vld [vmem:[#allocation3 + $0x228] sm:$0xff] }
  0x42   :  { %154 = vrot.lane.b32.xlu1 %v6762_v20, %s6447_s23  ;;  %v670_v43 = vld [vmem:[%s9040_s1 + $0x138] sm:$0xff]  ;;  %v735_v44 = vmul.f32 %v665_v42, %v595_v40  ;;  %v636_v59 = vld [vmem:[%s9040_s1 + $0x28] sm:$0xff]  ;;  %v637_v63 = vld [vmem:[%s9040_s1 + $0x30] sm:$0xff] }
  0x43   :  { %v740_v45 = vmul.f32 %v670_v43, %v600_v41  ;;  %v647_v10 = vld [vmem:[%s9040_s1 + $0x80] sm:$0xff]  ;;  %v646_v31 = vld [vmem:[%s9040_s1 + $0x78] sm:$0xff]  ;;  %v6955_v33 = vld [vmem:[%s9039_s2 + $0x110] sm:$0xff]  }
  0x44   :  { %v633_v40 = vld [vmem:[%s9040_s1 + $0x10] sm:$0xff]  ;;  %v638_v41 = vld [vmem:[%s9040_s1 + $0x38] sm:$0xff] }
  0x45   :  { %373 = vrot.lane.b32.xlu0 %v6698_v60, %s6447_s23  ;;  %v434_v60 = vld [vmem:[#allocation2 + $0x76] sm:$0xff]  ;;  %v790_v48 = vpack.c.bf16 %v740_v45, %v735_v44 }
  0x46   :  { %375 = vrot.lane.b32.xlu1 %v118_v17, %s6447_s23  ;;  %448 = vst.msk [vmem:[#allocation3 + $0x220] sm:$0xff] %vm53_vm0, %v434_v60  ;;  %v632_v60 = vld [vmem:[%s9040_s1 + $0x8] sm:$0xff]  ;;  %v6970_v43 = vld [vmem:[%s9039_s2 + $0x118] sm:$0xff]  }
  0x47   :  { %825 = vst.msk [vmem:[#allocation4 + $0x98] sm:$0xff] %vm53_vm0, %v790_v48 }
  0x49   :  { %269 = vrot.lane.b32.xlu0 %v233_v26, %s6447_s23 }
  0x4a   :  { %271 = vrot.lane.b32.xlu1 %v234_v29, %s6447_s23 }
  0x4d   :  { %489 = vrot.lane.b32.xlu0 %v232_v9, %s6447_s23  ;;  %v580_v9 = vld [vmem:[#allocation3 + $0x98] sm:$0xff] }
  0x4e   :  { %491 = vrot.lane.b32.xlu1 %v233_v26, %s6447_s23  ;;  %v720_v14 = vmul.f32 %v650_v11, %v580_v9  ;;  %v655_v26 = vld [vmem:[%s9040_s1 + $0xc0] sm:$0xff]  ;;  %v642_v9 = vld [vmem:[%s9040_s1 + $0x58] sm:$0xff] }
  0x4f   :  { %v725_v28 = vmul.f32 %v655_v26, %v585_v24 }
  0x50   :  { %v780_v17 = vpack.c.bf16 %v720_v14, %v715_v12 }
  0x51   :  { %156 = vrot.lane.b32.xlu0 %v120_v36, %s6447_s23 }
  0x52   :  { %158 = vrot.lane.b32.xlu1 %v121_v37, %s6447_s23  ;;  %815 = vst.msk [vmem:[#allocation4 + $0x48] sm:$0xff] %vm53_vm0, %v780_v17 }
  0x55   :  { %377 = vrot.lane.b32.xlu0 %v6762_v20, %s6447_s23  ;;  %v745_v20 = vmul.f32 %v675_v18, %v605_v15 }
  0x56   :  { %379 = vrot.lane.b32.xlu1 %v120_v36, %s6447_s23  ;;  %v760_v36 = vmul.f32 %v690_v34, %v620_v32 }
  0x57   :  { %v795_v23 = vpack.c.bf16 %v750_v21, %v745_v20  ;;  %v634_v20 = vld [vmem:[%s9040_s1 + $0x18] sm:$0xff]  ;;  %v639_v21 = vld [vmem:[%s9040_s1 + $0x40] sm:$0xff] }
  0x58   :  { %v800_v39 = vpack.c.bf16 %v760_v36, %v755_v35 }
  0x59   :  { %273 = vrot.lane.b32.xlu0 %v235_v46, %s6447_s23  ;;  %830 = vst.msk [vmem:[#allocation4 + $0xc0] sm:$0xff] %vm53_vm0, %v795_v23  ;;  %v6940_v23 = vld [vmem:[%s9039_s2 + $0x108] sm:$0xff]  }
  0x5a   :  { %275 = vrot.lane.b32.xlu1 %v236_v47, %s6447_s23  ;;  %835 = vst.msk [vmem:[#allocation4 + $0xe8] sm:$0xff] %vm53_vm0, %v800_v39 }
  0x5d   :  { %493 = vrot.lane.b32.xlu0 %v234_v29, %s6447_s23  ;;  %v730_v29 = vmul.f32 %v660_v27, %v590_v25 }
  0x5e   :  { %495 = vrot.lane.b32.xlu1 %v235_v46, %s6447_s23 }
  0x5f   :  { %v785_v30 = vpack.c.bf16 %v730_v29, %v725_v28 }
  0x61   :  { %160 = vrot.lane.b32.xlu0 %v122_v51, %s6447_s23  ;;  %820 = vst.msk [vmem:[#allocation4 + $0x70] sm:$0xff] %vm53_vm0, %v785_v30  ;;  %v641_v30 = vld [vmem:[%s9040_s1 + $0x50] sm:$0xff] }
  0x62   :  { %162 = vrot.lane.b32.xlu1 %v123_v52, %s6447_s23 }
  0x65   :  { %381 = vrot.lane.b32.xlu0 %v121_v37, %s6447_s23 }
  0x66   :  { %383 = vrot.lane.b32.xlu1 %v122_v51, %s6447_s23  ;;  %v695_v51 = vld [vmem:[%s9040_s1 + $0x200] sm:$0xff] }
  0x67   :  { %v765_v53 = vmul.f32 %v695_v51, %v625_v49  ;;  %v657_v51 = vld [vmem:[%s9040_s1 + $0xd0] sm:$0xff] }
  0x69   :  { %277 = vrot.lane.b32.xlu0 %v237_v57, %s6447_s23 }
  0x6a   :  { %279 = vrot.lane.b32.xlu1 %v238_v58, %s6447_s23 }
  0x6d   :  { %497 = vrot.lane.b32.xlu0 %v236_v47, %s6447_s23 }
  0x6e   :  { %499 = vrot.lane.b32.xlu1 %v237_v57, %s6447_s23 }
  0x71   :  { %164 = vrot.lane.b32.xlu0 %v124_v4, %s6447_s23 }
  0x72   :  { %166 = vrot.lane.b32.xlu1 %v125_v5, %s6447_s23 }
  0x75   :  { %385 = vrot.lane.b32.xlu0 %v123_v52, %s6447_s23  ;;  %v700_v52 = vld [vmem:[%s9040_s1 + $0x228] sm:$0xff] }
  0x76   :  { %387 = vrot.lane.b32.xlu1 %v124_v4, %s6447_s23  ;;  %v770_v54 = vmul.f32 %v700_v52, %v630_v50  ;;  %v652_v50 = vld [vmem:[%s9040_s1 + $0xa8] sm:$0xff] }
  0x78   :  { %v805_v57 = vpack.c.bf16 %v770_v54, %v765_v53 }
  0x79   :  { %501 = vrot.lane.b32.xlu0 %v238_v58, %s6447_s23  ;;  %v631_v58 = vld [vmem:[%s9040_s1] sm:$0xff] }
  0x7a   :  { %503 = vrot.lane.b32.xlu1 %v462_v13, %s6447_s23  ;;  %840 = vst.msk [vmem:[#allocation4 + $0x110] sm:$0xff] %vm53_vm0, %v805_v57  ;;  %v6926_v13 = vld [vmem:[%s9039_s2 + $0x100] sm:$0xff]  }
  0x7d   :  { %389 = vrot.lane.b32.xlu0 %v125_v5, %s6447_s23 }
  0x7e   :  { %391 = vrot.lane.b32.xlu1 %v350_v22, %s6447_s23 }
  0x83   :  { %v254_v37 = vpop.permute.xlu0 %253 }
  0x84   :  { %v141_v38 = vpop.permute.xlu1 %140  ;;  %295 = vst.msk [vmem:[#allocation3 + $0x8] sm:$0xff] %vm182_vm1, %v254_v37 }
  0x85   :  { %183 = vst.msk [vmem:[#allocation3] sm:$0xff] %vm182_vm1, %v141_v38 }
  0x87   :  { %v256_v46 = vpop.permute.xlu0 %255 }
  0x88   :  { %v143_v47 = vpop.permute.xlu1 %142  ;;  %296 = vst.msk [vmem:[#allocation3 + $0x30] sm:$0xff] %vm182_vm1, %v256_v46 }
  0x89   :  { %184 = vst.msk [vmem:[#allocation3 + $0x28] sm:$0xff] %vm182_vm1, %v143_v47 }
  0x8b   :  { %v258_v55 = vpop.permute.xlu0 %257  ;;  %v562_v61 = vld [vmem:[#allocation3 + $0x8] sm:$0xff] }
  0x8c   :  { %v260_v56 = vpop.permute.xlu1 %259  ;;  %297 = vst.msk [vmem:[#allocation3 + $0x58] sm:$0xff] %vm182_vm1, %v258_v55  ;;  %v561_v62 = vld [vmem:[#allocation3] sm:$0xff]  ;;  %v702_v7 = vmul.f32 %v632_v60, %v562_v61  ;;  %v649_v60 = vld [vmem:[%s9040_s1 + $0x90] sm:$0xff] }
  0x8d   :  { %298 = vst.msk [vmem:[#allocation3 + $0x80] sm:$0xff] %vm182_vm1, %v260_v56  ;;  %v701_v5 = vmul.f32 %v631_v58, %v561_v62 }
  0x8f   :  { %v567_v1 = vld [vmem:[#allocation3 + $0x30] sm:$0xff]  ;;  %v478_v3 = vpop.permute.xlu0 %477 }
  0x90   :  { %v566_v2 = vld [vmem:[#allocation3 + $0x28] sm:$0xff]  ;;  %v480_v4 = vpop.permute.xlu1 %479  ;;  %519 = vst.msk [vmem:[#allocation3 + $0x18] sm:$0xff] %vm182_vm1, %v478_v3  ;;  %v707_v8 = vmul.f32 %v637_v63, %v567_v1 }
  0x91   :  { %v706_v6 = vmul.f32 %v636_v59, %v566_v2  ;;  %520 = vst.msk [vmem:[#allocation3 + $0x40] sm:$0xff] %vm182_vm1, %v480_v4  ;;  %v644_v59 = vld [vmem:[%s9040_s1 + $0x68] sm:$0xff] }
  0x92   :  { %v772_v11 = vpack.c.bf16 %v707_v8, %v702_v7 }
  0x93   :  { %v771_v12 = vpack.c.bf16 %v706_v6, %v701_v5  ;;  %v572_v14 = vld [vmem:[#allocation3 + $0x58] sm:$0xff]  ;;  %v145_v16 = vpop.permute.xlu0 %144  ;;  %v651_v5 = vld [vmem:[%s9040_s1 + $0xa0] sm:$0xff]  ;;  %v656_v6 = vld [vmem:[%s9040_s1 + $0xc8] sm:$0xff] }
  0x94   :  { %v577_v15 = vld [vmem:[#allocation3 + $0x80] sm:$0xff]  ;;  %v147_v17 = vpop.permute.xlu1 %146  ;;  %v712_v18 = vmul.f32 %v642_v9, %v572_v14  ;;  %185 = vst.msk [vmem:[#allocation3 + $0x50] sm:$0xff] %vm182_vm1, %v145_v16  ;;  %1224 = vmatprep.mubr.bf16.mxu0 %v772_v11 }
  0x95   :  { %v717_v19 = vmul.f32 %v647_v10, %v577_v15  ;;  %186 = vst.msk [vmem:[#allocation3 + $0x78] sm:$0xff] %vm182_vm1, %v147_v17  ;;  %1225 = vmatmul.mubr.bf16.vlgmr.msra.gmra.mrb[0].mxu0 %v771_v12  ;;  %v643_v14 = vld [vmem:[%s9040_s1 + $0x60] sm:$0xff]  ;;  %v648_v15 = vld [vmem:[%s9040_s1 + $0x88] sm:$0xff] }
  0x96   :  { %5835 = vmatpush3.bf16.msra.mxu0 %v6926_v13 }
  0x97   :  { %v777_v22 = vpack.c.bf16 %v717_v19, %v712_v18  ;;  %v564_v24 = vld [vmem:[#allocation3 + $0x18] sm:$0xff]  ;;  %v366_v26 = vpop.permute.xlu0 %365  ;;  %5836 = vmatprep.subr.bf16.mxu0 %v6446_v0 }
  0x98   :  { %v569_v25 = vld [vmem:[#allocation3 + $0x40] sm:$0xff]  ;;  %v368_v27 = vpop.permute.xlu1 %367  ;;  %407 = vst.msk [vmem:[#allocation3 + $0x10] sm:$0xff] %vm182_vm1, %v366_v26  ;;  %v704_v28 = vmul.f32 %v634_v20, %v564_v24 }
  0x99   :  { %408 = vst.msk [vmem:[#allocation3 + $0x38] sm:$0xff] %vm182_vm1, %v368_v27  ;;  %1232 = vmatprep.mubr.bf16.mxu0 %v777_v22  ;;  %v709_v29 = vmul.f32 %v639_v21, %v569_v25  ;;  %v667_v24 = vld [vmem:[%s9040_s1 + $0x120] sm:$0xff] }
  0x9a   :  { %5837 = vmatpush3.bf16.msra.mxu0 %v6940_v23 }
  0x9b   :  { %v774_v32 = vpack.c.bf16 %v709_v29, %v704_v28  ;;  %v571_v34 = vld [vmem:[#allocation3 + $0x50] sm:$0xff]  ;;  %v262_v36 = vpop.permute.xlu0 %261  ;;  %5838 = vmatprep.subr.bf16.mxu0 %v6446_v0 }
  0x9c   :  { %v576_v35 = vld [vmem:[#allocation3 + $0x78] sm:$0xff]  ;;  %v264_v37 = vpop.permute.xlu1 %263  ;;  %v711_v38 = vmul.f32 %v641_v30, %v571_v34  ;;  %299 = vst.msk [vmem:[#allocation3 + $0xa8] sm:$0xff] %vm182_vm1, %v262_v36 }
  0x9d   :  { %v716_v39 = vmul.f32 %v646_v31, %v576_v35  ;;  %300 = vst.msk [vmem:[#allocation3 + $0xd0] sm:$0xff] %vm182_vm1, %v264_v37  ;;  %1313 = vmatprep.mubr.bf16.mxu1 %v774_v32  ;;  %v654_v32 = vld [vmem:[%s9040_s1 + $0xb8] sm:$0xff] }
  0x9e   :  { %5839 = vmatpush3.bf16.msra.mxu0 %v6955_v33 }
  0x9f   :  { %v776_v42 = vpack.c.bf16 %v716_v39, %v711_v38  ;;  %v563_v44 = vld [vmem:[#allocation3 + $0x10] sm:$0xff]  ;;  %v482_v46 = vpop.permute.xlu0 %481  ;;  %5840 = vmatprep.subr.bf16.mxu0 %v6446_v0 }
  0xa0   :  { %v568_v45 = vld [vmem:[#allocation3 + $0x38] sm:$0xff]  ;;  %v484_v47 = vpop.permute.xlu1 %483  ;;  %v703_v48 = vmul.f32 %v633_v40, %v563_v44  ;;  %521 = vst.msk [vmem:[#allocation3 + $0x68] sm:$0xff] %vm182_vm1, %v482_v46 }
  0xa1   :  { %v708_v49 = vmul.f32 %v638_v41, %v568_v45  ;;  %522 = vst.msk [vmem:[#allocation3 + $0x90] sm:$0xff] %vm182_vm1, %v484_v47  ;;  %1233 = vmatmul.mubr.bf16.gmra.mrb[4].mxu0 %v776_v42  ;;  %v661_v41 = vld [vmem:[%s9040_s1 + $0xf0] sm:$0xff]  ;;  %v666_v42 = vld [vmem:[%s9040_s1 + $0x118] sm:$0xff] }
  0xa2   :  { %5841 = vmatpush3.bf16.msra.mxu0 %v6970_v43 }
  0xa3   :  { %v773_v52 = vpack.c.bf16 %v708_v49, %v703_v48  ;;  %v582_v53 = vld [vmem:[#allocation3 + $0xa8] sm:$0xff]  ;;  %v149_v55 = vpop.permute.xlu0 %148 }
  0xa4   :  { %v587_v54 = vld [vmem:[#allocation3 + $0xd0] sm:$0xff]  ;;  %v151_v56 = vpop.permute.xlu1 %150  ;;  %v722_v57 = vmul.f32 %v652_v50, %v582_v53  ;;  %187 = vst.msk [vmem:[#allocation3 + $0xa0] sm:$0xff] %vm182_vm1, %v149_v55 }
  0xa5   :  { %v727_v58 = vmul.f32 %v657_v51, %v587_v54  ;;  %188 = vst.msk [vmem:[#allocation3 + $0xc8] sm:$0xff] %vm182_vm1, %v151_v56  ;;  %1314 = vmatmul.mubr.bf16.vlgmr.msra.gmra.mrb[0].mxu1 %v773_v52  ;;  %v653_v50 = vld [vmem:[%s9040_s1 + $0xb0] sm:$0xff]  ;;  %v658_v51 = vld [vmem:[%s9040_s1 + $0xd8] sm:$0xff] }
  0xa6   :  { %6038 = vmatpush3.bf16.msra.mxu1 %v6926_v13 }
  0xa7   :  { %v782_v61 = vpack.c.bf16 %v727_v58, %v722_v57  ;;  %6035 = vmatprep.subr.bf16.mxu1 %v6446_v0  ;;  %v574_v62 = vld [vmem:[#allocation3 + $0x68] sm:$0xff]  ;;  %v370_v1 = vpop.permute.xlu0 %369 }
  0xa8   :  { %v579_v63 = vld [vmem:[#allocation3 + $0x90] sm:$0xff]  ;;  %v372_v2 = vpop.permute.xlu1 %371  ;;  %v714_v3 = vmul.f32 %v644_v59, %v574_v62  ;;  %409 = vst.msk [vmem:[#allocation3 + $0x60] sm:$0xff] %vm182_vm1, %v370_v1  ;;  %v672_v59 = vld [vmem:[%s9040_s1 + $0x148] sm:$0xff] }
  0xa9   :  { %v719_v4 = vmul.f32 %v649_v60, %v579_v63  ;;  %410 = vst.msk [vmem:[#allocation3 + $0x88] sm:$0xff] %vm182_vm1, %v372_v2  ;;  %1240 = vmatprep.mubr.bf16.mxu0 %v782_v61  ;;  %v677_v60 = vld [vmem:[%s9040_s1 + $0x170] sm:$0xff] }
  0xaa   :  { %6039 = vmatpush3.bf16.msra.mxu1 %v6940_v23  ;;  %v662_v23 = vld [vmem:[%s9040_s1 + $0xf8] sm:$0xff] }
  0xab   :  { %v779_v7 = vpack.c.bf16 %v719_v4, %v714_v3  ;;  %6036 = vmatprep.subr.bf16.mxu1 %v6446_v0  ;;  %v581_v8 = vld [vmem:[#allocation3 + $0xa0] sm:$0xff]  ;;  %v266_v10 = vpop.permute.xlu0 %265 }
  0xac   :  { %v586_v9 = vld [vmem:[#allocation3 + $0xc8] sm:$0xff]  ;;  %v268_v11 = vpop.permute.xlu1 %267  ;;  %v721_v12 = vmul.f32 %v651_v5, %v581_v8  ;;  %301 = vst.msk [vmem:[#allocation3 + $0xf8] sm:$0xff] %vm182_vm1, %v266_v10 }
  0xad   :  { %v726_v13 = vmul.f32 %v656_v6, %v586_v9  ;;  %302 = vst.msk [vmem:[#allocation3 + $0x120] sm:$0xff] %vm182_vm1, %v268_v11  ;;  %1321 = vmatprep.mubr.bf16.mxu1 %v779_v7  ;;  %v664_v5 = vld [vmem:[%s9040_s1 + $0x108] sm:$0xff]  ;;  %v669_v6 = vld [vmem:[%s9040_s1 + $0x130] sm:$0xff] }
  0xae   :  { %6040 = vmatpush3.bf16.msra.mxu1 %v6955_v33  ;;  %v659_v33 = vld [vmem:[%s9040_s1 + $0xe0] sm:$0xff] }
  0xaf   :  { %v781_v16 = vpack.c.bf16 %v726_v13, %v721_v12  ;;  %6037 = vmatprep.subr.bf16.mxu1 %v6446_v0  ;;  %v573_v17 = vld [vmem:[#allocation3 + $0x60] sm:$0xff]  ;;  %v486_v19 = vpop.permute.xlu0 %485 }
  0xb0   :  { %v578_v18 = vld [vmem:[#allocation3 + $0x88] sm:$0xff]  ;;  %v488_v20 = vpop.permute.xlu1 %487  ;;  %v713_v21 = vmul.f32 %v643_v14, %v573_v17  ;;  %523 = vst.msk [vmem:[#allocation3 + $0xb8] sm:$0xff] %vm182_vm1, %v486_v19  ;;  %v671_v14 = vld [vmem:[%s9040_s1 + $0x140] sm:$0xff] }
  0xb1   :  { %v718_v22 = vmul.f32 %v648_v15, %v578_v18  ;;  %524 = vst.msk [vmem:[#allocation3 + $0xe0] sm:$0xff] %vm182_vm1, %v488_v20  ;;  %1241 = vmatmul.mubr.bf16.gmra.mrb[8].mxu0 %v781_v16  ;;  %v676_v15 = vld [vmem:[%s9040_s1 + $0x168] sm:$0xff] }
  0xb2   :  { %6041 = vmatpush3.bf16.msra.mxu1 %v6970_v43 }
  0xb3   :  { %v778_v25 = vpack.c.bf16 %v718_v22, %v713_v21  ;;  %v592_v26 = vld [vmem:[#allocation3 + $0xf8] sm:$0xff]  ;;  %v153_v28 = vpop.permute.xlu0 %152 }
  0xb4   :  { %v597_v27 = vld [vmem:[#allocation3 + $0x120] sm:$0xff]  ;;  %v155_v29 = vpop.permute.xlu1 %154  ;;  %v732_v30 = vmul.f32 %v662_v23, %v592_v26  ;;  %189 = vst.msk [vmem:[#allocation3 + $0xf0] sm:$0xff] %vm182_vm1, %v153_v28 }
  0xb5   :  { %v737_v31 = vmul.f32 %v667_v24, %v597_v27  ;;  %190 = vst.msk [vmem:[#allocation3 + $0x118] sm:$0xff] %vm182_vm1, %v155_v29  ;;  %1322 = vmatmul.mubr.bf16.gmra.mrb[4].mxu1 %v778_v25  ;;  %v663_v23 = vld [vmem:[%s9040_s1 + $0x100] sm:$0xff]  ;;  %v668_v24 = vld [vmem:[%s9040_s1 + $0x128] sm:$0xff] }
  0xb7   :  { %v787_v34 = vpack.c.bf16 %v737_v31, %v732_v30  ;;  %v584_v35 = vld [vmem:[#allocation3 + $0xb8] sm:$0xff]  ;;  %v374_v37 = vpop.permute.xlu0 %373 }
  0xb8   :  { %v589_v36 = vld [vmem:[#allocation3 + $0xe0] sm:$0xff]  ;;  %v376_v38 = vpop.permute.xlu1 %375  ;;  %v724_v39 = vmul.f32 %v654_v32, %v584_v35  ;;  %411 = vst.msk [vmem:[#allocation3 + $0xb0] sm:$0xff] %vm182_vm1, %v374_v37  ;;  %v682_v32 = vld [vmem:[%s9040_s1 + $0x198] sm:$0xff] }
  0xb9   :  { %v729_v40 = vmul.f32 %v659_v33, %v589_v36  ;;  %412 = vst.msk [vmem:[#allocation3 + $0xd8] sm:$0xff] %vm182_vm1, %v376_v38  ;;  %1248 = vmatprep.mubr.bf16.mxu0 %v787_v34  ;;  %v687_v33 = vld [vmem:[%s9040_s1 + $0x1c0] sm:$0xff] }
  0xbb   :  { %v784_v43 = vpack.c.bf16 %v729_v40, %v724_v39  ;;  %v591_v44 = vld [vmem:[#allocation3 + $0xf0] sm:$0xff]  ;;  %v270_v46 = vpop.permute.xlu0 %269 }
  0xbc   :  { %v596_v45 = vld [vmem:[#allocation3 + $0x118] sm:$0xff]  ;;  %v272_v47 = vpop.permute.xlu1 %271  ;;  %v731_v48 = vmul.f32 %v661_v41, %v591_v44  ;;  %303 = vst.msk [vmem:[#allocation3 + $0x148] sm:$0xff] %vm182_vm1, %v270_v46 }
  0xbd   :  { %v736_v49 = vmul.f32 %v666_v42, %v596_v45  ;;  %304 = vst.msk [vmem:[#allocation3 + $0x170] sm:$0xff] %vm182_vm1, %v272_v47  ;;  %1329 = vmatprep.mubr.bf16.mxu1 %v784_v43  ;;  %v674_v41 = vld [vmem:[%s9040_s1 + $0x158] sm:$0xff]  ;;  %v679_v42 = vld [vmem:[%s9040_s1 + $0x180] sm:$0xff] }
  0xbf   :  { %v786_v52 = vpack.c.bf16 %v736_v49, %v731_v48  ;;  %v583_v53 = vld [vmem:[#allocation3 + $0xb0] sm:$0xff]  ;;  %v490_v55 = vpop.permute.xlu0 %489 }
  0xc0   :  { %v588_v54 = vld [vmem:[#allocation3 + $0xd8] sm:$0xff]  ;;  %v492_v56 = vpop.permute.xlu1 %491  ;;  %v723_v57 = vmul.f32 %v653_v50, %v583_v53  ;;  %525 = vst.msk [vmem:[#allocation3 + $0x108] sm:$0xff] %vm182_vm1, %v490_v55  ;;  %v681_v50 = vld [vmem:[%s9040_s1 + $0x190] sm:$0xff] }
  0xc1   :  { %v728_v58 = vmul.f32 %v658_v51, %v588_v54  ;;  %526 = vst.msk [vmem:[#allocation3 + $0x130] sm:$0xff] %vm182_vm1, %v492_v56  ;;  %1249 = vmatmul.mubr.bf16.gmra.mrb[12].mxu0 %v786_v52  ;;  %v686_v51 = vld [vmem:[%s9040_s1 + $0x1b8] sm:$0xff] }
  0xc3   :  { %v783_v61 = vpack.c.bf16 %v728_v58, %v723_v57  ;;  %v602_v62 = vld [vmem:[#allocation3 + $0x148] sm:$0xff]  ;;  %v157_v1 = vpop.permute.xlu0 %156 }
  0xc4   :  { %v607_v63 = vld [vmem:[#allocation3 + $0x170] sm:$0xff]  ;;  %v159_v2 = vpop.permute.xlu1 %158  ;;  %v742_v3 = vmul.f32 %v672_v59, %v602_v62  ;;  %191 = vst.msk [vmem:[#allocation3 + $0x140] sm:$0xff] %vm182_vm1, %v157_v1 }
  0xc5   :  { %v747_v4 = vmul.f32 %v677_v60, %v607_v63  ;;  %192 = vst.msk [vmem:[#allocation3 + $0x168] sm:$0xff] %vm182_vm1, %v159_v2  ;;  %1330 = vmatmul.mubr.bf16.gmra.mrb[8].mxu1 %v783_v61  ;;  %v673_v59 = vld [vmem:[%s9040_s1 + $0x150] sm:$0xff]  ;;  %v678_v60 = vld [vmem:[%s9040_s1 + $0x178] sm:$0xff] }
  0xc7   :  { %v792_v7 = vpack.c.bf16 %v747_v4, %v742_v3  ;;  %v594_v8 = vld [vmem:[#allocation3 + $0x108] sm:$0xff]  ;;  %v378_v10 = vpop.permute.xlu0 %377 }
  0xc8   :  { %v599_v9 = vld [vmem:[#allocation3 + $0x130] sm:$0xff]  ;;  %v380_v11 = vpop.permute.xlu1 %379  ;;  %v734_v12 = vmul.f32 %v664_v5, %v594_v8  ;;  %413 = vst.msk [vmem:[#allocation3 + $0x100] sm:$0xff] %vm182_vm1, %v378_v10  ;;  %v692_v5 = vld [vmem:[%s9040_s1 + $0x1e8] sm:$0xff] }
  0xc9   :  { %v739_v13 = vmul.f32 %v669_v6, %v599_v9  ;;  %414 = vst.msk [vmem:[#allocation3 + $0x128] sm:$0xff] %vm182_vm1, %v380_v11  ;;  %1256 = vmatprep.mubr.bf16.mxu0 %v792_v7  ;;  %v697_v6 = vld [vmem:[%s9040_s1 + $0x210] sm:$0xff] }
  0xcb   :  { %v789_v16 = vpack.c.bf16 %v739_v13, %v734_v12  ;;  %v601_v17 = vld [vmem:[#allocation3 + $0x140] sm:$0xff]  ;;  %v274_v19 = vpop.permute.xlu0 %273 }
  0xcc   :  { %v606_v18 = vld [vmem:[#allocation3 + $0x168] sm:$0xff]  ;;  %v276_v20 = vpop.permute.xlu1 %275  ;;  %v741_v21 = vmul.f32 %v671_v14, %v601_v17  ;;  %305 = vst.msk [vmem:[#allocation3 + $0x198] sm:$0xff] %vm182_vm1, %v274_v19 }
  0xcd   :  { %v746_v22 = vmul.f32 %v676_v15, %v606_v18  ;;  %306 = vst.msk [vmem:[#allocation3 + $0x1c0] sm:$0xff] %vm182_vm1, %v276_v20  ;;  %1337 = vmatprep.mubr.bf16.mxu1 %v789_v16  ;;  %v684_v14 = vld [vmem:[%s9040_s1 + $0x1a8] sm:$0xff]  ;;  %v689_v15 = vld [vmem:[%s9040_s1 + $0x1d0] sm:$0xff] }
  0xcf   :  { %v791_v25 = vpack.c.bf16 %v746_v22, %v741_v21  ;;  %v593_v26 = vld [vmem:[#allocation3 + $0x100] sm:$0xff]  ;;  %v494_v28 = vpop.permute.xlu0 %493 }
  0xd0   :  { %v598_v27 = vld [vmem:[#allocation3 + $0x128] sm:$0xff]  ;;  %v496_v29 = vpop.permute.xlu1 %495  ;;  %v733_v30 = vmul.f32 %v663_v23, %v593_v26  ;;  %527 = vst.msk [vmem:[#allocation3 + $0x158] sm:$0xff] %vm182_vm1, %v494_v28  ;;  %v691_v23 = vld [vmem:[%s9040_s1 + $0x1e0] sm:$0xff] }
  0xd1   :  { %v738_v31 = vmul.f32 %v668_v24, %v598_v27  ;;  %528 = vst.msk [vmem:[#allocation3 + $0x180] sm:$0xff] %vm182_vm1, %v496_v29  ;;  %1257 = vmatmul.mubr.bf16.gmra.mrb[16].mxu0 %v791_v25  ;;  %v696_v24 = vld [vmem:[%s9040_s1 + $0x208] sm:$0xff] }
  0xd3   :  { %v788_v34 = vpack.c.bf16 %v738_v31, %v733_v30  ;;  %v612_v35 = vld [vmem:[#allocation3 + $0x198] sm:$0xff]  ;;  %v161_v37 = vpop.permute.xlu0 %160 }
  0xd4   :  { %v617_v36 = vld [vmem:[#allocation3 + $0x1c0] sm:$0xff]  ;;  %v163_v38 = vpop.permute.xlu1 %162  ;;  %v752_v39 = vmul.f32 %v682_v32, %v612_v35  ;;  %193 = vst.msk [vmem:[#allocation3 + $0x190] sm:$0xff] %vm182_vm1, %v161_v37 }
  0xd5   :  { %v757_v40 = vmul.f32 %v687_v33, %v617_v36  ;;  %194 = vst.msk [vmem:[#allocation3 + $0x1b8] sm:$0xff] %vm182_vm1, %v163_v38  ;;  %1338 = vmatmul.mubr.bf16.gmra.mrb[12].mxu1 %v788_v34  ;;  %v683_v32 = vld [vmem:[%s9040_s1 + $0x1a0] sm:$0xff]  ;;  %v688_v33 = vld [vmem:[%s9040_s1 + $0x1c8] sm:$0xff] }
  0xd7   :  { %v797_v43 = vpack.c.bf16 %v757_v40, %v752_v39  ;;  %v604_v44 = vld [vmem:[#allocation3 + $0x158] sm:$0xff]  ;;  %v382_v46 = vpop.permute.xlu0 %381 }
  0xd8   :  { %v609_v45 = vld [vmem:[#allocation3 + $0x180] sm:$0xff]  ;;  %v384_v47 = vpop.permute.xlu1 %383  ;;  %v744_v48 = vmul.f32 %v674_v41, %v604_v44  ;;  %415 = vst.msk [vmem:[#allocation3 + $0x150] sm:$0xff] %vm182_vm1, %v382_v46  ;;  %v694_v41 = vld [vmem:[%s9040_s1 + $0x1f8] sm:$0xff] }
  0xd9   :  { %v749_v49 = vmul.f32 %v679_v42, %v609_v45  ;;  %416 = vst.msk [vmem:[#allocation3 + $0x178] sm:$0xff] %vm182_vm1, %v384_v47  ;;  %1264 = vmatprep.mubr.bf16.mxu0 %v797_v43  ;;  %v699_v42 = vld [vmem:[%s9040_s1 + $0x220] sm:$0xff] }
  0xdb   :  { %v794_v52 = vpack.c.bf16 %v749_v49, %v744_v48  ;;  %v611_v53 = vld [vmem:[#allocation3 + $0x190] sm:$0xff]  ;;  %v278_v55 = vpop.permute.xlu0 %277  ;;  %v698_v49 = vld [vmem:[%s9040_s1 + $0x218] sm:$0xff] }
  0xdc   :  { %v616_v54 = vld [vmem:[#allocation3 + $0x1b8] sm:$0xff]  ;;  %v280_v56 = vpop.permute.xlu1 %279  ;;  %v751_v57 = vmul.f32 %v681_v50, %v611_v53  ;;  %307 = vst.msk [vmem:[#allocation3 + $0x1e8] sm:$0xff] %vm182_vm1, %v278_v55  ;;  %v693_v48 = vld [vmem:[%s9040_s1 + $0x1f0] sm:$0xff] }
  0xdd   :  { %v756_v58 = vmul.f32 %v686_v51, %v616_v54  ;;  %308 = vst.msk [vmem:[#allocation3 + $0x210] sm:$0xff] %vm182_vm1, %v280_v56  ;;  %1345 = vmatprep.mubr.bf16.mxu1 %v794_v52  ;;  %v845_v50 = vld [vmem:[#allocation4 + $0x20] sm:$0xff] }
  0xdf   :  { %v796_v61 = vpack.c.bf16 %v756_v58, %v751_v57  ;;  %v603_v62 = vld [vmem:[#allocation3 + $0x150] sm:$0xff]  ;;  %v498_v1 = vpop.permute.xlu0 %497  ;;  %v850_v57 = vld [vmem:[#allocation4 + $0x48] sm:$0xff] }
  0xe0   :  { %v608_v63 = vld [vmem:[#allocation3 + $0x178] sm:$0xff]  ;;  %v500_v2 = vpop.permute.xlu1 %499  ;;  %v743_v3 = vmul.f32 %v673_v59, %v603_v62  ;;  %529 = vst.msk [vmem:[#allocation3 + $0x1a8] sm:$0xff] %vm182_vm1, %v498_v1  ;;  %v865_v58 = vld [vmem:[#allocation4 + $0xc0] sm:$0xff]  ;;  %v855_v59 = vld [vmem:[#allocation4 + $0x70] sm:$0xff] }
  0xe1   :  { %v748_v4 = vmul.f32 %v678_v60, %v608_v63  ;;  %530 = vst.msk [vmem:[#allocation3 + $0x1d0] sm:$0xff] %vm182_vm1, %v500_v2  ;;  %1265 = vmatmul.mubr.bf16.gmra.mrb[20].mxu0 %v796_v61  ;;  %v870_v60 = vld [vmem:[#allocation4 + $0xe8] sm:$0xff]  ;;  %v860_v61 = vld [vmem:[#allocation4 + $0x98] sm:$0xff]  ;;  %v875_v62 = vld [vmem:[#allocation4 + $0x110] sm:$0xff] }
  0xe3   :  { %v793_v7 = vpack.c.bf16 %v748_v4, %v743_v3  ;;  %v622_v8 = vld [vmem:[#allocation3 + $0x1e8] sm:$0xff]  ;;  %v165_v10 = vpop.permute.xlu0 %164 }
  0xe4   :  { %v627_v9 = vld [vmem:[#allocation3 + $0x210] sm:$0xff]  ;;  %v167_v11 = vpop.permute.xlu1 %166  ;;  %v762_v12 = vmul.f32 %v692_v5, %v622_v8  ;;  %195 = vst.msk [vmem:[#allocation3 + $0x1e0] sm:$0xff] %vm182_vm1, %v165_v10  ;;  %v7179_v10 = vld [vmem:[%s9041_s3] ss:$0 sm:$0xff] }
  0xe5   :  { %v767_v13 = vmul.f32 %v697_v6, %v627_v9  ;;  %196 = vst.msk [vmem:[#allocation3 + $0x208] sm:$0xff] %vm182_vm1, %v167_v11  ;;  %1346 = vmatmul.mubr.bf16.gmra.mrb[16].mxu1 %v793_v7 }
  0xe7   :  { %v802_v16 = vpack.c.bf16 %v767_v13, %v762_v12  ;;  %v614_v17 = vld [vmem:[#allocation3 + $0x1a8] sm:$0xff]  ;;  %v386_v19 = vpop.permute.xlu0 %385 }
  0xe8   :  { %v619_v18 = vld [vmem:[#allocation3 + $0x1d0] sm:$0xff]  ;;  %v388_v20 = vpop.permute.xlu1 %387  ;;  %v754_v21 = vmul.f32 %v684_v14, %v614_v17  ;;  %417 = vst.msk [vmem:[#allocation3 + $0x1a0] sm:$0xff] %vm182_vm1, %v386_v19 }
  0xe9   :  { %v759_v22 = vmul.f32 %v689_v15, %v619_v18  ;;  %418 = vst.msk [vmem:[#allocation3 + $0x1c8] sm:$0xff] %vm182_vm1, %v388_v20  ;;  %1272 = vmatprep.mubr.bf16.mxu0 %v802_v16 }
  0xeb   :  { %v799_v25 = vpack.c.bf16 %v759_v22, %v754_v21  ;;  %v621_v26 = vld [vmem:[#allocation3 + $0x1e0] sm:$0xff]  ;;  %v502_v28 = vpop.permute.xlu0 %501 }
  0xec   :  { %v626_v27 = vld [vmem:[#allocation3 + $0x208] sm:$0xff]  ;;  %v504_v29 = vpop.permute.xlu1 %503  ;;  %v761_v30 = vmul.f32 %v691_v23, %v621_v26  ;;  %531 = vst.msk [vmem:[#allocation3 + $0x1f8] sm:$0xff] %vm182_vm1, %v502_v28 }
  0xed   :  { %v766_v31 = vmul.f32 %v696_v24, %v626_v27  ;;  %532 = vst.msk [vmem:[#allocation3 + $0x220] sm:$0xff] %vm182_vm1, %v504_v29  ;;  %1353 = vmatprep.mubr.bf16.mxu1 %v799_v25 }
  0xef   :  { %v801_v34 = vpack.c.bf16 %v766_v31, %v761_v30  ;;  %v613_v35 = vld [vmem:[#allocation3 + $0x1a0] sm:$0xff]  ;;  %v390_v37 = vpop.permute.xlu0 %389 }
  0xf0   :  { %v618_v36 = vld [vmem:[#allocation3 + $0x1c8] sm:$0xff]  ;;  %v392_v38 = vpop.permute.xlu1 %391  ;;  %v753_v39 = vmul.f32 %v683_v32, %v613_v35  ;;  %419 = vst.msk [vmem:[#allocation3 + $0x1f0] sm:$0xff] %vm182_vm1, %v390_v37 }
  0xf1   :  { %v758_v40 = vmul.f32 %v688_v33, %v618_v36  ;;  %420 = vst.msk [vmem:[#allocation3 + $0x218] sm:$0xff] %vm182_vm1, %v392_v38  ;;  %1273 = vmatmul.mubr.bf16.gmra.mrb[24].mxu0 %v801_v34 }
  0xf2   :  { %5842 = vmatprep.mubr.msk.bf16.mxu0 %vm6448_vm2, %v6446_v0 }
  0xf3   :  { %v798_v43 = vpack.c.bf16 %v758_v40, %v753_v39  ;;  %v624_v44 = vld [vmem:[#allocation3 + $0x1f8] sm:$0xff] }
  0xf4   :  { %v629_v45 = vld [vmem:[#allocation3 + $0x220] sm:$0xff]  ;;  %v764_v46 = vmul.f32 %v694_v41, %v624_v44 }
  0xf5   :  { %v769_v47 = vmul.f32 %v699_v42, %v629_v45  ;;  %1354 = vmatmul.mubr.bf16.gmra.mrb[20].mxu1 %v798_v43 }
  0xf7   :  { %v804_v51 = vpack.c.bf16 %v769_v47, %v764_v46  ;;  %v623_v52 = vld [vmem:[#allocation3 + $0x1f0] sm:$0xff] }
  0xf8   :  { %v628_v53 = vld [vmem:[#allocation3 + $0x218] sm:$0xff]  ;;  %v763_v54 = vmul.f32 %v693_v48, %v623_v52 }
  0xf9   :  { %v768_v55 = vmul.f32 %v698_v49, %v628_v53  ;;  %1361 = vmatprep.mubr.bf16.mxu1 %v804_v51  ;;  %5843 = vmatmul.mubr.msk.bf16.vlgmr.msra.gmra.mrb[28].mxu0 %vm53_vm0, %v845_v50 }
  0xfa   :  { %5846 = vmatprep.mubr.msk.bf16.mxu0 %vm6448_vm2, %v6446_v0 }
  0xfb   :  { %v803_v56 = vpack.c.bf16 %v768_v55, %v763_v54 }
  0xfd   :  { %1362 = vmatmul.mubr.bf16.gmra.mrb[24].mxu1 %v803_v56 }
  0xfe   :  { %5858 = vmatprep.mubr.msk.bf16.mxu1 %vm6448_vm2, %v6446_v0 }
 0x101   :  { %5847 = vmatmul.mubr.msk.bf16.gmra.mrb[32].mxu0 %vm53_vm0, %v850_v57 }
 0x102   :  { %5850 = vmatprep.mubr.msk.bf16.mxu0 %vm6448_vm2, %v6446_v0 }
 0x105   :  { %5859 = vmatmul.mubr.msk.bf16.vlgmr.msra.gmra.mrb[28].mxu1 %vm53_vm0, %v865_v58 }
 0x106   :  { %5862 = vmatprep.mubr.msk.bf16.mxu1 %vm6448_vm2, %v6446_v0 }
 0x109   :  { %5851 = vmatmul.mubr.msk.bf16.gmra.mrb[36].mxu0 %vm53_vm0, %v855_v59 }
 0x10a   :  { %5854 = vmatprep.mubr.msk.bf16.mxu0 %vm6448_vm2, %v6446_v0 }
 0x10d   :  { %5863 = vmatmul.mubr.msk.bf16.gmra.mrb[32].mxu1 %vm53_vm0, %v870_v60 }
 0x10e   :  { %5866 = vmatprep.mubr.msk.bf16.mxu1 %vm6448_vm2, %v6446_v0 }
 0x111   :  { %5855 = vmatmul.mubr.msk.bf16.gmra.mrb[40].mxu0 %vm53_vm0, %v860_v61 }
 0x115   :  { %5867 = vmatmul.mubr.msk.bf16.gmra.mrb[36].mxu1 %vm53_vm0, %v875_v62 }
 0x168   :  { %v5433_v63 = vpop.f32.mrb[0].mxu0 }
 0x169   :  { %v5434_v1 = vpop.f32.mrb[1].mxu0 }
 0x16a   :  { %v5435_v2 = vadd.f32 %v5434_v1, %v5433_v63  ;;  %v5436_v3 = vpop.f32.mrb[2].mxu0 }
 0x16b   :  { %v5437_v4 = vpop.f32.mrb[3].mxu0 }
 0x16c   :  { %v5438_v5 = vadd.f32 %v5437_v4, %v5436_v3  ;;  %v1227_v15 = vadd.f32 %v5435_v2, %v7179_v10 }
 0x16e   :  { %v1230_v19 = vadd.f32 %v5438_v5, %v7179_v10 }
 0x174   :  { %v5439_v6 = vpop.f32.mrb[4].mxu0 }
 0x175   :  { %v5440_v7 = vpop.f32.mrb[5].mxu0 }
 0x176   :  { %v5441_v8 = vadd.f32 %v5440_v7, %v5439_v6  ;;  %v5442_v9 = vpop.f32.mrb[6].mxu0 }
 0x177   :  { %v5443_v11 = vpop.f32.mrb[7].mxu0 }
 0x178   :  { %v5444_v12 = vadd.f32 %v5443_v11, %v5442_v9  ;;  %v5491_v13 = vpop.f32.mrb[0].mxu1  ;;  %v1235_v31 = vadd.f32 %v5441_v8, %v7179_v10 }
 0x179   :  { %v5492_v14 = vpop.f32.mrb[1].mxu1 }
 0x17a   :  { %v5493_v16 = vadd.f32 %v5492_v14, %v5491_v13  ;;  %v5494_v17 = vpop.f32.mrb[2].mxu1  ;;  %v1238_v35 = vadd.f32 %v5444_v12, %v7179_v10 }
 0x17b   :  { %v5495_v18 = vpop.f32.mrb[3].mxu1 }
 0x17c   :  { %v5496_v20 = vadd.f32 %v5495_v18, %v5494_v17  ;;  %v7183_v21 = vadd.f32 %v5493_v16, %v1227_v15 }
 0x17e   :  { %v7185_v22 = vadd.f32 %v5496_v20, %v1230_v19 }
 0x184   :  { %v5445_v23 = vpop.f32.mrb[8].mxu0 }
 0x185   :  { %v5446_v24 = vpop.f32.mrb[9].mxu0 }
 0x186   :  { %v5447_v25 = vadd.f32 %v5446_v24, %v5445_v23  ;;  %v5448_v26 = vpop.f32.mrb[10].mxu0 }
 0x187   :  { %v5449_v27 = vpop.f32.mrb[11].mxu0 }
 0x188   :  { %v5450_v28 = vadd.f32 %v5449_v27, %v5448_v26  ;;  %v5497_v29 = vpop.f32.mrb[4].mxu1  ;;  %v1243_v47 = vadd.f32 %v5447_v25, %v7179_v10 }
 0x189   :  { %v5498_v30 = vpop.f32.mrb[5].mxu1 }
 0x18a   :  { %v5499_v32 = vadd.f32 %v5498_v30, %v5497_v29  ;;  %v5500_v33 = vpop.f32.mrb[6].mxu1  ;;  %v1246_v51 = vadd.f32 %v5450_v28, %v7179_v10 }
 0x18b   :  { %v5501_v34 = vpop.f32.mrb[7].mxu1 }
 0x18c   :  { %v5502_v36 = vadd.f32 %v5501_v34, %v5500_v33  ;;  %v7189_v37 = vadd.f32 %v5499_v32, %v1235_v31 }
 0x18e   :  { %v7191_v38 = vadd.f32 %v5502_v36, %v1238_v35 }
 0x194   :  { %v5451_v39 = vpop.f32.mrb[12].mxu0 }
 0x195   :  { %v5452_v40 = vpop.f32.mrb[13].mxu0 }
 0x196   :  { %v5453_v41 = vadd.f32 %v5452_v40, %v5451_v39  ;;  %v5454_v42 = vpop.f32.mrb[14].mxu0 }
 0x197   :  { %v5455_v43 = vpop.f32.mrb[15].mxu0 }
 0x198   :  { %v5456_v44 = vadd.f32 %v5455_v43, %v5454_v42  ;;  %v5503_v45 = vpop.f32.mrb[8].mxu1  ;;  %v1251_v63 = vadd.f32 %v5453_v41, %v7179_v10 }
 0x199   :  { %v5504_v46 = vpop.f32.mrb[9].mxu1 }
 0x19a   :  { %v5505_v48 = vadd.f32 %v5504_v46, %v5503_v45  ;;  %v5506_v49 = vpop.f32.mrb[10].mxu1  ;;  %v1254_v4 = vadd.f32 %v5456_v44, %v7179_v10 }
 0x19b   :  { %v5507_v50 = vpop.f32.mrb[11].mxu1 }
 0x19c   :  { %v5508_v52 = vadd.f32 %v5507_v50, %v5506_v49  ;;  %v7195_v53 = vadd.f32 %v5505_v48, %v1243_v47 }
 0x19e   :  { %v7197_v54 = vadd.f32 %v5508_v52, %v1246_v51 }
 0x1a4   :  { %v5457_v55 = vpop.f32.mrb[16].mxu0 }
 0x1a5   :  { %v5458_v56 = vpop.f32.mrb[17].mxu0 }
 0x1a6   :  { %v5459_v57 = vadd.f32 %v5458_v56, %v5457_v55  ;;  %v5460_v58 = vpop.f32.mrb[18].mxu0 }
 0x1a7   :  { %v5461_v59 = vpop.f32.mrb[19].mxu0 }
 0x1a8   :  { %v5462_v60 = vadd.f32 %v5461_v59, %v5460_v58  ;;  %v5509_v61 = vpop.f32.mrb[12].mxu1  ;;  %v1259_v17 = vadd.f32 %v5459_v57, %v7179_v10 }
 0x1a9   :  { %v5510_v62 = vpop.f32.mrb[13].mxu1 }
 0x1aa   :  { %v5511_v1 = vadd.f32 %v5510_v62, %v5509_v61  ;;  %v5512_v2 = vpop.f32.mrb[14].mxu1  ;;  %v1262_v23 = vadd.f32 %v5462_v60, %v7179_v10 }
 0x1ab   :  { %v5513_v3 = vpop.f32.mrb[15].mxu1 }
 0x1ac   :  { %v5514_v5 = vadd.f32 %v5513_v3, %v5512_v2  ;;  %v7201_v6 = vadd.f32 %v5511_v1, %v1251_v63 }
 0x1ae   :  { %v7203_v7 = vadd.f32 %v5514_v5, %v1254_v4 }
 0x1b4   :  { %v5463_v8 = vpop.f32.mrb[20].mxu0 }
 0x1b5   :  { %v5464_v9 = vpop.f32.mrb[21].mxu0 }
 0x1b6   :  { %v5465_v11 = vadd.f32 %v5464_v9, %v5463_v8  ;;  %v5466_v12 = vpop.f32.mrb[22].mxu0 }
 0x1b7   :  { %v5467_v13 = vpop.f32.mrb[23].mxu0 }
 0x1b8   :  { %v5468_v14 = vadd.f32 %v5467_v13, %v5466_v12  ;;  %v5515_v15 = vpop.f32.mrb[16].mxu1  ;;  %v1267_v35 = vadd.f32 %v5465_v11, %v7179_v10 }
 0x1b9   :  { %v5516_v16 = vpop.f32.mrb[17].mxu1 }
 0x1ba   :  { %v5517_v18 = vadd.f32 %v5516_v16, %v5515_v15  ;;  %v5518_v19 = vpop.f32.mrb[18].mxu1  ;;  %v1270_v41 = vadd.f32 %v5468_v14, %v7179_v10 }
 0x1bb   :  { %v5519_v20 = vpop.f32.mrb[19].mxu1 }
 0x1bc   :  { %v5520_v24 = vadd.f32 %v5519_v20, %v5518_v19  ;;  %v1348_v25 = vadd.f32 %v5517_v18, %v1259_v17 }
 0x1be   :  { %v1351_v26 = vadd.f32 %v5520_v24, %v1262_v23 }
 0x1c4   :  { %v5469_v27 = vpop.f32.mrb[24].mxu0 }
 0x1c5   :  { %v5470_v28 = vpop.f32.mrb[25].mxu0 }
 0x1c6   :  { %v5471_v29 = vadd.f32 %v5470_v28, %v5469_v27  ;;  %v5472_v30 = vpop.f32.mrb[26].mxu0 }
 0x1c7   :  { %v5473_v31 = vpop.f32.mrb[27].mxu0 }
 0x1c8   :  { %v5474_v32 = vadd.f32 %v5473_v31, %v5472_v30  ;;  %v5521_v33 = vpop.f32.mrb[20].mxu1  ;;  %v1275_v57 = vadd.f32 %v5471_v29, %v7179_v10 }
 0x1c9   :  { %v5522_v34 = vpop.f32.mrb[21].mxu1 }
 0x1ca   :  { %v5523_v36 = vadd.f32 %v5522_v34, %v5521_v33  ;;  %v5524_v39 = vpop.f32.mrb[22].mxu1 }
 0x1cb   :  { %v5525_v40 = vpop.f32.mrb[23].mxu1 }
 0x1cc   :  { %v5526_v42 = vadd.f32 %v5525_v40, %v5524_v39  ;;  %v1404_v43 = vpop.f32.mrb[28].mxu0  ;;  %v1356_v44 = vadd.f32 %v5523_v36, %v1267_v35 }
 0x1cd   :  { %v7210_v45 = vadd.f32 %v1404_v43, %v7183_v21  ;;  %v5844_v46 = vpop.f32.mrb[29].mxu0  ;;  %v1278_v21 = vadd.f32 %v5474_v32, %v7179_v10 }
 0x1ce   :  { %v1407_v47 = vpop.f32.mrb[30].mxu0  ;;  %v1359_v48 = vadd.f32 %v5526_v42, %v1270_v41 }
 0x1cf   :  { %v1459_v49 = vmax.f32 %v7210_v45, 0.0   ;;  %v7214_v50 = vadd.f32 %v1407_v47, %v7185_v22  ;;  %v5845_v51 = vpop.f32.mrb[31].mxu0 }
 0x1d0   :  { %v5527_v52 = vpop.f32.mrb[24].mxu1 }
 0x1d1   :  { %v1460_v55 = vmax.f32 %v7214_v50, 0.0   ;;  %v5528_v56 = vpop.f32.mrb[25].mxu1 }
 0x1d2   :  { %v5529_v58 = vadd.f32 %v5528_v56, %v5527_v52  ;;  %v5530_v59 = vpop.f32.mrb[26].mxu1 }
 0x1d3   :  { %v5531_v60 = vpop.f32.mrb[27].mxu1 }
 0x1d4   :  { %v5532_v61 = vadd.f32 %v5531_v60, %v5530_v59  ;;  %v1412_v62 = vpop.f32.mrb[32].mxu0  ;;  %v1364_v63 = vadd.f32 %v5529_v58, %v1275_v57 }
 0x1d5   :  { %v1413_v1 = vadd.f32 %v1412_v62, %v7189_v37  ;;  %v5848_v2 = vpop.f32.mrb[33].mxu0 }
 0x1d6   :  { %v1415_v22 = vpop.f32.mrb[34].mxu0  ;;  %v1367_v3 = vadd.f32 %v5532_v61, %v1278_v21 }
 0x1d7   :  { %v1461_v4 = vmax.f32 %v1413_v1, 0.0   ;;  %v1416_v5 = vadd.f32 %v1415_v22, %v7191_v38  ;;  %v5849_v8 = vpop.f32.mrb[35].mxu0 }
 0x1d8   :  { %v1436_v9 = vpop.f32.mrb[28].mxu1 }
 0x1d9   :  { %v1462_v11 = vmax.f32 %v1416_v5, 0.0   ;;  %v1437_v12 = vadd.f32 %v1436_v9, %v1348_v25  ;;  %v5860_v13 = vpop.f32.mrb[29].mxu1 }
 0x1da   :  { %v1439_v14 = vpop.f32.mrb[30].mxu1 }
 0x1db   :  { %v1467_v15 = vmax.f32 %v1437_v12, 0.0   ;;  %v1440_v16 = vadd.f32 %v1439_v14, %v1351_v26  ;;  %v5861_v10 = vpop.f32.mrb[31].mxu1 }
 0x1dc   :  { %v1420_v17 = vpop.f32.mrb[36].mxu0 }
 0x1dd   :  { %v1468_v18 = vmax.f32 %v1440_v16, 0.0   ;;  %v1421_v19 = vadd.f32 %v1420_v17, %v7195_v53  ;;  %v5852_v37 = vpop.f32.mrb[37].mxu0 }
 0x1de   :  { %v1423_v20 = vpop.f32.mrb[38].mxu0 }
 0x1df   :  { %v1463_v23 = vmax.f32 %v1421_v19, 0.0   ;;  %v1424_v24 = vadd.f32 %v1423_v20, %v7197_v54  ;;  %v5853_v27 = vpop.f32.mrb[39].mxu0 }
 0x1e0   :  { %v1444_v38 = vpop.f32.mrb[32].mxu1 }
 0x1e1   :  { %v1464_v28 = vmax.f32 %v1424_v24, 0.0   ;;  %v1445_v29 = vadd.f32 %v1444_v38, %v1356_v44  ;;  %v5864_v30 = vpop.f32.mrb[33].mxu1 }
 0x1e2   :  { %v1447_v25 = vpop.f32.mrb[34].mxu1 }
 0x1e3   :  { %v1469_v31 = vmax.f32 %v1445_v29, 0.0   ;;  %v1448_v32 = vadd.f32 %v1447_v25, %v1359_v48  ;;  %v5865_v33 = vpop.f32.mrb[35].mxu1 }
 0x1e4   :  { %v1428_v26 = vpop.f32.mrb[40].mxu0 }
 0x1e5   :  { %v1470_v34 = vmax.f32 %v1448_v32, 0.0   ;;  %v1429_v35 = vadd.f32 %v1428_v26, %v7201_v6  ;;  %v5856_v36 = vpop.f32.mrb[41].mxu0 }
 0x1e6   :  { %v1431_v53 = vpop.f32.mrb[42].mxu0 }
 0x1e7   :  { %v1465_v39 = vmax.f32 %v1429_v35, 0.0   ;;  %v1432_v40 = vadd.f32 %v1431_v53, %v7203_v7  ;;  %v5857_v41 = vpop.f32.mrb[43].mxu0 }
 0x1e8   :  { %v1452_v54 = vpop.f32.mrb[36].mxu1 }
 0x1e9   :  { %v1466_v42 = vmax.f32 %v1432_v40, 0.0   ;;  %v1453_v43 = vadd.f32 %v1452_v54, %v1364_v63  ;;  %v5868_v46 = vpop.f32.mrb[37].mxu1 }
 0x1ea   :  { %v1455_v44 = vpop.f32.mrb[38].mxu1 }
 0x1eb   :  { %v1471_v47 = vmax.f32 %v1453_v43, 0.0   ;;  %v1456_v51 = vadd.f32 %v1455_v44, %v1367_v3  ;;  %v5869_v52 = vpop.f32.mrb[39].mxu1 }
 0x1ed   :  { %v1472_v48 = vmax.f32 %v1456_v51, 0.0  }
 0x1ee LB: > { %v1509_v6 = vld [vmem:[#allocation2] sm:$0xff]  ;;  %1495 = vst.msk [vmem:[#allocation2 + $0x8] sm:$0xff] %vm53_vm0, %v6440_v49  ;;  %1496 = vst.msk [vmem:[#allocation2 + $0x10] sm:$0xff] %vm53_vm0, %v6436_v55  ;;  %s5152_s17 = smul.u32 576, %s6444_s0  ;;  %s6449_s23 = smov 64   ;;  %vm6451_vm3 = vmmov 0   ;;  %s6444_s0 = sphi %s7257_s0, %s1478_s0   ;;  %v6440_v49 = vphi %v1459_v49, %v9071_v49   ;;  %v6436_v55 = vphi %v1460_v55, %v9070_v55   ;;  %v6432_v4 = vphi %v1461_v4, %v9069_v4   ;;  %v6428_v11 = vphi %v1462_v11, %v9068_v11   ;;  %v6424_v23 = vphi %v1463_v23, %v9067_v23   ;;  %v6420_v28 = vphi %v1464_v28, %v9066_v28   ;;  %v6416_v39 = vphi %v1465_v39, %v9065_v39   ;;  %v6412_v42 = vphi %v1466_v42, %v9064_v42   ;;  %v6408_v15 = vphi %v1467_v15, %v9063_v15   ;;  %v6404_v18 = vphi %v1468_v18, %v9062_v18   ;;  %v6400_v31 = vphi %v1469_v31, %v9061_v31   ;;  %v6396_v34 = vphi %v1470_v34, %v9060_v34   ;;  %v6392_v47 = vphi %v1471_v47, %v9059_v47   ;;  %v6388_v48 = vphi %v1472_v48, %v9058_v48  }
 0x1ef   : > { %1523 = vst.msk [vmem:[#allocation3] sm:$0xff] %vm53_vm0, %v1509_v6  ;;  %1497 = vst.msk [vmem:[#allocation2 + $0x18] sm:$0xff] %vm53_vm0, %v6432_v4  ;;  %s5225_s30 = sshll.u32 %s6444_s0, 1  ;;  %s1478_s0 = sadd.s32 1, %s6444_s0  }
 0x1f0   : > { %1498 = vst.msk [vmem:[#allocation2 + $0x20] sm:$0xff] %vm53_vm0, %v6428_v11  ;;  %1499 = vst.msk [vmem:[#allocation2 + $0x28] sm:$0xff] %vm53_vm0, %v6424_v23  ;;  %s7325_s20 = scalar_lea.vmem %s9039_s2, %s5152_s17  ;;  %s7937_s19 = scalar_lea.vmem %s9041_s3, %s5225_s30 }
 0x1f1   : > { %1500 = vst.msk [vmem:[#allocation2 + $0x30] sm:$0xff] %vm53_vm0, %v6420_v28  ;;  %1501 = vst.msk [vmem:[#allocation2 + $0x38] sm:$0xff] %vm53_vm0, %v6416_v39  ;;  %v6207_v7 = vld [vmem:[%s7325_s20 + $0x160] sm:$0xff]   ;;  %v6209_v50 = vld [vmem:[%s7325_s20 + $0x168] sm:$0xff]   ;;  %p8620_p0 = scmp.ge.s32.totalorder %s1478_s0, 3  }
 0x1f2   : > { %1502 = vst.msk [vmem:[#allocation2 + $0x40] sm:$0xff] %vm53_vm0, %v6412_v42  ;;  %1503 = vst.msk [vmem:[#allocation2 + $0x48] sm:$0xff] %vm53_vm0, %v6408_v15  ;;  %v6208_v45 = vld [vmem:[%s7325_s20 + $0x120] sm:$0xff]   ;;  %5544 = vmatprep.subr.bf16.mxu0 %v6207_v7  ;;  %v6210_v56 = vld [vmem:[%s7325_s20 + $0x128] sm:$0xff]   ;;  %vm4793_vm4 = vcmask (%p8620_p0), 916480  }
 0x1f3   : > { %1504 = vst.msk [vmem:[#allocation2 + $0x50] sm:$0xff] %vm53_vm0, %v6404_v18  ;;  %1505 = vst.msk [vmem:[#allocation2 + $0x58] sm:$0xff] %vm53_vm0, %v6400_v31  ;;  %5545 = vmatpush3.bf16.msra.mxu0 %v6208_v45  ;;  %v6211_v24 = vld [vmem:[%s7325_s20 + $0x170] sm:$0xff]   ;;  %v6213_v32 = vld [vmem:[%s7325_s20 + $0x178] sm:$0xff]  }
 0x1f4   : > { %1506 = vst.msk [vmem:[#allocation2 + $0x60] sm:$0xff] %vm53_vm0, %v6396_v34  ;;  %1507 = vst.msk [vmem:[#allocation2 + $0x68] sm:$0xff] %vm53_vm0, %v6392_v47  ;;  %5546 = vmatprep.subr.bf16.mxu0 %v6209_v50  ;;  %v6212_v38 = vld [vmem:[%s7325_s20 + $0x130] sm:$0xff]   ;;  %v6214_v33 = vld [vmem:[%s7325_s20 + $0x138] sm:$0xff]  }
 0x1f5   : > { %1508 = vst.msk [vmem:[#allocation2 + $0x70] sm:$0xff] %vm53_vm0, %v6388_v48  ;;  %v1649_v57 = vld [vmem:[#allocation2 + $0x7] sm:$0xff]  ;;  %v7345_v59 = vld [vmem:[#allocation2 + $0xf] sm:$0xff] }
 0x1f6   : > { %v1537_v58 = vld [vmem:[#allocation2 + $0x1] sm:$0xff]  ;;  %1677 = vrot.lane.b32.xlu0 %v1649_v57, %s6449_s23  ;;  %v1957_v60 = vld [vmem:[#allocation2 + $0x10] sm:$0xff]  ;;  %v1958_v61 = vld [vmem:[#allocation2 + $0x18] sm:$0xff] }
 0x1f7   : > { %1565 = vrot.lane.b32.xlu1 %v1537_v58, %s6449_s23  ;;  %1971 = vst.msk [vmem:[#allocation3 + $0x20] sm:$0xff] %vm53_vm0, %v1957_v60  ;;  %v7348_v21 = vld [vmem:[#allocation2 + $0x9] sm:$0xff]  ;;  %v1959_v62 = vld [vmem:[#allocation2 + $0x20] sm:$0xff]  ;;  %1525 = vst.msk [vmem:[#allocation3 + $0x50] sm:$0xff] %vm53_vm0, %v1957_v60  ;;  %5547 = vmatpush3.bf16.msra.mxu0 %v6210_v56 }
 0x1f8   : > { %1972 = vst.msk [vmem:[#allocation3 + $0x48] sm:$0xff] %vm53_vm0, %v1958_v61  ;;  %1973 = vst.msk [vmem:[#allocation3 + $0x70] sm:$0xff] %vm53_vm0, %v1959_v62  ;;  %v1960_v63 = vld [vmem:[#allocation2 + $0x28] sm:$0xff]  ;;  %v1961_v1 = vld [vmem:[#allocation2 + $0x30] sm:$0xff]  ;;  %5548 = vmatprep.subr.bf16.mxu0 %v6211_v24 }
 0x1f9   : > { %1526 = vst.msk [vmem:[#allocation3 + $0x78] sm:$0xff] %vm53_vm0, %v1958_v61  ;;  %1527 = vst.msk [vmem:[#allocation3 + $0xa0] sm:$0xff] %vm53_vm0, %v1959_v62  ;;  %v7359_v2 = vld [vmem:[#allocation2 + $0x17] sm:$0xff]  ;;  %v7365_v22 = vld [vmem:[#allocation2 + $0x1f] sm:$0xff] }
 0x1fa   : > { %1679 = vrot.lane.b32.xlu0 %v7345_v59, %s6449_s23  ;;  %1974 = vst.msk [vmem:[#allocation3 + $0x98] sm:$0xff] %vm53_vm0, %v1960_v63  ;;  %1975 = vst.msk [vmem:[#allocation3 + $0xc0] sm:$0xff] %vm53_vm0, %v1961_v1  ;;  %v1962_v3 = vld [vmem:[#allocation2 + $0x38] sm:$0xff]  ;;  %v1963_v5 = vld [vmem:[#allocation2 + $0x40] sm:$0xff] }
 0x1fb   : > { %1567 = vrot.lane.b32.xlu1 %v7348_v21, %s6449_s23  ;;  %1528 = vst.msk [vmem:[#allocation3 + $0xc8] sm:$0xff] %vm53_vm0, %v1960_v63  ;;  %1529 = vst.msk [vmem:[#allocation3 + $0xf0] sm:$0xff] %vm53_vm0, %v1961_v1  ;;  %v1964_v8 = vld [vmem:[#allocation2 + $0x48] sm:$0xff]  ;;  %v1965_v9 = vld [vmem:[#allocation2 + $0x50] sm:$0xff]  ;;  %5549 = vmatpush3.bf16.msra.mxu0 %v6212_v38 }
 0x1fc   : > { %1976 = vst.msk [vmem:[#allocation3 + $0xe8] sm:$0xff] %vm53_vm0, %v1962_v3  ;;  %1977 = vst.msk [vmem:[#allocation3 + $0x110] sm:$0xff] %vm53_vm0, %v1963_v5  ;;  %v7375_v12 = vld [vmem:[#allocation2 + $0x11] sm:$0xff]  ;;  %v7381_v13 = vld [vmem:[#allocation2 + $0x19] sm:$0xff]  ;;  %5550 = vmatprep.subr.bf16.mxu0 %v6213_v32 }
 0x1fd   : > { %1530 = vst.msk [vmem:[#allocation3 + $0x118] sm:$0xff] %vm53_vm0, %v1962_v3  ;;  %1531 = vst.msk [vmem:[#allocation3 + $0x140] sm:$0xff] %vm53_vm0, %v1963_v5  ;;  %v1966_v14 = vld [vmem:[#allocation2 + $0x58] sm:$0xff]  ;;  %v1967_v16 = vld [vmem:[#allocation2 + $0x60] sm:$0xff] }
 0x1fe   : > { %1681 = vrot.lane.b32.xlu0 %v7359_v2, %s6449_s23  ;;  %1978 = vst.msk [vmem:[#allocation3 + $0x138] sm:$0xff] %vm53_vm0, %v1964_v8  ;;  %1979 = vst.msk [vmem:[#allocation3 + $0x160] sm:$0xff] %vm53_vm0, %v1965_v9  ;;  %v1968_v10 = vld [vmem:[#allocation2 + $0x68] sm:$0xff]  ;;  %v1969_v17 = vld [vmem:[#allocation2 + $0x70] sm:$0xff] }
 0x1ff   : > { %1683 = vrot.lane.b32.xlu1 %v7365_v22, %s6449_s23  ;;  %1532 = vst.msk [vmem:[#allocation3 + $0x168] sm:$0xff] %vm53_vm0, %v1964_v8  ;;  %1533 = vst.msk [vmem:[#allocation3 + $0x190] sm:$0xff] %vm53_vm0, %v1965_v9  ;;  %v7391_v19 = vld [vmem:[#allocation2 + $0x27] sm:$0xff]  ;;  %v7396_v37 = vld [vmem:[#allocation2 + $0x2f] sm:$0xff]  ;;  %5551 = vmatpush3.bf16.msra.mxu0 %v6214_v33 }
 0x200   : > { %1980 = vst.msk [vmem:[#allocation3 + $0x188] sm:$0xff] %vm53_vm0, %v1966_v14  ;;  %1981 = vst.msk [vmem:[#allocation3 + $0x1b0] sm:$0xff] %vm53_vm0, %v1967_v16  ;;  %v1621_v20 = vld [vmem:[#allocation2 + $0x2] sm:$0xff]  ;;  %v1622_v30 = vld [vmem:[#allocation2 + $0xa] sm:$0xff] }
 0x201   : > { %1534 = vst.msk [vmem:[#allocation3 + $0x1b8] sm:$0xff] %vm53_vm0, %v1966_v14  ;;  %1535 = vst.msk [vmem:[#allocation3 + $0x1e0] sm:$0xff] %vm53_vm0, %v1967_v16  ;;  %v7400_v27 = vld [vmem:[#allocation2 + $0x21] sm:$0xff]  ;;  %v7407_v29 = vld [vmem:[#allocation2 + $0x29] sm:$0xff]  ;;  %v6450_v16 = vmov 0.0  }
 0x202   : > { %1569 = vrot.lane.b32.xlu0 %v7375_v12, %s6449_s23  ;;  %1982 = vst.msk [vmem:[#allocation3 + $0x1d8] sm:$0xff] %vm53_vm0, %v1968_v10  ;;  %1983 = vst.msk [vmem:[#allocation3 + $0x200] sm:$0xff] %vm53_vm0, %v1969_v17  ;;  %v1510_v25 = vld [vmem:[#allocation2 + $0x8] sm:$0xff]  ;;  %v7414_v26 = vld [vmem:[#allocation2 + $0x37] sm:$0xff] }
 0x203   : > { %1571 = vrot.lane.b32.xlu1 %v7381_v13, %s6449_s23  ;;  %1536 = vst.msk [vmem:[#allocation3 + $0x208] sm:$0xff] %vm53_vm0, %v1968_v10  ;;  %1635 = vst.msk [vmem:[#allocation3 + $0x8] sm:$0xff] %vm53_vm0, %v1621_v20  ;;  %v7416_v35 = vld [vmem:[#allocation2 + $0x3f] sm:$0xff]  ;;  %v1623_v36 = vld [vmem:[#allocation2 + $0x12] sm:$0xff] }
 0x204   : > { %1636 = vst.msk [vmem:[#allocation3 + $0x30] sm:$0xff] %vm53_vm0, %v1622_v30  ;;  %1524 = vst.msk [vmem:[#allocation3 + $0x28] sm:$0xff] %vm53_vm0, %v1510_v25  ;;  %v1624_v53 = vld [vmem:[#allocation2 + $0x1a] sm:$0xff]  ;;  %v6217_v54 = vld [vmem:[%s7325_s20 + $0x188] sm:$0xff]  }
 0x205   : > { %1747 = vst.msk [vmem:[#allocation3 + $0x10] sm:$0xff] %vm53_vm0, %v1510_v25  ;;  %1637 = vst.msk [vmem:[#allocation3 + $0x58] sm:$0xff] %vm53_vm0, %v1623_v36  ;;  %v6215_v40 = vld [vmem:[%s7325_s20 + $0x180] sm:$0xff]   ;;  %v7431_v46 = vld [vmem:[#allocation2 + $0x31] sm:$0xff] }
 0x206   : > { %1685 = vrot.lane.b32.xlu0 %v7391_v19, %s6449_s23  ;;  %1638 = vst.msk [vmem:[#allocation3 + $0x80] sm:$0xff] %vm53_vm0, %v1624_v53  ;;  %v6216_v41 = vld [vmem:[%s7325_s20 + $0x140] sm:$0xff]   ;;  %5552 = vmatprep.subr.bf16.mxu0 %v6215_v40  ;;  %v6218_v51 = vld [vmem:[%s7325_s20 + $0x148] sm:$0xff]   ;;  %v6219_v6 = vld [vmem:[%s7325_s20 + $0x190] sm:$0xff]  }
 0x207   : > { %1687 = vrot.lane.b32.xlu1 %v7396_v37, %s6449_s23  ;;  %v1625_v43 = vld [vmem:[#allocation2 + $0x22] sm:$0xff]  ;;  %v7433_v44 = vld [vmem:[#allocation2 + $0x39] sm:$0xff]  ;;  %5553 = vmatpush3.bf16.msra.mxu0 %v6216_v41  ;;  %v1626_v52 = vld [vmem:[#allocation2 + $0x2a] sm:$0xff] }
 0x208   : > { %1639 = vst.msk [vmem:[#allocation3 + $0xa8] sm:$0xff] %vm53_vm0, %v1625_v43  ;;  %5554 = vmatprep.subr.bf16.mxu0 %v6217_v54  ;;  %1640 = vst.msk [vmem:[#allocation3 + $0xd0] sm:$0xff] %vm53_vm0, %v1626_v52  ;;  %v7443_v7 = vld [vmem:[#allocation2 + $0x47] sm:$0xff]  ;;  %v1627_v45 = vld [vmem:[#allocation2 + $0x32] sm:$0xff] }
 0x209   : > { %v7445_v50 = vld [vmem:[#allocation2 + $0x4f] sm:$0xff]  ;;  %1641 = vst.msk [vmem:[#allocation3 + $0xf8] sm:$0xff] %vm53_vm0, %v1627_v45  ;;  %v6221_v57 = vld [vmem:[%s7325_s20 + $0x198] sm:$0xff]   ;;  %v7454_v58 = vld [vmem:[#allocation2 + $0x41] sm:$0xff] }
 0x20a   : > { %1573 = vrot.lane.b32.xlu0 %v7400_v27, %s6449_s23  ;;  %v6220_v56 = vld [vmem:[%s7325_s20 + $0x150] sm:$0xff]   ;;  %v1628_v60 = vld [vmem:[#allocation2 + $0x3a] sm:$0xff]  ;;  %v1629_v63 = vld [vmem:[#allocation2 + $0x42] sm:$0xff] }
 0x20b   : > { %1575 = vrot.lane.b32.xlu1 %v7407_v29, %s6449_s23  ;;  %5555 = vmatpush3.bf16.msra.mxu0 %v6218_v51  ;;  %v7456_v61 = vld [vmem:[#allocation2 + $0x49] sm:$0xff]  ;;  %1642 = vst.msk [vmem:[#allocation3 + $0x120] sm:$0xff] %vm53_vm0, %v1628_v60  ;;  %v6222_v62 = vld [vmem:[%s7325_s20 + $0x158] sm:$0xff]   ;;  %1643 = vst.msk [vmem:[#allocation3 + $0x148] sm:$0xff] %vm53_vm0, %v1629_v63 }
 0x20c   : > { %5556 = vmatprep.subr.bf16.mxu0 %v6219_v6  ;;  %v1630_v1 = vld [vmem:[#allocation2 + $0x4a] sm:$0xff]  ;;  %v7465_v3 = vld [vmem:[#allocation2 + $0x57] sm:$0xff]  ;;  %v7467_v5 = vld [vmem:[#allocation2 + $0x5f] sm:$0xff] }
 0x20d   : > { %1644 = vst.msk [vmem:[#allocation3 + $0x170] sm:$0xff] %vm53_vm0, %v1630_v1  ;;  %v1631_v8 = vld [vmem:[#allocation2 + $0x52] sm:$0xff]  ;;  %v1632_v9 = vld [vmem:[#allocation2 + $0x5a] sm:$0xff]  ;;  %v1633_v10 = vld [vmem:[#allocation2 + $0x62] sm:$0xff] }
 0x20e   : > { %1689 = vrot.lane.b32.xlu0 %v7414_v26, %s6449_s23  ;;  %1645 = vst.msk [vmem:[#allocation3 + $0x198] sm:$0xff] %vm53_vm0, %v1631_v8  ;;  %1646 = vst.msk [vmem:[#allocation3 + $0x1c0] sm:$0xff] %vm53_vm0, %v1632_v9  ;;  %v7472_v14 = vld [vmem:[#allocation2 + $0x51] sm:$0xff]  ;;  %v7479_v20 = vld [vmem:[#allocation2 + $0x59] sm:$0xff] }
 0x20f   : > { %1691 = vrot.lane.b32.xlu1 %v7416_v35, %s6449_s23  ;;  %5557 = vmatpush3.bf16.msra.mxu0 %v6220_v56  ;;  %v1634_v17 = vld [vmem:[#allocation2 + $0x6a] sm:$0xff]  ;;  %1647 = vst.msk [vmem:[#allocation3 + $0x1e8] sm:$0xff] %vm53_vm0, %v1633_v10  ;;  %v6225_v24 = vld [vmem:[%s7325_s20 + $0x1e0] sm:$0xff]   ;;  %v1846_v53 = vld [vmem:[#allocation2 + $0x16] sm:$0xff] }
 0x210   : > { %5558 = vmatprep.subr.bf16.mxu0 %v6221_v57  ;;  %1648 = vst.msk [vmem:[#allocation3 + $0x210] sm:$0xff] %vm53_vm0, %v1634_v17  ;;  %v6226_v38 = vld [vmem:[%s7325_s20 + $0x1a0] sm:$0xff]   ;;  %v7487_v25 = vld [vmem:[#allocation2 + $0x6f] sm:$0xff]  ;;  %5602 = vmatprep.subr.bf16.mxu1 %v6225_v24  ;;  %1860 = vst.msk [vmem:[#allocation3 + $0x40] sm:$0xff] %vm53_vm0, %v1846_v53 }
 0x211   : > { %v7485_v30 = vld [vmem:[#allocation2 + $0x67] sm:$0xff]  ;;  %5603 = vmatpush3.bf16.msra.mxu1 %v6226_v38  ;;  %v6229_v40 = vld [vmem:[%s7325_s20 + $0x1f0] sm:$0xff]   ;;  %v6232_v52 = vld [vmem:[%s7325_s20 + $0x1f8] sm:$0xff]  }
 0x212   : > { %1577 = vrot.lane.b32.xlu0 %v7431_v46, %s6449_s23  ;;  %v6227_v32 = vld [vmem:[%s7325_s20 + $0x1e8] sm:$0xff]   ;;  %v6230_v43 = vld [vmem:[%s7325_s20 + $0x1b0] sm:$0xff]   ;;  %v1847_v6 = vld [vmem:[#allocation2 + $0x1e] sm:$0xff] }
 0x213   : > { %1579 = vrot.lane.b32.xlu1 %v7433_v44, %s6449_s23  ;;  %5559 = vmatpush3.bf16.msra.mxu0 %v6222_v62  ;;  %v1845_v33 = vld [vmem:[#allocation2 + $0xe] sm:$0xff]  ;;  %v7498_v41 = vld [vmem:[#allocation2 + $0x61] sm:$0xff]  ;;  %v6233_v56 = vld [vmem:[%s7325_s20 + $0x1b8] sm:$0xff]   ;;  %1861 = vst.msk [vmem:[#allocation3 + $0x68] sm:$0xff] %vm53_vm0, %v1847_v6 }
 0x214   : > { %5870 = vmatprep.subr.bf16.mxu0 %v6450_v16  ;;  %v6228_v36 = vld [vmem:[%s7325_s20 + $0x1a8] sm:$0xff]   ;;  %1859 = vst.msk [vmem:[#allocation3 + $0x18] sm:$0xff] %vm53_vm0, %v1845_v33  ;;  %5604 = vmatprep.subr.bf16.mxu1 %v6227_v32  ;;  %v1734_v51 = vld [vmem:[#allocation2 + $0x10] sm:$0xff]  ;;  %v6234_v57 = vld [vmem:[%s7325_s20 + $0x200] sm:$0xff]  }
 0x215   : > { %v7500_v54 = vld [vmem:[#allocation2 + $0x69] sm:$0xff]  ;;  %5605 = vmatpush3.bf16.msra.mxu1 %v6228_v36  ;;  %1748 = vst.msk [vmem:[#allocation3 + $0x38] sm:$0xff] %vm53_vm0, %v1734_v51  ;;  %v1735_v60 = vld [vmem:[#allocation2 + $0x18] sm:$0xff]  ;;  %v1736_v62 = vld [vmem:[#allocation2 + $0x20] sm:$0xff] }
 0x216   : > { %1693 = vrot.lane.b32.xlu0 %v7443_v7, %s6449_s23  ;;  %5606 = vmatprep.subr.bf16.mxu1 %v6229_v40  ;;  %v1848_v45 = vld [vmem:[#allocation2 + $0x26] sm:$0xff]  ;;  %1749 = vst.msk [vmem:[#allocation3 + $0x60] sm:$0xff] %vm53_vm0, %v1735_v60  ;;  %1750 = vst.msk [vmem:[#allocation3 + $0x88] sm:$0xff] %vm53_vm0, %v1736_v62  ;;  %v1850_v8 = vld [vmem:[#allocation2 + $0x36] sm:$0xff] }
 0x217   : > { %1695 = vrot.lane.b32.xlu1 %v7445_v50, %s6449_s23  ;;  %1862 = vst.msk [vmem:[#allocation3 + $0x90] sm:$0xff] %vm53_vm0, %v1848_v45  ;;  %v6235_v63 = vld [vmem:[%s7325_s20 + $0x1c0] sm:$0xff]   ;;  %v6236_v1 = vld [vmem:[%s7325_s20 + $0x208] sm:$0xff]   ;;  %1864 = vst.msk [vmem:[#allocation3 + $0xe0] sm:$0xff] %vm53_vm0, %v1850_v8 }
 0x218   : > { %v6239_v9 = vld [vmem:[%s7325_s20 + $0x210] sm:$0xff]   ;;  %v1737_v10 = vld [vmem:[#allocation2 + $0x28] sm:$0xff]  ;;  %v6241_v24 = vld [vmem:[%s7325_s20 + $0x218] sm:$0xff]  }
 0x219   : > { %5607 = vmatpush3.bf16.msra.mxu1 %v6230_v43  ;;  %v1738_v17 = vld [vmem:[#allocation2 + $0x30] sm:$0xff]  ;;  %1751 = vst.msk [vmem:[#allocation3 + $0xb0] sm:$0xff] %vm53_vm0, %v1737_v10  ;;  %v1994_v38 = vld [vmem:[#allocation3 + $0x48] sm:$0xff]  ;;  %v2059_v32 = vld [vmem:[%s9040_s1 + $0x20] sm:$0xff] }
 0x21a   : > { %1581 = vrot.lane.b32.xlu0 %v7454_v58, %s6449_s23  ;;  %5608 = vmatprep.subr.bf16.mxu1 %v6232_v52  ;;  %1752 = vst.msk [vmem:[#allocation3 + $0xd8] sm:$0xff] %vm53_vm0, %v1738_v17  ;;  %v6242_v33 = vld [vmem:[%s7325_s20 + $0x1d8] sm:$0xff]   ;;  %v1852_v53 = vld [vmem:[#allocation2 + $0x46] sm:$0xff]  ;;  %v1999_v43 = vld [vmem:[#allocation3 + $0x70] sm:$0xff] }
 0x21b   : > { %1583 = vrot.lane.b32.xlu1 %v7456_v61, %s6449_s23  ;;  %v1851_v36 = vld [vmem:[#allocation2 + $0x3e] sm:$0xff]  ;;  %1866 = vst.msk [vmem:[#allocation3 + $0x130] sm:$0xff] %vm53_vm0, %v1852_v53  ;;  %v2014_v62 = vld [vmem:[#allocation3 + $0xe8] sm:$0xff]  ;;  %v1854_v10 = vld [vmem:[#allocation2 + $0x56] sm:$0xff] }
 0x21c   : > { %1865 = vst.msk [vmem:[#allocation3 + $0x108] sm:$0xff] %vm53_vm0, %v1851_v36  ;;  %v1739_v51 = vld [vmem:[#allocation2 + $0x38] sm:$0xff]  ;;  %v1740_v52 = vld [vmem:[#allocation2 + $0x40] sm:$0xff]  ;;  %1868 = vst.msk [vmem:[#allocation3 + $0x180] sm:$0xff] %vm53_vm0, %v1854_v10 }
 0x21d   : > { %5609 = vmatpush3.bf16.msra.mxu1 %v6233_v56  ;;  %v2004_v6 = vld [vmem:[#allocation3 + $0x98] sm:$0xff]  ;;  %1753 = vst.msk [vmem:[#allocation3 + $0x100] sm:$0xff] %vm53_vm0, %v1739_v51  ;;  %1754 = vst.msk [vmem:[#allocation3 + $0x128] sm:$0xff] %vm53_vm0, %v1740_v52  ;;  %v2009_v60 = vld [vmem:[#allocation3 + $0xc0] sm:$0xff] }
 0x21e   : > { %1697 = vrot.lane.b32.xlu0 %v7465_v3, %s6449_s23  ;;  %5610 = vmatprep.subr.bf16.mxu1 %v6234_v57  ;;  %v2024_v17 = vld [vmem:[#allocation3 + $0x138] sm:$0xff]  ;;  %v1744_v36 = vld [vmem:[#allocation2 + $0x60] sm:$0xff]  ;;  %v2034_v53 = vld [vmem:[#allocation3 + $0x188] sm:$0xff] }
 0x21f   : > { %1699 = vrot.lane.b32.xlu1 %v7467_v5, %s6449_s23  ;;  %1758 = vst.msk [vmem:[#allocation3 + $0x1c8] sm:$0xff] %vm53_vm0, %v1744_v36  ;;  %v2039_v51 = vld [vmem:[#allocation3 + $0x1b0] sm:$0xff]  ;;  %v2055_v10 = vld [vmem:[%s9040_s1] sm:$0xff]  ;;  %v2066_v36 = vld [vmem:[%s9040_s1 + $0x58] sm:$0xff] }
 0x220   : > { %v1857_v52 = vld [vmem:[#allocation2 + $0x6e] sm:$0xff] }
 0x221   : > { %5611 = vmatpush3.bf16.msra.mxu1 %v6235_v63  ;;  %v2079_v63 = vld [vmem:[%s9040_s1 + $0xc0] sm:$0xff]  ;;  %1871 = vst.msk [vmem:[#allocation3 + $0x1f8] sm:$0xff] %vm53_vm0, %v1857_v52 }
 0x222   : > { %1585 = vrot.lane.b32.xlu0 %v7472_v14, %s6449_s23  ;;  %5612 = vmatprep.subr.bf16.mxu1 %v6236_v1  ;;  %v2084_v1 = vld [vmem:[%s9040_s1 + $0xe8] sm:$0xff]  ;;  %v2149_v8 = vmul.f32 %v2079_v63, %v2009_v60  ;;  %v2049_v60 = vld [vmem:[#allocation3 + $0x200] sm:$0xff] }
 0x223   : > { %1587 = vrot.lane.b32.xlu1 %v7479_v20, %s6449_s23  ;;  %v2119_v63 = vld [vmem:[%s9040_s1 + $0x200] sm:$0xff] }
 0x226   : > { %1701 = vrot.lane.b32.xlu0 %v7485_v30, %s6449_s23 }
 0x227   : > { %1703 = vrot.lane.b32.xlu1 %v7487_v25, %s6449_s23 }
 0x22a   : > { %1589 = vrot.lane.b32.xlu0 %v7498_v41, %s6449_s23 }
 0x22b   : > { %1591 = vrot.lane.b32.xlu1 %v7500_v54, %s6449_s23 }
 0x22e   : > { %1901 = vrot.lane.b32.xlu0 %v7345_v59, %s6449_s23  ;;  %v1849_v59 = vld [vmem:[#allocation2 + $0x2e] sm:$0xff] }
 0x22f   : > { %1903 = vrot.lane.b32.xlu1 %v7359_v2, %s6449_s23  ;;  %v6237_v2 = vld [vmem:[%s7325_s20 + $0x1c8] sm:$0xff]   ;;  %1863 = vst.msk [vmem:[#allocation3 + $0xb8] sm:$0xff] %vm53_vm0, %v1849_v59 }
 0x230   : > { %5613 = vmatpush3.bf16.msra.mxu1 %v6237_v2  ;;  %v2154_v2 = vmul.f32 %v2084_v1, %v2014_v62  ;;  %v1886_v62 = vld [vmem:[#allocation2 + $0x77] sm:$0xff] }
 0x231   : > { %5614 = vmatprep.subr.bf16.mxu1 %v6239_v9  ;;  %v2019_v9 = vld [vmem:[#allocation3 + $0x110] sm:$0xff] }
 0x232   : > { %1789 = vrot.lane.b32.xlu0 %v7348_v21, %s6449_s23  ;;  %v1989_v21 = vld [vmem:[#allocation3 + $0x20] sm:$0xff] }
 0x233   : > { %1791 = vrot.lane.b32.xlu1 %v7375_v12, %s6449_s23  ;;  %v6240_v12 = vld [vmem:[%s7325_s20 + $0x1d0] sm:$0xff]  }
 0x234   : > { %5615 = vmatpush3.bf16.msra.mxu1 %v6240_v12  ;;  %v1742_v12 = vld [vmem:[#allocation2 + $0x50] sm:$0xff] }
 0x235   : > { %5616 = vmatprep.subr.bf16.mxu1 %v6241_v24  ;;  %v2089_v24 = vld [vmem:[%s9040_s1 + $0x110] sm:$0xff]  ;;  %1756 = vst.msk [vmem:[#allocation3 + $0x178] sm:$0xff] %vm53_vm0, %v1742_v12 }
 0x236   : > { %1905 = vrot.lane.b32.xlu0 %v7365_v22, %s6449_s23  ;;  %v2064_v22 = vld [vmem:[%s9040_s1 + $0x48] sm:$0xff] }
 0x237   : > { %1907 = vrot.lane.b32.xlu1 %v7391_v19, %s6449_s23  ;;  %v2129_v19 = vmul.f32 %v2059_v32, %v1989_v21  ;;  %v2134_v40 = vmul.f32 %v2064_v22, %v1994_v38  ;;  %v1741_v21 = vld [vmem:[#allocation2 + $0x48] sm:$0xff] }
 0x238   : > { %5617 = vmatpush3.bf16.msra.mxu1 %v6242_v33  ;;  %1755 = vst.msk [vmem:[#allocation3 + $0x150] sm:$0xff] %vm53_vm0, %v1741_v21  ;;  %v1855_v33 = vld [vmem:[#allocation2 + $0x5e] sm:$0xff]  ;;  %v1856_v22 = vld [vmem:[#allocation2 + $0x66] sm:$0xff] }
 0x239   : > { %v2199_v45 = vpack.c.bf16 %v2134_v40, %v2129_v19  ;;  %v2029_v19 = vld [vmem:[#allocation3 + $0x160] sm:$0xff]  ;;  %1869 = vst.msk [vmem:[#allocation3 + $0x1a8] sm:$0xff] %vm53_vm0, %v1855_v33  ;;  %1870 = vst.msk [vmem:[#allocation3 + $0x1d0] sm:$0xff] %vm53_vm0, %v1856_v22 }
 0x23a   : > { %1793 = vrot.lane.b32.xlu0 %v7381_v13, %s6449_s23  ;;  %v2069_v13 = vld [vmem:[%s9040_s1 + $0x70] sm:$0xff] }
 0x23b   : > { %1795 = vrot.lane.b32.xlu1 %v7400_v27, %s6449_s23  ;;  %v2074_v27 = vld [vmem:[%s9040_s1 + $0x98] sm:$0xff]  ;;  %v2139_v56 = vmul.f32 %v2069_v13, %v1999_v43  ;;  %2234 = vst.msk [vmem:[#allocation4 + $0x20] sm:$0xff] %vm53_vm0, %v2199_v45  ;;  %v1746_v13 = vld [vmem:[#allocation2 + $0x70] sm:$0xff] }
 0x23c   : > { %v2144_v57 = vmul.f32 %v2074_v27, %v2004_v6  ;;  %v1858_v6 = vld [vmem:[#allocation2 + $0x76] sm:$0xff]  ;;  %1760 = vst.msk [vmem:[#allocation3 + $0x218] sm:$0xff] %vm53_vm0, %v1746_v13 }
 0x23d   : > { %v2044_v45 = vld [vmem:[#allocation3 + $0x1d8] sm:$0xff]  ;;  %1872 = vst.msk [vmem:[#allocation3 + $0x220] sm:$0xff] %vm53_vm0, %v1858_v6 }
 0x23e   : > { %1909 = vrot.lane.b32.xlu0 %v7396_v37, %s6449_s23  ;;  %v2204_v59 = vpack.c.bf16 %v2144_v57, %v2139_v56  ;;  %v2209_v37 = vpack.c.bf16 %v2154_v2, %v2149_v8  ;;  %v1970_v27 = vld [vmem:[#allocation2 + $0x78] sm:$0xff] }
 0x23f   : > { %1911 = vrot.lane.b32.xlu1 %v7414_v26, %s6449_s23  ;;  %v1853_v26 = vld [vmem:[#allocation2 + $0x4e] sm:$0xff]  ;;  %1984 = vst.msk [vmem:[#allocation3 + $0x228] sm:$0xff] %vm53_vm0, %v1970_v27  ;;  %v2070_v13 = vld [vmem:[%s9040_s1 + $0x78] sm:$0xff] }
 0x240   : > { %2239 = vst.msk [vmem:[#allocation4 + $0x48] sm:$0xff] %vm53_vm0, %v2204_v59  ;;  %1867 = vst.msk [vmem:[#allocation3 + $0x158] sm:$0xff] %vm53_vm0, %v1853_v26 }
 0x241   : > { %2244 = vst.msk [vmem:[#allocation4 + $0x70] sm:$0xff] %vm53_vm0, %v2209_v37 }
 0x242   : > { %1797 = vrot.lane.b32.xlu0 %v7407_v29, %s6449_s23  ;;  %v2094_v29 = vld [vmem:[%s9040_s1 + $0x138] sm:$0xff] }
 0x243   : > { %1799 = vrot.lane.b32.xlu1 %v7431_v46, %s6449_s23  ;;  %v2159_v46 = vmul.f32 %v2089_v24, %v2019_v9  ;;  %v2164_v38 = vmul.f32 %v2094_v29, %v2024_v17  ;;  %v2061_v17 = vld [vmem:[%s9040_s1 + $0x30] sm:$0xff]  ;;  %v2060_v24 = vld [vmem:[%s9040_s1 + $0x28] sm:$0xff] }
 0x245   : > { %v2214_v32 = vpack.c.bf16 %v2164_v38, %v2159_v46 }
 0x246   : > { %1913 = vrot.lane.b32.xlu0 %v7416_v35, %s6449_s23  ;;  %v1743_v35 = vld [vmem:[#allocation2 + $0x58] sm:$0xff]  ;;  %v2054_v1 = vld [vmem:[#allocation3 + $0x228] sm:$0xff] }
 0x247   : > { %1915 = vrot.lane.b32.xlu1 %v7443_v7, %s6449_s23  ;;  %2249 = vst.msk [vmem:[#allocation4 + $0x98] sm:$0xff] %vm53_vm0, %v2214_v32  ;;  %1757 = vst.msk [vmem:[#allocation3 + $0x1a0] sm:$0xff] %vm53_vm0, %v1743_v35  ;;  %v2104_v7 = vld [vmem:[%s9040_s1 + $0x188] sm:$0xff] }
 0x248   : > { %v2174_v40 = vmul.f32 %v2104_v7, %v2034_v53  ;;  %3391 = vst.msk [vmem:[#allocation3 + $0x228] sm:$0xff] %vm53_vm0, %v1970_v27  ;;  %v2071_v53 = vld [vmem:[%s9040_s1 + $0x80] sm:$0xff] }
 0x24a   : > { %1801 = vrot.lane.b32.xlu0 %v7433_v44, %s6449_s23  ;;  %v2099_v44 = vld [vmem:[%s9040_s1 + $0x160] sm:$0xff] }
 0x24b   : > { %1803 = vrot.lane.b32.xlu1 %v7454_v58, %s6449_s23  ;;  %v2169_v58 = vmul.f32 %v2099_v44, %v2029_v19 }
 0x24d   : > { %v2219_v43 = vpack.c.bf16 %v2174_v40, %v2169_v58  ;;  %v6223_v58 = vld [vmem:[%s7325_s20 + $0x220] sm:$0xff]  }
 0x24e   : > { %1917 = vrot.lane.b32.xlu0 %v7445_v50, %s6449_s23  ;;  %v1745_v50 = vld [vmem:[#allocation2 + $0x68] sm:$0xff] }
 0x24f   : > { %1919 = vrot.lane.b32.xlu1 %v7465_v3, %s6449_s23  ;;  %2254 = vst.msk [vmem:[#allocation4 + $0xc0] sm:$0xff] %vm53_vm0, %v2219_v43  ;;  %v2109_v3 = vld [vmem:[%s9040_s1 + $0x1b0] sm:$0xff]  ;;  %1759 = vst.msk [vmem:[#allocation3 + $0x1f0] sm:$0xff] %vm53_vm0, %v1745_v50 }
 0x250   : > { %v2065_v50 = vld [vmem:[%s9040_s1 + $0x50] sm:$0xff] }
 0x252   : > { %1805 = vrot.lane.b32.xlu0 %v7456_v61, %s6449_s23  ;;  %v2114_v61 = vld [vmem:[%s9040_s1 + $0x1d8] sm:$0xff] }
 0x253   : > { %1807 = vrot.lane.b32.xlu1 %v7472_v14, %s6449_s23  ;;  %v2179_v14 = vmul.f32 %v2109_v3, %v2039_v51  ;;  %v2184_v56 = vmul.f32 %v2114_v61, %v2044_v45  ;;  %v6224_v61 = vld [vmem:[%s7325_s20 + $0x228] sm:$0xff]  }
 0x255   : > { %v2224_v57 = vpack.c.bf16 %v2184_v56, %v2179_v14 }
 0x256   : > { %1921 = vrot.lane.b32.xlu0 %v7467_v5, %s6449_s23  ;;  %v2124_v5 = vld [vmem:[%s9040_s1 + $0x228] sm:$0xff] }
 0x257   : > { %1923 = vrot.lane.b32.xlu1 %v7485_v30, %s6449_s23  ;;  %2259 = vst.msk [vmem:[#allocation4 + $0xe8] sm:$0xff] %vm53_vm0, %v2224_v57  ;;  %v2189_v30 = vmul.f32 %v2119_v63, %v2049_v60  ;;  %v2194_v59 = vmul.f32 %v2124_v5, %v2054_v1  ;;  %v2076_v63 = vld [vmem:[%s9040_s1 + $0xa8] sm:$0xff]  ;;  %v2081_v5 = vld [vmem:[%s9040_s1 + $0xd0] sm:$0xff] }
 0x258   : > { %v6231_v1 = vld [vmem:[%s7325_s20 + $0x230] sm:$0xff]  }
 0x25a   : > { %1809 = vrot.lane.b32.xlu0 %v7479_v20, %s6449_s23  ;;  %v1774_v20 = vld [vmem:[#allocation2 + $0x71] sm:$0xff] }
 0x25b   : > { %1811 = vrot.lane.b32.xlu1 %v7498_v41, %s6449_s23  ;;  %v2229_v41 = vpack.c.bf16 %v2194_v59, %v2189_v30 }
 0x25d   : > { %2264 = vst.msk [vmem:[#allocation4 + $0x110] sm:$0xff] %vm53_vm0, %v2229_v41 }
 0x25e   : > { %1925 = vrot.lane.b32.xlu0 %v7487_v25, %s6449_s23 }
 0x25f   : > { %1927 = vrot.lane.b32.xlu1 %v1886_v62, %s6449_s23 }
 0x262   : > { %1813 = vrot.lane.b32.xlu0 %v7500_v54, %s6449_s23  ;;  %v2056_v54 = vld [vmem:[%s9040_s1 + $0x8] sm:$0xff] }
 0x263   : > { %1815 = vrot.lane.b32.xlu1 %v1774_v20, %s6449_s23 }
 0x268   : > { %v1678_v8 = vpop.permute.xlu0 %1677 }
 0x269   : > { %v1566_v2 = vpop.permute.xlu1 %1565  ;;  %1719 = vst.msk [vmem:[#allocation3 + $0x8] sm:$0xff] %vm182_vm1, %v1678_v8 }
 0x26a   : > { %1607 = vst.msk [vmem:[#allocation3] sm:$0xff] %vm182_vm1, %v1566_v2 }
 0x26c   : > { %v1680_v37 = vpop.permute.xlu0 %1679 }
 0x26d   : > { %v1568_v9 = vpop.permute.xlu1 %1567  ;;  %1720 = vst.msk [vmem:[#allocation3 + $0x30] sm:$0xff] %vm182_vm1, %v1680_v37 }
 0x26e   : > { %1608 = vst.msk [vmem:[#allocation3 + $0x28] sm:$0xff] %vm182_vm1, %v1568_v9  ;;  %v2075_v9 = vld [vmem:[%s9040_s1 + $0xa0] sm:$0xff] }
 0x270   : > { %v1682_v25 = vpop.permute.xlu0 %1681  ;;  %v1986_v21 = vld [vmem:[#allocation3 + $0x8] sm:$0xff] }
 0x271   : > { %v1684_v26 = vpop.permute.xlu1 %1683  ;;  %1721 = vst.msk [vmem:[#allocation3 + $0x58] sm:$0xff] %vm182_vm1, %v1682_v25  ;;  %v1985_v12 = vld [vmem:[#allocation3] sm:$0xff]  ;;  %v2126_v33 = vmul.f32 %v2056_v54, %v1986_v21  ;;  %v2080_v25 = vld [vmem:[%s9040_s1 + $0xc8] sm:$0xff]  ;;  %v6238_v54 = vld [vmem:[%s7325_s20 + $0x238] sm:$0xff]  }
 0x272   : > { %1722 = vst.msk [vmem:[#allocation3 + $0x80] sm:$0xff] %vm182_vm1, %v1684_v26  ;;  %v2125_v22 = vmul.f32 %v2055_v10, %v1985_v12 }
 0x274   : > { %v1991_v29 = vld [vmem:[#allocation3 + $0x30] sm:$0xff]  ;;  %v1570_v38 = vpop.permute.xlu0 %1569 }
 0x275   : > { %v1990_v46 = vld [vmem:[#allocation3 + $0x28] sm:$0xff]  ;;  %v1572_v32 = vpop.permute.xlu1 %1571  ;;  %v2131_v19 = vmul.f32 %v2061_v17, %v1991_v29  ;;  %1609 = vst.msk [vmem:[#allocation3 + $0x50] sm:$0xff] %vm182_vm1, %v1570_v38  ;;  %v2091_v38 = vld [vmem:[%s9040_s1 + $0x120] sm:$0xff] }
 0x276   : > { %v2130_v35 = vmul.f32 %v2060_v24, %v1990_v46  ;;  %1610 = vst.msk [vmem:[#allocation3 + $0x78] sm:$0xff] %vm182_vm1, %v1572_v32  ;;  %v2086_v46 = vld [vmem:[%s9040_s1 + $0xf8] sm:$0xff] }
 0x277   : > { %v2196_v44 = vpack.c.bf16 %v2131_v19, %v2126_v33 }
 0x278   : > { %v2195_v7 = vpack.c.bf16 %v2130_v35, %v2125_v22  ;;  %v1996_v40 = vld [vmem:[#allocation3 + $0x58] sm:$0xff]  ;;  %v1686_v51 = vpop.permute.xlu0 %1685 }
 0x279   : > { %v2001_v43 = vld [vmem:[#allocation3 + $0x80] sm:$0xff]  ;;  %v1688_v52 = vpop.permute.xlu1 %1687  ;;  %v2136_v6 = vmul.f32 %v2066_v36, %v1996_v40  ;;  %1723 = vst.msk [vmem:[#allocation3 + $0xa8] sm:$0xff] %vm182_vm1, %v1686_v51  ;;  %2652 = vmatprep.mubr.bf16.mxu0 %v2196_v44  ;;  %v2085_v44 = vld [vmem:[%s9040_s1 + $0xf0] sm:$0xff] }
 0x27a   : > { %v2141_v45 = vmul.f32 %v2071_v53, %v2001_v43  ;;  %1724 = vst.msk [vmem:[#allocation3 + $0xd0] sm:$0xff] %vm182_vm1, %v1688_v52  ;;  %2653 = vmatmul.mubr.bf16.vlgmr.msra.gmra.mrb[0].mxu0 %v2195_v7  ;;  %v2090_v7 = vld [vmem:[%s9040_s1 + $0x118] sm:$0xff] }
 0x27b   : > { %5871 = vmatpush3.bf16.msra.mxu0 %v6223_v58 }
 0x27c   : > { %v2201_v3 = vpack.c.bf16 %v2141_v45, %v2136_v6  ;;  %v1995_v14 = vld [vmem:[#allocation3 + $0x50] sm:$0xff]  ;;  %v1574_v56 = vpop.permute.xlu0 %1573  ;;  %5872 = vmatprep.subr.bf16.mxu0 %v6450_v16 }
 0x27d   : > { %v2000_v27 = vld [vmem:[#allocation3 + $0x78] sm:$0xff]  ;;  %v1576_v57 = vpop.permute.xlu1 %1575  ;;  %v2135_v60 = vmul.f32 %v2065_v50, %v1995_v14  ;;  %1611 = vst.msk [vmem:[#allocation3 + $0xa0] sm:$0xff] %vm182_vm1, %v1574_v56  ;;  %v2096_v50 = vld [vmem:[%s9040_s1 + $0x148] sm:$0xff] }
 0x27e   : > { %v2140_v62 = vmul.f32 %v2070_v13, %v2000_v27  ;;  %1612 = vst.msk [vmem:[#allocation3 + $0xc8] sm:$0xff] %vm182_vm1, %v1576_v57  ;;  %2660 = vmatprep.mubr.bf16.mxu0 %v2201_v3  ;;  %v2101_v13 = vld [vmem:[%s9040_s1 + $0x170] sm:$0xff] }
 0x27f   : > { %5873 = vmatpush3.bf16.msra.mxu0 %v6224_v61 }
 0x280   : > { %v2200_v30 = vpack.c.bf16 %v2140_v62, %v2135_v60  ;;  %v2006_v59 = vld [vmem:[#allocation3 + $0xa8] sm:$0xff]  ;;  %v1690_v41 = vpop.permute.xlu0 %1689  ;;  %5874 = vmatprep.subr.bf16.mxu0 %v6450_v16  ;;  %v2095_v62 = vld [vmem:[%s9040_s1 + $0x140] sm:$0xff] }
 0x281   : > { %v2011_v20 = vld [vmem:[#allocation3 + $0xd0] sm:$0xff]  ;;  %v1692_v8 = vpop.permute.xlu1 %1691  ;;  %v2146_v2 = vmul.f32 %v2076_v63, %v2006_v59  ;;  %1725 = vst.msk [vmem:[#allocation3 + $0xf8] sm:$0xff] %vm182_vm1, %v1690_v41  ;;  %v2100_v63 = vld [vmem:[%s9040_s1 + $0x168] sm:$0xff] }
 0x282   : > { %v2151_v37 = vmul.f32 %v2081_v5, %v2011_v20  ;;  %1726 = vst.msk [vmem:[#allocation3 + $0x120] sm:$0xff] %vm182_vm1, %v1692_v8  ;;  %2661 = vmatmul.mubr.bf16.gmra.mrb[4].mxu0 %v2200_v30 }
 0x283   : > { %5875 = vmatpush3.bf16.msra.mxu0 %v6231_v1 }
 0x284   : > { %v2206_v26 = vpack.c.bf16 %v2151_v37, %v2146_v2  ;;  %v2005_v10 = vld [vmem:[#allocation3 + $0xa0] sm:$0xff]  ;;  %v1578_v21 = vpop.permute.xlu0 %1577  ;;  %5876 = vmatprep.subr.bf16.mxu0 %v6450_v16  ;;  %v2106_v2 = vld [vmem:[%s9040_s1 + $0x198] sm:$0xff] }
 0x285   : > { %v2010_v17 = vld [vmem:[#allocation3 + $0xc8] sm:$0xff]  ;;  %v1580_v12 = vpop.permute.xlu1 %1579  ;;  %v2145_v24 = vmul.f32 %v2075_v9, %v2005_v10  ;;  %1613 = vst.msk [vmem:[#allocation3 + $0xf0] sm:$0xff] %vm182_vm1, %v1578_v21  ;;  %v2111_v37 = vld [vmem:[%s9040_s1 + $0x1c0] sm:$0xff] }
 0x286   : > { %v2150_v29 = vmul.f32 %v2080_v25, %v2010_v17  ;;  %1614 = vst.msk [vmem:[#allocation3 + $0x118] sm:$0xff] %vm182_vm1, %v1580_v12  ;;  %2668 = vmatprep.mubr.bf16.mxu0 %v2206_v26  ;;  %v2105_v12 = vld [vmem:[%s9040_s1 + $0x190] sm:$0xff] }
 0x287   : > { %5877 = vmatpush3.bf16.msra.mxu0 %v6238_v54 }
 0x288   : > { %v2205_v32 = vpack.c.bf16 %v2150_v29, %v2145_v24  ;;  %v2016_v33 = vld [vmem:[#allocation3 + $0xf8] sm:$0xff]  ;;  %v1694_v19 = vpop.permute.xlu0 %1693 }
 0x289   : > { %v2021_v22 = vld [vmem:[#allocation3 + $0x120] sm:$0xff]  ;;  %v1696_v35 = vpop.permute.xlu1 %1695  ;;  %v2156_v36 = vmul.f32 %v2086_v46, %v2016_v33  ;;  %1727 = vst.msk [vmem:[#allocation3 + $0x148] sm:$0xff] %vm182_vm1, %v1694_v19  ;;  %v2110_v24 = vld [vmem:[%s9040_s1 + $0x1b8] sm:$0xff] }
 0x28a   : > { %v2161_v53 = vmul.f32 %v2091_v38, %v2021_v22  ;;  %1728 = vst.msk [vmem:[#allocation3 + $0x170] sm:$0xff] %vm182_vm1, %v1696_v35  ;;  %2669 = vmatmul.mubr.bf16.gmra.mrb[8].mxu0 %v2205_v32  ;;  %v2116_v35 = vld [vmem:[%s9040_s1 + $0x1e8] sm:$0xff] }
 0x28c   : > { %v2211_v58 = vpack.c.bf16 %v2161_v53, %v2156_v36  ;;  %v2015_v40 = vld [vmem:[#allocation3 + $0xf0] sm:$0xff]  ;;  %v1582_v51 = vpop.permute.xlu0 %1581 }
 0x28d   : > { %v2020_v43 = vld [vmem:[#allocation3 + $0x118] sm:$0xff]  ;;  %v1584_v52 = vpop.permute.xlu1 %1583  ;;  %v2155_v6 = vmul.f32 %v2085_v44, %v2015_v40  ;;  %1615 = vst.msk [vmem:[#allocation3 + $0x140] sm:$0xff] %vm182_vm1, %v1582_v51  ;;  %v2121_v36 = vld [vmem:[%s9040_s1 + $0x210] sm:$0xff] }
 0x28e   : > { %v2160_v45 = vmul.f32 %v2090_v7, %v2020_v43  ;;  %1616 = vst.msk [vmem:[#allocation3 + $0x168] sm:$0xff] %vm182_vm1, %v1584_v52  ;;  %2676 = vmatprep.mubr.bf16.mxu0 %v2211_v58  ;;  %v2115_v52 = vld [vmem:[%s9040_s1 + $0x1e0] sm:$0xff] }
 0x290   : > { %v2210_v3 = vpack.c.bf16 %v2160_v45, %v2155_v6  ;;  %v2026_v61 = vld [vmem:[#allocation3 + $0x148] sm:$0xff]  ;;  %v1698_v27 = vpop.permute.xlu0 %1697 }
 0x291   : > { %v2031_v14 = vld [vmem:[#allocation3 + $0x170] sm:$0xff]  ;;  %v1700_v56 = vpop.permute.xlu1 %1699  ;;  %v2166_v57 = vmul.f32 %v2096_v50, %v2026_v61  ;;  %1729 = vst.msk [vmem:[#allocation3 + $0x198] sm:$0xff] %vm182_vm1, %v1698_v27  ;;  %v2120_v6 = vld [vmem:[%s9040_s1 + $0x208] sm:$0xff] }
 0x292   : > { %v2171_v60 = vmul.f32 %v2101_v13, %v2031_v14  ;;  %1730 = vst.msk [vmem:[#allocation3 + $0x1c0] sm:$0xff] %vm182_vm1, %v1700_v56  ;;  %2677 = vmatmul.mubr.bf16.gmra.mrb[12].mxu0 %v2210_v3  ;;  %v2058_v56 = vld [vmem:[%s9040_s1 + $0x18] sm:$0xff] }
 0x294   : > { %v2216_v5 = vpack.c.bf16 %v2171_v60, %v2166_v57  ;;  %v2025_v30 = vld [vmem:[#allocation3 + $0x140] sm:$0xff]  ;;  %v1586_v59 = vpop.permute.xlu0 %1585 }
 0x295   : > { %v2030_v1 = vld [vmem:[#allocation3 + $0x168] sm:$0xff]  ;;  %v1588_v20 = vpop.permute.xlu1 %1587  ;;  %v2165_v41 = vmul.f32 %v2095_v62, %v2025_v30  ;;  %1617 = vst.msk [vmem:[#allocation3 + $0x190] sm:$0xff] %vm182_vm1, %v1586_v59  ;;  %v2063_v57 = vld [vmem:[%s9040_s1 + $0x40] sm:$0xff] }
 0x296   : > { %v2170_v8 = vmul.f32 %v2100_v63, %v2030_v1  ;;  %1618 = vst.msk [vmem:[#allocation3 + $0x1b8] sm:$0xff] %vm182_vm1, %v1588_v20  ;;  %2684 = vmatprep.mubr.bf16.mxu0 %v2216_v5  ;;  %v2057_v20 = vld [vmem:[%s9040_s1 + $0x10] sm:$0xff] }
 0x298   : > { %v2215_v9 = vpack.c.bf16 %v2170_v8, %v2165_v41  ;;  %v2036_v25 = vld [vmem:[#allocation3 + $0x198] sm:$0xff]  ;;  %v1702_v54 = vpop.permute.xlu0 %1701 }
 0x299   : > { %v2041_v26 = vld [vmem:[#allocation3 + $0x1c0] sm:$0xff]  ;;  %v1704_v10 = vpop.permute.xlu1 %1703  ;;  %v2176_v17 = vmul.f32 %v2106_v2, %v2036_v25  ;;  %1731 = vst.msk [vmem:[#allocation3 + $0x1e8] sm:$0xff] %vm182_vm1, %v1702_v54  ;;  %v2062_v41 = vld [vmem:[%s9040_s1 + $0x38] sm:$0xff] }
 0x29a   : > { %v2181_v21 = vmul.f32 %v2111_v37, %v2041_v26  ;;  %1732 = vst.msk [vmem:[#allocation3 + $0x210] sm:$0xff] %vm182_vm1, %v1704_v10  ;;  %2685 = vmatmul.mubr.bf16.gmra.mrb[16].mxu0 %v2215_v9  ;;  %v2068_v10 = vld [vmem:[%s9040_s1 + $0x68] sm:$0xff] }
 0x29c   : > { %v2221_v29 = vpack.c.bf16 %v2181_v21, %v2176_v17  ;;  %v2035_v46 = vld [vmem:[#allocation3 + $0x190] sm:$0xff]  ;;  %v1590_v32 = vpop.permute.xlu0 %1589 }
 0x29d   : > { %v2040_v38 = vld [vmem:[#allocation3 + $0x1b8] sm:$0xff]  ;;  %v1592_v33 = vpop.permute.xlu1 %1591  ;;  %v2175_v22 = vmul.f32 %v2105_v12, %v2035_v46  ;;  %1619 = vst.msk [vmem:[#allocation3 + $0x1e0] sm:$0xff] %vm182_vm1, %v1590_v32  ;;  %v2073_v17 = vld [vmem:[%s9040_s1 + $0x90] sm:$0xff] }
 0x29e   : > { %v2180_v19 = vmul.f32 %v2110_v24, %v2040_v38  ;;  %1620 = vst.msk [vmem:[#allocation3 + $0x208] sm:$0xff] %vm182_vm1, %v1592_v33  ;;  %2692 = vmatprep.mubr.bf16.mxu0 %v2221_v29  ;;  %v2269_v12 = vld [vmem:[#allocation4 + $0x20] sm:$0xff] }
 0x2a0   : > { %v2220_v53 = vpack.c.bf16 %v2180_v19, %v2175_v22  ;;  %v2046_v44 = vld [vmem:[#allocation3 + $0x1e8] sm:$0xff]  ;;  %v1902_v58 = vpop.permute.xlu0 %1901  ;;  %v2067_v22 = vld [vmem:[%s9040_s1 + $0x60] sm:$0xff] }
 0x2a1   : > { %v2051_v7 = vld [vmem:[#allocation3 + $0x210] sm:$0xff]  ;;  %v1904_v40 = vpop.permute.xlu1 %1903  ;;  %v2186_v43 = vmul.f32 %v2116_v35, %v2046_v44  ;;  %1943 = vst.msk [vmem:[#allocation3 + $0x18] sm:$0xff] %vm182_vm1, %v1902_v58  ;;  %v2072_v19 = vld [vmem:[%s9040_s1 + $0x88] sm:$0xff] }
 0x2a2   : > { %v2191_v51 = vmul.f32 %v2121_v36, %v2051_v7  ;;  %1944 = vst.msk [vmem:[#allocation3 + $0x40] sm:$0xff] %vm182_vm1, %v1904_v40  ;;  %2693 = vmatmul.mubr.bf16.gmra.mrb[20].mxu0 %v2220_v53 }
 0x2a4   : > { %v2226_v45 = vpack.c.bf16 %v2191_v51, %v2186_v43  ;;  %v2045_v50 = vld [vmem:[#allocation3 + $0x1e0] sm:$0xff]  ;;  %v1790_v3 = vpop.permute.xlu0 %1789  ;;  %v2078_v43 = vld [vmem:[%s9040_s1 + $0xb8] sm:$0xff] }
 0x2a5   : > { %v2050_v13 = vld [vmem:[#allocation3 + $0x208] sm:$0xff]  ;;  %v1792_v61 = vpop.permute.xlu1 %1791  ;;  %v2185_v14 = vmul.f32 %v2115_v52, %v2045_v50  ;;  %1831 = vst.msk [vmem:[#allocation3 + $0x10] sm:$0xff] %vm182_vm1, %v1790_v3  ;;  %v2083_v51 = vld [vmem:[%s9040_s1 + $0xe0] sm:$0xff] }
 0x2a6   : > { %v2190_v27 = vmul.f32 %v2120_v6, %v2050_v13  ;;  %1832 = vst.msk [vmem:[#allocation3 + $0x38] sm:$0xff] %vm182_vm1, %v1792_v61  ;;  %2700 = vmatprep.mubr.bf16.mxu0 %v2226_v45  ;;  %v2274_v6 = vld [vmem:[#allocation4 + $0x48] sm:$0xff] }
 0x2a8   : > { %v2225_v60 = vpack.c.bf16 %v2190_v27, %v2185_v14  ;;  %v1988_v62 = vld [vmem:[#allocation3 + $0x18] sm:$0xff]  ;;  %v1906_v5 = vpop.permute.xlu0 %1905  ;;  %v2077_v27 = vld [vmem:[%s9040_s1 + $0xb0] sm:$0xff] }
 0x2a9   : > { %v1993_v63 = vld [vmem:[#allocation3 + $0x40] sm:$0xff]  ;;  %v1908_v30 = vpop.permute.xlu1 %1907  ;;  %v2128_v1 = vmul.f32 %v2058_v56, %v1988_v62  ;;  %1945 = vst.msk [vmem:[#allocation3 + $0x68] sm:$0xff] %vm182_vm1, %v1906_v5  ;;  %v2082_v56 = vld [vmem:[%s9040_s1 + $0xd8] sm:$0xff] }
 0x2aa   : > { %v2133_v59 = vmul.f32 %v2063_v57, %v1993_v63  ;;  %1946 = vst.msk [vmem:[#allocation3 + $0x90] sm:$0xff] %vm182_vm1, %v1908_v30  ;;  %2701 = vmatmul.mubr.bf16.gmra.mrb[24].mxu0 %v2225_v60 }
 0x2ab   : > { %5878 = vmatprep.mubr.msk.bf16.mxu0 %vm6451_vm3, %v6450_v16 }
 0x2ac   : > { %v2198_v8 = vpack.c.bf16 %v2133_v59, %v2128_v1  ;;  %v1987_v2 = vld [vmem:[#allocation3 + $0x10] sm:$0xff]  ;;  %v1794_v9 = vpop.permute.xlu0 %1793  ;;  %v2088_v59 = vld [vmem:[%s9040_s1 + $0x108] sm:$0xff] }
 0x2ad   : > { %v1992_v37 = vld [vmem:[#allocation3 + $0x38] sm:$0xff]  ;;  %v1796_v25 = vpop.permute.xlu1 %1795  ;;  %v2127_v26 = vmul.f32 %v2057_v20, %v1987_v2  ;;  %1833 = vst.msk [vmem:[#allocation3 + $0x60] sm:$0xff] %vm182_vm1, %v1794_v9  ;;  %v2093_v20 = vld [vmem:[%s9040_s1 + $0x130] sm:$0xff] }
 0x2ae   : > { %v2132_v54 = vmul.f32 %v2062_v41, %v1992_v37  ;;  %1834 = vst.msk [vmem:[#allocation3 + $0x88] sm:$0xff] %vm182_vm1, %v1796_v25  ;;  %2741 = vmatprep.mubr.bf16.mxu1 %v2198_v8  ;;  %v2279_v8 = vld [vmem:[#allocation4 + $0x70] sm:$0xff] }
 0x2b0   : > { %v2197_v21 = vpack.c.bf16 %v2132_v54, %v2127_v26  ;;  %v1998_v24 = vld [vmem:[#allocation3 + $0x68] sm:$0xff]  ;;  %v1910_v46 = vpop.permute.xlu0 %1909 }
 0x2b1   : > { %v2003_v29 = vld [vmem:[#allocation3 + $0x90] sm:$0xff]  ;;  %v1912_v38 = vpop.permute.xlu1 %1911  ;;  %v2138_v32 = vmul.f32 %v2068_v10, %v1998_v24  ;;  %1947 = vst.msk [vmem:[#allocation3 + $0xb8] sm:$0xff] %vm182_vm1, %v1910_v46  ;;  %v2087_v10 = vld [vmem:[%s9040_s1 + $0x100] sm:$0xff] }
 0x2b2   : > { %v2143_v33 = vmul.f32 %v2073_v17, %v2003_v29  ;;  %1948 = vst.msk [vmem:[#allocation3 + $0xe0] sm:$0xff] %vm182_vm1, %v1912_v38  ;;  %2742 = vmatmul.mubr.bf16.vlgmr.msra.gmra.mrb[0].mxu1 %v2197_v21  ;;  %5879 = vmatmul.mubr.msk.bf16.vlgmr.msra.gmra.mrb[28].mxu0 %vm53_vm0, %v2269_v12  ;;  %v2092_v17 = vld [vmem:[%s9040_s1 + $0x128] sm:$0xff] }
 0x2b3   : > { %5882 = vmatprep.mubr.msk.bf16.mxu0 %vm6451_vm3, %v6450_v16 }
 0x2b4   : > { %v2203_v35 = vpack.c.bf16 %v2143_v33, %v2138_v32  ;;  %v1997_v36 = vld [vmem:[#allocation3 + $0x60] sm:$0xff]  ;;  %v1798_v44 = vpop.permute.xlu0 %1797  ;;  %v2098_v33 = vld [vmem:[%s9040_s1 + $0x158] sm:$0xff] }
 0x2b5   : > { %v2002_v53 = vld [vmem:[#allocation3 + $0x88] sm:$0xff]  ;;  %v1800_v7 = vpop.permute.xlu1 %1799  ;;  %v2137_v58 = vmul.f32 %v2067_v22, %v1997_v36  ;;  %1835 = vst.msk [vmem:[#allocation3 + $0xb0] sm:$0xff] %vm182_vm1, %v1798_v44  ;;  %v2103_v22 = vld [vmem:[%s9040_s1 + $0x180] sm:$0xff] }
 0x2b6   : > { %v2142_v40 = vmul.f32 %v2072_v19, %v2002_v53  ;;  %1836 = vst.msk [vmem:[#allocation3 + $0xd8] sm:$0xff] %vm182_vm1, %v1800_v7  ;;  %2749 = vmatprep.mubr.bf16.mxu1 %v2203_v35  ;;  %v2284_v35 = vld [vmem:[#allocation4 + $0x98] sm:$0xff] }
 0x2b8   : > { %v2202_v52 = vpack.c.bf16 %v2142_v40, %v2137_v58  ;;  %v2008_v45 = vld [vmem:[#allocation3 + $0xb8] sm:$0xff]  ;;  %v1914_v13 = vpop.permute.xlu0 %1913 }
 0x2b9   : > { %v2013_v50 = vld [vmem:[#allocation3 + $0xe0] sm:$0xff]  ;;  %v1916_v3 = vpop.permute.xlu1 %1915  ;;  %v2148_v61 = vmul.f32 %v2078_v43, %v2008_v45  ;;  %1949 = vst.msk [vmem:[#allocation3 + $0x108] sm:$0xff] %vm182_vm1, %v1914_v13  ;;  %v2097_v43 = vld [vmem:[%s9040_s1 + $0x150] sm:$0xff] }
 0x2ba   : > { %v2153_v14 = vmul.f32 %v2083_v51, %v2013_v50  ;;  %1950 = vst.msk [vmem:[#allocation3 + $0x130] sm:$0xff] %vm182_vm1, %v1916_v3  ;;  %2750 = vmatmul.mubr.bf16.gmra.mrb[4].mxu1 %v2202_v52  ;;  %5883 = vmatmul.mubr.msk.bf16.gmra.mrb[32].mxu0 %vm53_vm0, %v2274_v6  ;;  %v2102_v51 = vld [vmem:[%s9040_s1 + $0x178] sm:$0xff] }
 0x2bb   : > { %5886 = vmatprep.mubr.msk.bf16.mxu0 %vm6451_vm3, %v6450_v16 }
 0x2bc   : > { %v2208_v57 = vpack.c.bf16 %v2153_v14, %v2148_v61  ;;  %v2007_v60 = vld [vmem:[#allocation3 + $0xb0] sm:$0xff]  ;;  %v1802_v63 = vpop.permute.xlu0 %1801  ;;  %v2108_v14 = vld [vmem:[%s9040_s1 + $0x1a8] sm:$0xff] }
 0x2bd   : > { %v2012_v62 = vld [vmem:[#allocation3 + $0xd8] sm:$0xff]  ;;  %v1804_v5 = vpop.permute.xlu1 %1803  ;;  %v2147_v30 = vmul.f32 %v2077_v27, %v2007_v60  ;;  %1837 = vst.msk [vmem:[#allocation3 + $0x100] sm:$0xff] %vm182_vm1, %v1802_v63  ;;  %v2113_v27 = vld [vmem:[%s9040_s1 + $0x1d0] sm:$0xff] }
 0x2be   : > { %v2152_v1 = vmul.f32 %v2082_v56, %v2012_v62  ;;  %1838 = vst.msk [vmem:[#allocation3 + $0x128] sm:$0xff] %vm182_vm1, %v1804_v5  ;;  %2757 = vmatprep.mubr.bf16.mxu1 %v2208_v57  ;;  %v2289_v57 = vld [vmem:[#allocation4 + $0xc0] sm:$0xff] }
 0x2c0   : > { %v2207_v41 = vpack.c.bf16 %v2152_v1, %v2147_v30  ;;  %v2018_v2 = vld [vmem:[#allocation3 + $0x108] sm:$0xff]  ;;  %v1918_v9 = vpop.permute.xlu0 %1917 }
 0x2c1   : > { %v2023_v37 = vld [vmem:[#allocation3 + $0x130] sm:$0xff]  ;;  %v1920_v25 = vpop.permute.xlu1 %1919  ;;  %v2158_v26 = vmul.f32 %v2088_v59, %v2018_v2  ;;  %1951 = vst.msk [vmem:[#allocation3 + $0x158] sm:$0xff] %vm182_vm1, %v1918_v9  ;;  %v2107_v59 = vld [vmem:[%s9040_s1 + $0x1a0] sm:$0xff] }
 0x2c2   : > { %v2163_v54 = vmul.f32 %v2093_v20, %v2023_v37  ;;  %1952 = vst.msk [vmem:[#allocation3 + $0x180] sm:$0xff] %vm182_vm1, %v1920_v25  ;;  %2758 = vmatmul.mubr.bf16.gmra.mrb[8].mxu1 %v2207_v41  ;;  %5887 = vmatmul.mubr.msk.bf16.gmra.mrb[36].mxu0 %vm53_vm0, %v2279_v8  ;;  %v2112_v20 = vld [vmem:[%s9040_s1 + $0x1c8] sm:$0xff] }
 0x2c3   : > { %5890 = vmatprep.mubr.msk.bf16.mxu0 %vm6451_vm3, %v6450_v16 }
 0x2c4   : > { %v2213_v21 = vpack.c.bf16 %v2163_v54, %v2158_v26  ;;  %v2017_v12 = vld [vmem:[#allocation3 + $0x100] sm:$0xff]  ;;  %v1806_v29 = vpop.permute.xlu0 %1805  ;;  %v2118_v54 = vld [vmem:[%s9040_s1 + $0x1f8] sm:$0xff] }
 0x2c5   : > { %v2022_v24 = vld [vmem:[#allocation3 + $0x128] sm:$0xff]  ;;  %v1808_v46 = vpop.permute.xlu1 %1807  ;;  %v2157_v38 = vmul.f32 %v2087_v10, %v2017_v12  ;;  %1839 = vst.msk [vmem:[#allocation3 + $0x150] sm:$0xff] %vm182_vm1, %v1806_v29  ;;  %v2123_v10 = vld [vmem:[%s9040_s1 + $0x220] sm:$0xff] }
 0x2c6   : > { %v2162_v32 = vmul.f32 %v2092_v17, %v2022_v24  ;;  %1840 = vst.msk [vmem:[#allocation3 + $0x178] sm:$0xff] %vm182_vm1, %v1808_v46  ;;  %2765 = vmatprep.mubr.bf16.mxu1 %v2213_v21  ;;  %v2294_v21 = vld [vmem:[#allocation4 + $0xe8] sm:$0xff] }
 0x2c8   : > { %v2212_v19 = vpack.c.bf16 %v2162_v32, %v2157_v38  ;;  %v2028_v36 = vld [vmem:[#allocation3 + $0x158] sm:$0xff]  ;;  %v1922_v44 = vpop.permute.xlu0 %1921  ;;  %v2117_v38 = vld [vmem:[%s9040_s1 + $0x1f0] sm:$0xff] }
 0x2c9   : > { %v2033_v53 = vld [vmem:[#allocation3 + $0x180] sm:$0xff]  ;;  %v1924_v7 = vpop.permute.xlu1 %1923  ;;  %v2168_v58 = vmul.f32 %v2098_v33, %v2028_v36  ;;  %1953 = vst.msk [vmem:[#allocation3 + $0x1a8] sm:$0xff] %vm182_vm1, %v1922_v44  ;;  %v2122_v32 = vld [vmem:[%s9040_s1 + $0x218] sm:$0xff] }
 0x2ca   : > { %v2173_v40 = vmul.f32 %v2103_v22, %v2033_v53  ;;  %1954 = vst.msk [vmem:[#allocation3 + $0x1d0] sm:$0xff] %vm182_vm1, %v1924_v7  ;;  %2766 = vmatmul.mubr.bf16.gmra.mrb[12].mxu1 %v2212_v19  ;;  %5891 = vmatmul.mubr.msk.bf16.gmra.mrb[40].mxu0 %vm53_vm0, %v2284_v35  ;;  %v2299_v44 = vld [vmem:[#allocation4 + $0x110] sm:$0xff] }
 0x2cb   : > { %5894 = vmatprep.mubr.msk.bf16.mxu0 %vm6451_vm3, %v6450_v16 }
 0x2cc   : > { %v2218_v52 = vpack.c.bf16 %v2173_v40, %v2168_v58  ;;  %v2027_v6 = vld [vmem:[#allocation3 + $0x150] sm:$0xff]  ;;  %v1810_v50 = vpop.permute.xlu0 %1809 }
 0x2cd   : > { %v2032_v45 = vld [vmem:[#allocation3 + $0x178] sm:$0xff]  ;;  %v1812_v13 = vpop.permute.xlu1 %1811  ;;  %v2167_v3 = vmul.f32 %v2097_v43, %v2027_v6  ;;  %1841 = vst.msk [vmem:[#allocation3 + $0x1a0] sm:$0xff] %vm182_vm1, %v1810_v50 }
 0x2ce   : > { %v2172_v61 = vmul.f32 %v2102_v51, %v2032_v45  ;;  %1842 = vst.msk [vmem:[#allocation3 + $0x1c8] sm:$0xff] %vm182_vm1, %v1812_v13  ;;  %2773 = vmatprep.mubr.bf16.mxu1 %v2218_v52 }
 0x2d0   : > { %v2217_v56 = vpack.c.bf16 %v2172_v61, %v2167_v3  ;;  %v2038_v60 = vld [vmem:[#allocation3 + $0x1a8] sm:$0xff]  ;;  %v1926_v63 = vpop.permute.xlu0 %1925 }
 0x2d1   : > { %v2043_v62 = vld [vmem:[#allocation3 + $0x1d0] sm:$0xff]  ;;  %v1928_v5 = vpop.permute.xlu1 %1927  ;;  %v2178_v30 = vmul.f32 %v2108_v14, %v2038_v60  ;;  %1955 = vst.msk [vmem:[#allocation3 + $0x1f8] sm:$0xff] %vm182_vm1, %v1926_v63 }
 0x2d2   : > { %v2183_v1 = vmul.f32 %v2113_v27, %v2043_v62  ;;  %1956 = vst.msk [vmem:[#allocation3 + $0x220] sm:$0xff] %vm182_vm1, %v1928_v5  ;;  %2774 = vmatmul.mubr.bf16.gmra.mrb[16].mxu1 %v2217_v56  ;;  %5895 = vmatmul.mubr.msk.bf16.gmra.mrb[44].mxu0 %vm53_vm0, %v2289_v57 }
 0x2d3   : > { %5898 = vmatprep.mubr.msk.bf16.mxu0 %vm6451_vm3, %v6450_v16 }
 0x2d4   : > { %v2223_v41 = vpack.c.bf16 %v2183_v1, %v2178_v30  ;;  %v2037_v8 = vld [vmem:[#allocation3 + $0x1a0] sm:$0xff]  ;;  %v1814_v37 = vpop.permute.xlu0 %1813 }
 0x2d5   : > { %v2042_v2 = vld [vmem:[#allocation3 + $0x1c8] sm:$0xff]  ;;  %v1816_v9 = vpop.permute.xlu1 %1815  ;;  %v2177_v25 = vmul.f32 %v2107_v59, %v2037_v8  ;;  %1843 = vst.msk [vmem:[#allocation3 + $0x1f0] sm:$0xff] %vm182_vm1, %v1814_v37  ;;  %v6244_v37 = vld [vmem:[%s7325_s20 + $0x240] sm:$0xff]  }
 0x2d6   : > { %v2182_v26 = vmul.f32 %v2112_v20, %v2042_v2  ;;  %1844 = vst.msk [vmem:[#allocation3 + $0x218] sm:$0xff] %vm182_vm1, %v1816_v9  ;;  %2781 = vmatprep.mubr.bf16.mxu1 %v2223_v41  ;;  %v6243_v2 = vld [vmem:[%s7325_s20 + $0x280] sm:$0xff]  }
 0x2d7   : > { %5671 = vmatprep.subr.bf16.mxu1 %v6243_v2  ;;  %v6251_v2 = vld [vmem:[%s7325_s20 + $0x2a0] sm:$0xff]  }
 0x2d8   : > { %v2222_v17 = vpack.c.bf16 %v2182_v26, %v2177_v25  ;;  %v2048_v12 = vld [vmem:[#allocation3 + $0x1f8] sm:$0xff]  ;;  %5672 = vmatpush3.bf16.msra.mxu1 %v6244_v37  ;;  %v6252_v37 = vld [vmem:[%s7325_s20 + $0x260] sm:$0xff]  }
 0x2d9   : > { %v2053_v24 = vld [vmem:[#allocation3 + $0x220] sm:$0xff]  ;;  %v2188_v29 = vmul.f32 %v2118_v54, %v2048_v12  ;;  %v6246_v12 = vld [vmem:[%s7325_s20 + $0x248] sm:$0xff]  }
 0x2da   : > { %v2193_v46 = vmul.f32 %v2123_v10, %v2053_v24  ;;  %2782 = vmatmul.mubr.bf16.gmra.mrb[20].mxu1 %v2222_v17  ;;  %5899 = vmatmul.mubr.msk.bf16.gmra.mrb[48].mxu0 %vm53_vm0, %v2294_v21  ;;  %v6245_v10 = vld [vmem:[%s7325_s20 + $0x288] sm:$0xff]  }
 0x2db   : > { %5902 = vmatprep.mubr.msk.bf16.mxu0 %vm6451_vm3, %v6450_v16  ;;  %5673 = vmatprep.subr.bf16.mxu1 %v6245_v10  ;;  %v2916_v10 = vld [vmem:[#allocation2] sm:$0xff] }
 0x2dc   : > { %v2228_v33 = vpack.c.bf16 %v2193_v46, %v2188_v29  ;;  %v2047_v22 = vld [vmem:[#allocation3 + $0x1f0] sm:$0xff]  ;;  %5674 = vmatpush3.bf16.msra.mxu1 %v6246_v12  ;;  %2930 = vst.msk [vmem:[#allocation3] sm:$0xff] %vm53_vm0, %v2916_v10 }
 0x2dd   : > { %v2052_v19 = vld [vmem:[#allocation3 + $0x218] sm:$0xff]  ;;  %v2187_v35 = vmul.f32 %v2117_v38, %v2047_v22 }
 0x2de   : > { %v2192_v36 = vmul.f32 %v2122_v32, %v2052_v19  ;;  %2789 = vmatprep.mubr.bf16.mxu1 %v2228_v33  ;;  %v6247_v32 = vld [vmem:[%s7325_s20 + $0x290] sm:$0xff]  }
 0x2df   : > { %v6248_v33 = vld [vmem:[%s7325_s20 + $0x250] sm:$0xff]   ;;  %5675 = vmatprep.subr.bf16.mxu1 %v6247_v32 }
 0x2e0   : > { %v2227_v53 = vpack.c.bf16 %v2192_v36, %v2187_v35  ;;  %5676 = vmatpush3.bf16.msra.mxu1 %v6248_v33  ;;  %v6253_v33 = vld [vmem:[%s7325_s20 + $0x2a8] sm:$0xff]  }
 0x2e2   : > { %2790 = vmatmul.mubr.bf16.gmra.mrb[24].mxu1 %v2227_v53  ;;  %5903 = vmatmul.mubr.msk.bf16.gmra.mrb[52].mxu0 %vm53_vm0, %v2299_v44 }
 0x34d   : > { %v5560_v7 = vpop.f32.mrb[0].mxu0 }
 0x34e   : > { %v5561_v58 = vpop.f32.mrb[1].mxu0 }
 0x34f   : > { %v5562_v40 = vadd.f32 %v5561_v58, %v5560_v7  ;;  %v5563_v43 = vpop.f32.mrb[2].mxu0  ;;  %v6249_v7 = vld [vmem:[%s7325_s20 + $0x298] sm:$0xff]   ;;  %v7943_v58 = vld [vmem:[%s7937_s19 + $0x1] ss:$0 sm:$0xff] }
 0x350   : > { %v5564_v51 = vpop.f32.mrb[3].mxu0  ;;  %5677 = vmatprep.subr.bf16.mxu1 %v6249_v7 }
 0x351   : > { %v7903_v52 = vadd.f32 %v5564_v51, %v5563_v43  ;;  %v6250_v51 = vld [vmem:[%s7325_s20 + $0x258] sm:$0xff]  }
 0x352   : > { %5678 = vmatpush3.bf16.msra.mxu1 %v6250_v51 }
 0x353   : > { %5679 = vmatprep.subr.bf16.mxu1 %v6251_v2 }
 0x355   : > { %v5566_v6 = vpop.f32.mrb[4].mxu0 }
 0x356   : > { %v5567_v45 = vpop.f32.mrb[5].mxu0  ;;  %5680 = vmatpush3.bf16.msra.mxu1 %v6252_v37  ;;  %v6257_v37 = vld [vmem:[%s7325_s20 + $0x2b8] sm:$0xff]  }
 0x357   : > { %v7905_v50 = vadd.f32 %v5567_v45, %v5566_v6  ;;  %v5569_v13 = vpop.f32.mrb[6].mxu0  ;;  %5681 = vmatprep.subr.bf16.mxu1 %v6253_v33 }
 0x358   : > { %v5570_v3 = vpop.f32.mrb[7].mxu0 }
 0x359   : > { %v7907_v61 = vadd.f32 %v5570_v3, %v5569_v13  ;;  %v2655_v13 = vadd.f32 %v5562_v40, %v7943_v58 }
 0x35d   : > { %v5572_v14 = vpop.f32.mrb[8].mxu0 }
 0x35e   : > { %v5573_v27 = vpop.f32.mrb[9].mxu0 }
 0x35f   : > { %v7909_v56 = vadd.f32 %v5573_v27, %v5572_v14  ;;  %v5575_v57 = vpop.f32.mrb[10].mxu0 }
 0x360   : > { %v5576_v60 = vpop.f32.mrb[11].mxu0 }
 0x361   : > { %v7911_v62 = vadd.f32 %v5576_v60, %v5575_v57 }
 0x365   : > { %v5578_v63 = vpop.f32.mrb[12].mxu0 }
 0x366   : > { %v5579_v5 = vpop.f32.mrb[13].mxu0 }
 0x367   : > { %v7913_v30 = vadd.f32 %v5579_v5, %v5578_v63  ;;  %v5581_v1 = vpop.f32.mrb[14].mxu0  ;;  %v2658_v63 = vadd.f32 %v7903_v52, %v7943_v58  ;;  %v2663_v52 = vadd.f32 %v7905_v50, %v7943_v58 }
 0x368   : > { %v5582_v59 = vpop.f32.mrb[15].mxu0 }
 0x369   : > { %v7915_v20 = vadd.f32 %v5582_v59, %v5581_v1 }
 0x36d   : > { %v5584_v41 = vpop.f32.mrb[16].mxu0 }
 0x36e   : > { %v5585_v8 = vpop.f32.mrb[17].mxu0 }
 0x36f   : > { %v7919_v9 = vadd.f32 %v5585_v8, %v5584_v41  ;;  %v5587_v25 = vpop.f32.mrb[18].mxu0 }
 0x370   : > { %v5588_v26 = vpop.f32.mrb[19].mxu0 }
 0x371   : > { %v7921_v54 = vadd.f32 %v5588_v26, %v5587_v25 }
 0x375   : > { %v5590_v17 = vpop.f32.mrb[20].mxu0 }
 0x376   : > { %v5591_v21 = vpop.f32.mrb[21].mxu0 }
 0x377   : > { %v7925_v24 = vadd.f32 %v5591_v21, %v5590_v17  ;;  %v5593_v29 = vpop.f32.mrb[22].mxu0 }
 0x378   : > { %v5594_v46 = vpop.f32.mrb[23].mxu0 }
 0x379   : > { %v7927_v38 = vadd.f32 %v5594_v46, %v5593_v29 }
 0x37d   : > { %v5596_v22 = vpop.f32.mrb[24].mxu0 }
 0x37e   : > { %v5597_v19 = vpop.f32.mrb[25].mxu0 }
 0x37f   : > { %v7932_v35 = vadd.f32 %v5597_v19, %v5596_v22  ;;  %v5599_v36 = vpop.f32.mrb[26].mxu0 }
 0x380   : > { %v5600_v53 = vpop.f32.mrb[27].mxu0 }
 0x381   : > { %v7939_v44 = vadd.f32 %v5600_v53, %v5599_v36  ;;  %v6254_v36 = vld [vmem:[%s7325_s20 + $0x268] sm:$0xff]   ;;  %v2666_v53 = vadd.f32 %v7907_v61, %v7943_v58 }
 0x382   : > { %5682 = vmatpush3.bf16.msra.mxu1 %v6254_v36 }
 0x385   : > { %v5618_v43 = vpop.f32.mrb[0].mxu1  ;;  %v2832_v45 = vpop.f32.mrb[28].mxu0 }
 0x386   : > { %v5619_v6 = vpop.f32.mrb[1].mxu1  ;;  %v5880_v27 = vpop.f32.mrb[29].mxu0 }
 0x387   : > { %v5620_v3 = vadd.f32 %v5619_v6, %v5618_v43  ;;  %v5621_v14 = vpop.f32.mrb[2].mxu1  ;;  %v2835_v60 = vpop.f32.mrb[30].mxu0 }
 0x388   : > { %v5622_v57 = vpop.f32.mrb[3].mxu1  ;;  %v5881_v59 = vpop.f32.mrb[31].mxu0 }
 0x389   : > { %v2744_v5 = vadd.f32 %v5620_v3, %v2655_v13  ;;  %v5623_v1 = vadd.f32 %v5622_v57, %v5621_v14  ;;  %v6256_v13 = vld [vmem:[%s7325_s20 + $0x270] sm:$0xff]  }
 0x38b   : > { %v2833_v41 = vadd.f32 %v2832_v45, %v2744_v5  ;;  %v2747_v8 = vadd.f32 %v5623_v1, %v2658_v63  ;;  %v6255_v45 = vld [vmem:[%s7325_s20 + $0x2b0] sm:$0xff]   ;;  %v2671_v5 = vadd.f32 %v7909_v56, %v7943_v58  ;;  %v2674_v56 = vadd.f32 %v7911_v62, %v7943_v58 }
 0x38c   : > { %5683 = vmatprep.subr.bf16.mxu1 %v6255_v45 }
 0x38d   : > { %v2887_v25 = vmax.f32 %v2833_v41, 0.0  ;;  %v2836_v26 = vadd.f32 %v2835_v60, %v2747_v8  ;;  %v5624_v40 = vpop.f32.mrb[4].mxu1  ;;  %v2840_v21 = vpop.f32.mrb[32].mxu0  ;;  %5684 = vmatpush3.bf16.msra.mxu1 %v6256_v13 }
 0x38e   : > { %v5625_v17 = vpop.f32.mrb[5].mxu1  ;;  %v5884_v32 = vpop.f32.mrb[33].mxu0  ;;  %5685 = vmatprep.subr.bf16.mxu1 %v6257_v37 }
 0x38f   : > { %2902 = vst.msk [vmem:[#allocation2 + $0x8] sm:$0xff] %vm53_vm0, %v2887_v25  ;;  %v2888_v12 = vmax.f32 %v2836_v26, 0.0  ;;  %v5626_v29 = vadd.f32 %v5625_v17, %v5624_v40  ;;  %v5627_v46 = vpop.f32.mrb[6].mxu1  ;;  %v2843_v19 = vpop.f32.mrb[34].mxu0  ;;  %v6258_v32 = vld [vmem:[%s7325_s20 + $0x278] sm:$0xff]  }
 0x390   : > { %v5628_v22 = vpop.f32.mrb[7].mxu1  ;;  %v5885_v50 = vpop.f32.mrb[35].mxu0 }
 0x391   : > { %2903 = vst.msk [vmem:[#allocation2 + $0x10] sm:$0xff] %vm53_vm0, %v2888_v12  ;;  %v5629_v7 = vadd.f32 %v5628_v22, %v5627_v46  ;;  %v2752_v43 = vadd.f32 %v5626_v29, %v2663_v52  ;;  %5686 = vmatpush3.bf16.msra.mxu1 %v6258_v32 }
 0x392   : > { %5906 = vmatprep.subr.bf16.mxu1 %v6450_v16 }
 0x393   : > { %v2841_v51 = vadd.f32 %v2840_v21, %v2752_v43  ;;  %v2755_v6 = vadd.f32 %v5629_v7, %v2666_v53 }
 0x395   : > { %v2889_v3 = vmax.f32 %v2841_v51, 0.0  ;;  %v2844_v14 = vadd.f32 %v2843_v19, %v2755_v6  ;;  %v5630_v27 = vpop.f32.mrb[8].mxu1  ;;  %v2848_v63 = vpop.f32.mrb[36].mxu0  ;;  %v2679_v51 = vadd.f32 %v7913_v30, %v7943_v58  ;;  %v2682_v30 = vadd.f32 %v7915_v20, %v7943_v58 }
 0x396   : > { %v5631_v57 = vpop.f32.mrb[9].mxu1  ;;  %v3056_v60 = vld [vmem:[#allocation2 + $0x7] sm:$0xff]  ;;  %v5888_v8 = vpop.f32.mrb[37].mxu0 }
 0x397   : > { %v3028_v61 = vld [vmem:[#allocation2 + $0x2] sm:$0xff]  ;;  %2904 = vst.msk [vmem:[#allocation2 + $0x18] sm:$0xff] %vm53_vm0, %v2889_v3  ;;  %v2890_v1 = vmax.f32 %v2844_v14, 0.0  ;;  %v5632_v59 = vadd.f32 %v5631_v57, %v5630_v27  ;;  %3084 = vrot.lane.b32.xlu0 %v3056_v60, %s6449_s23  ;;  %v5633_v41 = vpop.f32.mrb[10].mxu1  ;;  %v2851_v40 = vpop.f32.mrb[38].mxu0 }
 0x398   : > { %3042 = vst.msk [vmem:[#allocation3 + $0x8] sm:$0xff] %vm53_vm0, %v3028_v61  ;;  %v2917_v2 = vld [vmem:[#allocation2 + $0x8] sm:$0xff]  ;;  %v5634_v25 = vpop.f32.mrb[11].mxu1  ;;  %v5889_v52 = vpop.f32.mrb[39].mxu0  ;;  %v2918_v29 = vld [vmem:[#allocation2 + $0x10] sm:$0xff] }
 0x399   : > { %v3057_v26 = vld [vmem:[#allocation2 + $0xf] sm:$0xff]  ;;  %2931 = vst.msk [vmem:[#allocation3 + $0x28] sm:$0xff] %vm53_vm0, %v2917_v2  ;;  %3154 = vst.msk [vmem:[#allocation3 + $0x10] sm:$0xff] %vm53_vm0, %v2917_v2  ;;  %v5635_v17 = vadd.f32 %v5634_v25, %v5633_v41  ;;  %v2760_v21 = vadd.f32 %v5632_v59, %v2671_v5  ;;  %v2944_v46 = vld [vmem:[#allocation2 + $0x1] sm:$0xff] }
 0x39a   : > { %v3029_v10 = vld [vmem:[#allocation2 + $0xa] sm:$0xff]  ;;  %2905 = vst.msk [vmem:[#allocation2 + $0x20] sm:$0xff] %vm53_vm0, %v2890_v1  ;;  %3086 = vrot.lane.b32.xlu1 %v3057_v26, %s6449_s23  ;;  %2932 = vst.msk [vmem:[#allocation3 + $0x50] sm:$0xff] %vm53_vm0, %v2918_v29 }
 0x39b   : > { %3043 = vst.msk [vmem:[#allocation3 + $0x30] sm:$0xff] %vm53_vm0, %v3029_v10  ;;  %v3252_v12 = vld [vmem:[#allocation2 + $0xe] sm:$0xff]  ;;  %3155 = vst.msk [vmem:[#allocation3 + $0x38] sm:$0xff] %vm53_vm0, %v2918_v29  ;;  %v2849_v62 = vadd.f32 %v2848_v63, %v2760_v21  ;;  %2972 = vrot.lane.b32.xlu0 %v2944_v46, %s6449_s23  ;;  %v2763_v33 = vadd.f32 %v5635_v17, %v2674_v56  ;;  %v3466_v21 = vld [vmem:[%s9040_s1 + $0x20] sm:$0xff] }
 0x39c   : > { %3266 = vst.msk [vmem:[#allocation3 + $0x18] sm:$0xff] %vm53_vm0, %v3252_v12  ;;  %3378 = vst.msk [vmem:[#allocation3 + $0x20] sm:$0xff] %vm53_vm0, %v2918_v29  ;;  %v7981_v22 = vld [vmem:[#allocation2 + $0x9] sm:$0xff]  ;;  %v2687_v12 = vadd.f32 %v7919_v9, %v7943_v58 }
 0x39d   : > { %v2891_v19 = vmax.f32 %v2849_v62, 0.0  ;;  %v2852_v36 = vadd.f32 %v2851_v40, %v2763_v33  ;;  %v5636_v53 = vpop.f32.mrb[12].mxu1  ;;  %v2856_v43 = vpop.f32.mrb[40].mxu0  ;;  %v3471_v52 = vld [vmem:[%s9040_s1 + $0x48] sm:$0xff] }
 0x39e   : > { %2974 = vrot.lane.b32.xlu1 %v7981_v22, %s6449_s23  ;;  %v5637_v7 = vpop.f32.mrb[13].mxu1  ;;  %v3253_v50 = vld [vmem:[#allocation2 + $0x16] sm:$0xff]  ;;  %v5892_v3 = vpop.f32.mrb[41].mxu0 }
 0x39f   : > { %2906 = vst.msk [vmem:[#allocation2 + $0x28] sm:$0xff] %vm53_vm0, %v2891_v19  ;;  %v2892_v6 = vmax.f32 %v2852_v36, 0.0  ;;  %v5638_v45 = vadd.f32 %v5637_v7, %v5636_v53  ;;  %3308 = vrot.lane.b32.xlu0 %v3057_v26, %s6449_s23  ;;  %v5639_v13 = vpop.f32.mrb[14].mxu1  ;;  %3267 = vst.msk [vmem:[#allocation3 + $0x40] sm:$0xff] %vm53_vm0, %v3253_v50  ;;  %v3030_v14 = vld [vmem:[#allocation2 + $0x12] sm:$0xff]  ;;  %v2859_v63 = vpop.f32.mrb[42].mxu0 }
 0x3a0   : > { %v2919_v27 = vld [vmem:[#allocation2 + $0x18] sm:$0xff]  ;;  %v5640_v57 = vpop.f32.mrb[15].mxu1  ;;  %3044 = vst.msk [vmem:[#allocation3 + $0x58] sm:$0xff] %vm53_vm0, %v3030_v14  ;;  %v5893_v59 = vpop.f32.mrb[43].mxu0 }
 0x3a1   : > { %v3281_v60 = vld [vmem:[#allocation2 + $0x17] sm:$0xff]  ;;  %2933 = vst.msk [vmem:[#allocation3 + $0x78] sm:$0xff] %vm53_vm0, %v2919_v27  ;;  %3156 = vst.msk [vmem:[#allocation3 + $0x60] sm:$0xff] %vm53_vm0, %v2919_v27  ;;  %v5641_v5 = vadd.f32 %v5640_v57, %v5639_v13  ;;  %v2768_v1 = vadd.f32 %v5638_v45, %v2679_v51  ;;  %v2920_v41 = vld [vmem:[#allocation2 + $0x20] sm:$0xff]  ;;  %v2690_v51 = vadd.f32 %v7921_v54, %v7943_v58 }
 0x3a2   : > { %v3031_v61 = vld [vmem:[#allocation2 + $0x1a] sm:$0xff]  ;;  %3379 = vst.msk [vmem:[#allocation3 + $0x48] sm:$0xff] %vm53_vm0, %v2919_v27  ;;  %2907 = vst.msk [vmem:[#allocation2 + $0x30] sm:$0xff] %vm53_vm0, %v2892_v6  ;;  %3310 = vrot.lane.b32.xlu1 %v3281_v60, %s6449_s23  ;;  %v8009_v56 = vld [vmem:[#allocation2 + $0x11] sm:$0xff] }
 0x3a3   : > { %3045 = vst.msk [vmem:[#allocation3 + $0x80] sm:$0xff] %vm53_vm0, %v3031_v61  ;;  %v3254_v8 = vld [vmem:[#allocation2 + $0x1e] sm:$0xff]  ;;  %2934 = vst.msk [vmem:[#allocation3 + $0xa0] sm:$0xff] %vm53_vm0, %v2920_v41  ;;  %v2857_v20 = vadd.f32 %v2856_v43, %v2768_v1  ;;  %3088 = vrot.lane.b32.xlu0 %v3281_v60, %s6449_s23  ;;  %v2771_v2 = vadd.f32 %v5641_v5, %v2682_v30 }
 0x3a4   : > { %3268 = vst.msk [vmem:[#allocation3 + $0x68] sm:$0xff] %vm53_vm0, %v3254_v8  ;;  %3157 = vst.msk [vmem:[#allocation3 + $0x88] sm:$0xff] %vm53_vm0, %v2920_v41  ;;  %v8005_v37 = vld [vmem:[#allocation2 + $0x1f] sm:$0xff] }
 0x3a5   : > { %3380 = vst.msk [vmem:[#allocation3 + $0x70] sm:$0xff] %vm53_vm0, %v2920_v41  ;;  %v2893_v25 = vmax.f32 %v2857_v20, 0.0  ;;  %v2860_v26 = vadd.f32 %v2859_v63, %v2771_v2  ;;  %v5642_v40 = vpop.f32.mrb[16].mxu1  ;;  %v2864_v17 = vpop.f32.mrb[44].mxu0  ;;  %v8022_v7 = vld [vmem:[#allocation2 + $0x19] sm:$0xff] }
 0x3a6   : > { %3090 = vrot.lane.b32.xlu1 %v8005_v37, %s6449_s23  ;;  %v5643_v10 = vpop.f32.mrb[17].mxu1  ;;  %v5896_v62 = vpop.f32.mrb[45].mxu0  ;;  %v3032_v33 = vld [vmem:[#allocation2 + $0x22] sm:$0xff] }
 0x3a7   : > { %2908 = vst.msk [vmem:[#allocation2 + $0x38] sm:$0xff] %vm53_vm0, %v2893_v25  ;;  %v2894_v29 = vmax.f32 %v2860_v26, 0.0  ;;  %v5644_v46 = vadd.f32 %v5643_v10, %v5642_v40  ;;  %2976 = vrot.lane.b32.xlu0 %v8009_v56, %s6449_s23  ;;  %v5645_v32 = vpop.f32.mrb[18].mxu1  ;;  %v2921_v19 = vld [vmem:[#allocation2 + $0x28] sm:$0xff]  ;;  %v2867_v43 = vpop.f32.mrb[46].mxu0  ;;  %3046 = vst.msk [vmem:[#allocation3 + $0xa8] sm:$0xff] %vm53_vm0, %v3032_v33  ;;  %v2695_v10 = vadd.f32 %v7925_v24, %v7943_v58 }
 0x3a8   : > { %v3255_v36 = vld [vmem:[#allocation2 + $0x26] sm:$0xff]  ;;  %v5646_v53 = vpop.f32.mrb[19].mxu1  ;;  %2935 = vst.msk [vmem:[#allocation3 + $0xc8] sm:$0xff] %vm53_vm0, %v2921_v19  ;;  %3158 = vst.msk [vmem:[#allocation3 + $0xb0] sm:$0xff] %vm53_vm0, %v2921_v19  ;;  %v5897_v13 = vpop.f32.mrb[47].mxu0  ;;  %v3476_v26 = vld [vmem:[%s9040_s1 + $0x70] sm:$0xff] }
 0x3a9   : > { %v3033_v50 = vld [vmem:[#allocation2 + $0x2a] sm:$0xff]  ;;  %3269 = vst.msk [vmem:[#allocation3 + $0x90] sm:$0xff] %vm53_vm0, %v3255_v36  ;;  %v3396_v9 = vld [vmem:[#allocation3 + $0x20] sm:$0xff]  ;;  %3381 = vst.msk [vmem:[#allocation3 + $0x98] sm:$0xff] %vm53_vm0, %v2921_v19  ;;  %v5647_v6 = vadd.f32 %v5646_v53, %v5645_v32  ;;  %v2776_v45 = vadd.f32 %v5644_v46, %v2687_v12  ;;  %v2698_v53 = vadd.f32 %v7927_v38, %v7943_v58 }
 0x3aa   : > { %2909 = vst.msk [vmem:[#allocation2 + $0x40] sm:$0xff] %vm53_vm0, %v2894_v29  ;;  %2978 = vrot.lane.b32.xlu1 %v8022_v7, %s6449_s23  ;;  %3047 = vst.msk [vmem:[#allocation3 + $0xd0] sm:$0xff] %vm53_vm0, %v3033_v50  ;;  %v2922_v3 = vld [vmem:[#allocation2 + $0x30] sm:$0xff]  ;;  %v8035_v27 = vld [vmem:[#allocation2 + $0x27] sm:$0xff]  ;;  %v3536_v63 = vmul.f32 %v3466_v21, %v3396_v9 }
 0x3ab   : > { %v3256_v14 = vld [vmem:[#allocation2 + $0x2e] sm:$0xff]  ;;  %2936 = vst.msk [vmem:[#allocation3 + $0xf0] sm:$0xff] %vm53_vm0, %v2922_v3  ;;  %3159 = vst.msk [vmem:[#allocation3 + $0xd8] sm:$0xff] %vm53_vm0, %v2922_v3  ;;  %v2865_v57 = vadd.f32 %v2864_v17, %v2776_v45  ;;  %3092 = vrot.lane.b32.xlu0 %v8035_v27, %s6449_s23  ;;  %v2779_v60 = vadd.f32 %v5647_v6, %v2690_v51  ;;  %v6259_v5 = vld [vmem:[%s7325_s20 + $0x300] sm:$0xff]  }
 0x3ac   : > { %3270 = vst.msk [vmem:[#allocation3 + $0xb8] sm:$0xff] %vm53_vm0, %v3256_v14  ;;  %v3401_v54 = vld [vmem:[#allocation3 + $0x48] sm:$0xff]  ;;  %3382 = vst.msk [vmem:[#allocation3 + $0xc0] sm:$0xff] %vm53_vm0, %v2922_v3  ;;  %5729 = vmatprep.subr.bf16.mxu0 %v6259_v5  ;;  %v3481_v40 = vld [vmem:[%s9040_s1 + $0x98] sm:$0xff] }
 0x3ad   : > { %v3541_v61 = vmul.f32 %v3471_v52, %v3401_v54  ;;  %v8043_v30 = vld [vmem:[#allocation2 + $0x2f] sm:$0xff]  ;;  %v2895_v1 = vmax.f32 %v2865_v57, 0.0  ;;  %v2868_v59 = vadd.f32 %v2867_v43, %v2779_v60  ;;  %v5648_v41 = vpop.f32.mrb[20].mxu1  ;;  %v8048_v2 = vld [vmem:[#allocation2 + $0x21] sm:$0xff]  ;;  %v2872_v25 = vpop.f32.mrb[48].mxu0 }
 0x3ae   : > { %3094 = vrot.lane.b32.xlu1 %v8043_v30, %s6449_s23  ;;  %v5649_v20 = vpop.f32.mrb[21].mxu1  ;;  %v5900_v12 = vpop.f32.mrb[49].mxu0  ;;  %v3034_v29 = vld [vmem:[#allocation2 + $0x32] sm:$0xff]  ;;  %v8062_v33 = vld [vmem:[#allocation2 + $0x29] sm:$0xff]  ;;  %v6260_v36 = vld [vmem:[%s7325_s20 + $0x2c0] sm:$0xff]  }
 0x3af   : > { %v3606_v8 = vpack.c.bf16 %v3541_v61, %v3536_v63  ;;  %2910 = vst.msk [vmem:[#allocation2 + $0x48] sm:$0xff] %vm53_vm0, %v2895_v1  ;;  %v2896_v17 = vmax.f32 %v2868_v59, 0.0  ;;  %v5650_v21 = vadd.f32 %v5649_v20, %v5648_v41  ;;  %2980 = vrot.lane.b32.xlu0 %v8048_v2, %s6449_s23  ;;  %v5651_v52 = vpop.f32.mrb[22].mxu1  ;;  %v2923_v46 = vld [vmem:[#allocation2 + $0x38] sm:$0xff]  ;;  %v2875_v19 = vpop.f32.mrb[50].mxu0  ;;  %3048 = vst.msk [vmem:[#allocation3 + $0xf8] sm:$0xff] %vm53_vm0, %v3034_v29  ;;  %5730 = vmatpush3.bf16.msra.mxu0 %v6260_v36 }
 0x3b0   : > { %v3257_v32 = vld [vmem:[#allocation2 + $0x36] sm:$0xff]  ;;  %v5652_v62 = vpop.f32.mrb[23].mxu1  ;;  %2937 = vst.msk [vmem:[#allocation3 + $0x118] sm:$0xff] %vm53_vm0, %v2923_v46  ;;  %3160 = vst.msk [vmem:[#allocation3 + $0x100] sm:$0xff] %vm53_vm0, %v2923_v46  ;;  %v5901_v9 = vpop.f32.mrb[51].mxu0  ;;  %v6262_v63 = vld [vmem:[%s7325_s20 + $0x308] sm:$0xff]  }
 0x3b1   : > { %3641 = vst.msk [vmem:[#allocation4 + $0x20] sm:$0xff] %vm53_vm0, %v3606_v8  ;;  %3271 = vst.msk [vmem:[#allocation3 + $0xe0] sm:$0xff] %vm53_vm0, %v3257_v32  ;;  %v3406_v24 = vld [vmem:[#allocation3 + $0x70] sm:$0xff]  ;;  %v5653_v43 = vadd.f32 %v5652_v62, %v5651_v52  ;;  %v2784_v50 = vadd.f32 %v5650_v21, %v2695_v10  ;;  %v3035_v51 = vld [vmem:[#allocation2 + $0x3a] sm:$0xff]  ;;  %5731 = vmatprep.subr.bf16.mxu0 %v6262_v63  ;;  %v2703_v10 = vadd.f32 %v7932_v35, %v7943_v58 }
 0x3b2   : > { %3383 = vst.msk [vmem:[#allocation3 + $0xe8] sm:$0xff] %vm53_vm0, %v2923_v46  ;;  %2911 = vst.msk [vmem:[#allocation2 + $0x50] sm:$0xff] %vm53_vm0, %v2896_v17  ;;  %2982 = vrot.lane.b32.xlu1 %v8062_v33, %s6449_s23  ;;  %v2924_v6 = vld [vmem:[#allocation2 + $0x40] sm:$0xff]  ;;  %v8075_v45 = vld [vmem:[#allocation2 + $0x37] sm:$0xff]  ;;  %v3546_v54 = vmul.f32 %v3476_v26, %v3406_v24 }
 0x3b3   : > { %3049 = vst.msk [vmem:[#allocation3 + $0x120] sm:$0xff] %vm53_vm0, %v3035_v51  ;;  %2938 = vst.msk [vmem:[#allocation3 + $0x140] sm:$0xff] %vm53_vm0, %v2924_v6  ;;  %v3258_v38 = vld [vmem:[#allocation2 + $0x3e] sm:$0xff]  ;;  %v2873_v3 = vadd.f32 %v2872_v25, %v2784_v50  ;;  %3096 = vrot.lane.b32.xlu0 %v8075_v45, %s6449_s23  ;;  %v2787_v14 = vadd.f32 %v5653_v43, %v2698_v53  ;;  %v6263_v61 = vld [vmem:[%s7325_s20 + $0x2c8] sm:$0xff]   ;;  %v2706_v53 = vadd.f32 %v7939_v44, %v7943_v58 }
 0x3b4   : > { %3161 = vst.msk [vmem:[#allocation3 + $0x128] sm:$0xff] %vm53_vm0, %v2924_v6  ;;  %v3411_v13 = vld [vmem:[#allocation3 + $0x98] sm:$0xff]  ;;  %3384 = vst.msk [vmem:[#allocation3 + $0x110] sm:$0xff] %vm53_vm0, %v2924_v6  ;;  %v3486_v26 = vld [vmem:[%s9040_s1 + $0xc0] sm:$0xff]  ;;  %5732 = vmatpush3.bf16.msra.mxu0 %v6263_v61 }
 0x3b5   : > { %3272 = vst.msk [vmem:[#allocation3 + $0x108] sm:$0xff] %vm53_vm0, %v3258_v38  ;;  %v3551_v57 = vmul.f32 %v3481_v40, %v3411_v13  ;;  %v8084_v60 = vld [vmem:[#allocation2 + $0x3f] sm:$0xff]  ;;  %v2897_v5 = vmax.f32 %v2873_v3, 0.0  ;;  %v2876_v1 = vadd.f32 %v2875_v19, %v2787_v14  ;;  %v5654_v59 = vpop.f32.mrb[24].mxu1  ;;  %v8090_v20 = vld [vmem:[#allocation2 + $0x31] sm:$0xff]  ;;  %v2880_v25 = vpop.f32.mrb[52].mxu0 }
 0x3b6   : > { %3098 = vrot.lane.b32.xlu1 %v8084_v60, %s6449_s23  ;;  %v5655_v8 = vpop.f32.mrb[25].mxu1  ;;  %v3491_v40 = vld [vmem:[%s9040_s1 + $0xe8] sm:$0xff]  ;;  %v5904_v12 = vpop.f32.mrb[53].mxu0  ;;  %v8104_v19 = vld [vmem:[#allocation2 + $0x39] sm:$0xff]  ;;  %v6264_v3 = vld [vmem:[%s7325_s20 + $0x310] sm:$0xff]  }
 0x3b7   : > { %v3611_v41 = vpack.c.bf16 %v3551_v57, %v3546_v54  ;;  %2912 = vst.msk [vmem:[#allocation2 + $0x58] sm:$0xff] %vm53_vm0, %v2897_v5  ;;  %v2898_v17 = vmax.f32 %v2876_v1, 0.0  ;;  %v5656_v21 = vadd.f32 %v5655_v8, %v5654_v59  ;;  %2984 = vrot.lane.b32.xlu0 %v8090_v20, %s6449_s23  ;;  %v5657_v52 = vpop.f32.mrb[26].mxu1  ;;  %v3036_v29 = vld [vmem:[#allocation2 + $0x42] sm:$0xff]  ;;  %v2883_v36 = vpop.f32.mrb[54].mxu0  ;;  %v6265_v63 = vld [vmem:[%s7325_s20 + $0x2d0] sm:$0xff]   ;;  %5733 = vmatprep.subr.bf16.mxu0 %v6264_v3 }
 0x3b8   : > { %v2925_v46 = vld [vmem:[#allocation2 + $0x48] sm:$0xff]  ;;  %v5658_v62 = vpop.f32.mrb[27].mxu1  ;;  %3050 = vst.msk [vmem:[#allocation3 + $0x148] sm:$0xff] %vm53_vm0, %v3036_v29  ;;  %v3416_v24 = vld [vmem:[#allocation3 + $0xc0] sm:$0xff]  ;;  %v5905_v9 = vpop.f32.mrb[55].mxu0  ;;  %5734 = vmatpush3.bf16.msra.mxu0 %v6265_v63 }
 0x3b9   : > { %v3259_v32 = vld [vmem:[#allocation2 + $0x46] sm:$0xff]  ;;  %3646 = vst.msk [vmem:[#allocation4 + $0x48] sm:$0xff] %vm53_vm0, %v3611_v41  ;;  %2939 = vst.msk [vmem:[#allocation3 + $0x168] sm:$0xff] %vm53_vm0, %v2925_v46  ;;  %v5659_v43 = vadd.f32 %v5658_v62, %v5657_v52  ;;  %v2792_v50 = vadd.f32 %v5656_v21, %v2703_v10  ;;  %v2926_v51 = vld [vmem:[#allocation2 + $0x50] sm:$0xff]  ;;  %v3556_v14 = vmul.f32 %v3486_v26, %v3416_v24 }
 0x3ba   : > { %v3037_v35 = vld [vmem:[#allocation2 + $0x4a] sm:$0xff]  ;;  %3273 = vst.msk [vmem:[#allocation3 + $0x130] sm:$0xff] %vm53_vm0, %v3259_v32  ;;  %3162 = vst.msk [vmem:[#allocation3 + $0x150] sm:$0xff] %vm53_vm0, %v2925_v46  ;;  %2986 = vrot.lane.b32.xlu1 %v8104_v19, %s6449_s23  ;;  %v8131_v59 = vld [vmem:[#allocation2 + $0x41] sm:$0xff] }
 0x3bb   : > { %3385 = vst.msk [vmem:[#allocation3 + $0x138] sm:$0xff] %vm53_vm0, %v2925_v46  ;;  %2913 = vst.msk [vmem:[#allocation2 + $0x60] sm:$0xff] %vm53_vm0, %v2898_v17  ;;  %v8117_v6 = vld [vmem:[#allocation2 + $0x47] sm:$0xff]  ;;  %v2881_v58 = vadd.f32 %v2880_v25, %v2792_v50  ;;  %v2795_v13 = vadd.f32 %v5659_v43, %v2706_v53  ;;  %v8126_v57 = vld [vmem:[#allocation2 + $0x4f] sm:$0xff] }
 0x3bc   : > { %3051 = vst.msk [vmem:[#allocation3 + $0x170] sm:$0xff] %vm53_vm0, %v3037_v35  ;;  %2940 = vst.msk [vmem:[#allocation3 + $0x190] sm:$0xff] %vm53_vm0, %v2926_v51  ;;  %v3260_v38 = vld [vmem:[#allocation2 + $0x4e] sm:$0xff]  ;;  %3100 = vrot.lane.b32.xlu0 %v8117_v6, %s6449_s23  ;;  %v6267_v25 = vld [vmem:[%s7325_s20 + $0x318] sm:$0xff]  }
 0x3bd   : > { %3163 = vst.msk [vmem:[#allocation3 + $0x178] sm:$0xff] %vm53_vm0, %v2926_v51  ;;  %v3421_v44 = vld [vmem:[#allocation3 + $0xe8] sm:$0xff]  ;;  %3386 = vst.msk [vmem:[#allocation3 + $0x160] sm:$0xff] %vm53_vm0, %v2926_v51  ;;  %v2899_v61 = vmax.f32 %v2881_v58, 0.0  ;;  %v2884_v5 = vadd.f32 %v2883_v36, %v2795_v13  ;;  %v3496_v10 = vld [vmem:[%s9040_s1 + $0x110] sm:$0xff]  ;;  %5735 = vmatprep.subr.bf16.mxu0 %v6267_v25 }
 0x3be   : > { %3274 = vst.msk [vmem:[#allocation3 + $0x158] sm:$0xff] %vm53_vm0, %v3260_v38  ;;  %v3561_v54 = vmul.f32 %v3491_v40, %v3421_v44  ;;  %3102 = vrot.lane.b32.xlu1 %v8126_v57, %s6449_s23  ;;  %v3038_v8 = vld [vmem:[#allocation2 + $0x52] sm:$0xff]  ;;  %v8138_v40 = vld [vmem:[#allocation2 + $0x49] sm:$0xff]  ;;  %v6269_v62 = vld [vmem:[%s7325_s20 + $0x320] sm:$0xff]  }
 0x3bf   : > { %2914 = vst.msk [vmem:[#allocation2 + $0x68] sm:$0xff] %vm53_vm0, %v2899_v61  ;;  %v2900_v41 = vmax.f32 %v2884_v5, 0.0  ;;  %v2927_v26 = vld [vmem:[#allocation2 + $0x58] sm:$0xff]  ;;  %3052 = vst.msk [vmem:[#allocation3 + $0x198] sm:$0xff] %vm53_vm0, %v3038_v8  ;;  %v3426_v12 = vld [vmem:[#allocation3 + $0x110] sm:$0xff] }
 0x3c0   : > { %v3616_v1 = vpack.c.bf16 %v3561_v54, %v3556_v14  ;;  %2988 = vrot.lane.b32.xlu0 %v8131_v59, %s6449_s23  ;;  %2941 = vst.msk [vmem:[#allocation3 + $0x1b8] sm:$0xff] %vm53_vm0, %v2927_v26  ;;  %3164 = vst.msk [vmem:[#allocation3 + $0x1a0] sm:$0xff] %vm53_vm0, %v2927_v26  ;;  %v3501_v17 = vld [vmem:[%s9040_s1 + $0x138] sm:$0xff]  ;;  %v6270_v24 = vld [vmem:[%s7325_s20 + $0x2e0] sm:$0xff]   ;;  %v3566_v43 = vmul.f32 %v3496_v10, %v3426_v12 }
 0x3c1   : > { %3387 = vst.msk [vmem:[#allocation3 + $0x188] sm:$0xff] %vm53_vm0, %v2927_v26  ;;  %2915 = vst.msk [vmem:[#allocation2 + $0x70] sm:$0xff] %vm53_vm0, %v2900_v41  ;;  %v6268_v52 = vld [vmem:[%s7325_s20 + $0x2d8] sm:$0xff]   ;;  %v3506_v54 = vld [vmem:[%s9040_s1 + $0x160] sm:$0xff] }
 0x3c2   : > { %3651 = vst.msk [vmem:[#allocation4 + $0x70] sm:$0xff] %vm53_vm0, %v3616_v1  ;;  %2990 = vrot.lane.b32.xlu1 %v8138_v40, %s6449_s23  ;;  %v3039_v21 = vld [vmem:[#allocation2 + $0x5a] sm:$0xff]  ;;  %5736 = vmatpush3.bf16.msra.mxu0 %v6268_v52  ;;  %v8170_v9 = vld [vmem:[#allocation2 + $0x51] sm:$0xff]  ;;  %v3511_v63 = vld [vmem:[%s9040_s1 + $0x188] sm:$0xff] }
 0x3c3   : > { %v8154_v29 = vld [vmem:[#allocation2 + $0x57] sm:$0xff]  ;;  %3053 = vst.msk [vmem:[#allocation3 + $0x1c0] sm:$0xff] %vm53_vm0, %v3039_v21  ;;  %v2928_v46 = vld [vmem:[#allocation2 + $0x60] sm:$0xff]  ;;  %5737 = vmatprep.subr.bf16.mxu0 %v6269_v62  ;;  %v6272_v5 = vld [vmem:[%s7325_s20 + $0x328] sm:$0xff]  }
 0x3c4   : > { %v3261_v32 = vld [vmem:[#allocation2 + $0x56] sm:$0xff]  ;;  %3104 = vrot.lane.b32.xlu0 %v8154_v29, %s6449_s23  ;;  %2942 = vst.msk [vmem:[#allocation3 + $0x1e0] sm:$0xff] %vm53_vm0, %v2928_v46  ;;  %v3262_v36 = vld [vmem:[#allocation2 + $0x5e] sm:$0xff]  ;;  %3165 = vst.msk [vmem:[#allocation3 + $0x1c8] sm:$0xff] %vm53_vm0, %v2928_v46 }
 0x3c5   : > { %3275 = vst.msk [vmem:[#allocation3 + $0x180] sm:$0xff] %vm53_vm0, %v3261_v32  ;;  %3388 = vst.msk [vmem:[#allocation3 + $0x1b0] sm:$0xff] %vm53_vm0, %v2928_v46  ;;  %v8164_v35 = vld [vmem:[#allocation2 + $0x5f] sm:$0xff]  ;;  %v6273_v1 = vld [vmem:[%s7325_s20 + $0x2e8] sm:$0xff]  }
 0x3c6   : > { %3276 = vst.msk [vmem:[#allocation3 + $0x1a8] sm:$0xff] %vm53_vm0, %v3262_v36  ;;  %v3431_v53 = vld [vmem:[#allocation3 + $0x138] sm:$0xff]  ;;  %3106 = vrot.lane.b32.xlu1 %v8164_v35, %s6449_s23  ;;  %v3040_v51 = vld [vmem:[#allocation2 + $0x62] sm:$0xff]  ;;  %5738 = vmatpush3.bf16.msra.mxu0 %v6270_v24  ;;  %v3516_v25 = vld [vmem:[%s9040_s1 + $0x1b0] sm:$0xff] }
 0x3c7   : > { %v3571_v50 = vmul.f32 %v3501_v17, %v3431_v53  ;;  %v2929_v38 = vld [vmem:[#allocation2 + $0x68] sm:$0xff]  ;;  %v8174_v13 = vld [vmem:[#allocation2 + $0x59] sm:$0xff]  ;;  %3054 = vst.msk [vmem:[#allocation3 + $0x1e8] sm:$0xff] %vm53_vm0, %v3040_v51  ;;  %5739 = vmatprep.subr.bf16.mxu0 %v6272_v5  ;;  %v6274_v52 = vld [vmem:[%s7325_s20 + $0x330] sm:$0xff]  }
 0x3c8   : > { %2992 = vrot.lane.b32.xlu0 %v8170_v9, %s6449_s23  ;;  %v3263_v44 = vld [vmem:[#allocation2 + $0x66] sm:$0xff]  ;;  %v3376_v3 = vld [vmem:[#allocation2 + $0x70] sm:$0xff]  ;;  %2943 = vst.msk [vmem:[#allocation3 + $0x208] sm:$0xff] %vm53_vm0, %v2929_v38  ;;  %3166 = vst.msk [vmem:[#allocation3 + $0x1f0] sm:$0xff] %vm53_vm0, %v2929_v38 }
 0x3c9   : > { %v3621_v58 = vpack.c.bf16 %v3571_v50, %v3566_v43  ;;  %3277 = vst.msk [vmem:[#allocation3 + $0x1d0] sm:$0xff] %vm53_vm0, %v3263_v44  ;;  %3389 = vst.msk [vmem:[#allocation3 + $0x1d8] sm:$0xff] %vm53_vm0, %v2929_v38  ;;  %v3041_v14 = vld [vmem:[#allocation2 + $0x6a] sm:$0xff]  ;;  %v3436_v8 = vld [vmem:[#allocation3 + $0x160] sm:$0xff] }
 0x3ca   : > { %2994 = vrot.lane.b32.xlu1 %v8174_v13, %s6449_s23  ;;  %3390 = vst.msk [vmem:[#allocation3 + $0x200] sm:$0xff] %vm53_vm0, %v3376_v3  ;;  %v8191_v61 = vld [vmem:[#allocation2 + $0x67] sm:$0xff]  ;;  %3055 = vst.msk [vmem:[#allocation3 + $0x210] sm:$0xff] %vm53_vm0, %v3041_v14  ;;  %v3521_v26 = vld [vmem:[%s9040_s1 + $0x1d8] sm:$0xff]  ;;  %5740 = vmatpush3.bf16.msra.mxu0 %v6273_v1  ;;  %v3576_v24 = vmul.f32 %v3506_v54, %v3436_v8 }
 0x3cb   : > { %3656 = vst.msk [vmem:[#allocation4 + $0x98] sm:$0xff] %vm53_vm0, %v3621_v58  ;;  %v3264_v41 = vld [vmem:[#allocation2 + $0x6e] sm:$0xff]  ;;  %v3265_v12 = vld [vmem:[#allocation2 + $0x76] sm:$0xff]  ;;  %v2956_v36 = vld [vmem:[#allocation2 + $0x61] sm:$0xff]  ;;  %5741 = vmatprep.subr.bf16.mxu0 %v6274_v52 }
 0x3cc   : > { %3108 = vrot.lane.b32.xlu0 %v8191_v61, %s6449_s23  ;;  %v3461_v10 = vld [vmem:[#allocation3 + $0x228] sm:$0xff]  ;;  %3278 = vst.msk [vmem:[#allocation3 + $0x1f8] sm:$0xff] %vm53_vm0, %v3264_v41  ;;  %v6275_v46 = vld [vmem:[%s7325_s20 + $0x2f0] sm:$0xff]   ;;  %3279 = vst.msk [vmem:[#allocation3 + $0x220] sm:$0xff] %vm53_vm0, %v3265_v12 }
 0x3cd   : > { %v3531_v17 = vld [vmem:[%s9040_s1 + $0x228] sm:$0xff]  ;;  %v3153_v32 = vld [vmem:[#allocation2 + $0x70] sm:$0xff]  ;;  %v3526_v51 = vld [vmem:[%s9040_s1 + $0x200] sm:$0xff] }
 0x3ce   : > { %v3069_v21 = vld [vmem:[#allocation2 + $0x6f] sm:$0xff]  ;;  %3167 = vst.msk [vmem:[#allocation3 + $0x218] sm:$0xff] %vm53_vm0, %v3153_v32  ;;  %v6277_v44 = vld [vmem:[%s7325_s20 + $0x338] sm:$0xff]   ;;  %v3601_v5 = vmul.f32 %v3531_v17, %v3461_v10  ;;  %5742 = vmatpush3.bf16.msra.mxu0 %v6275_v46  ;;  %v6261_v12 = vld [vmem:[%s7325_s20 + $0x340] sm:$0xff]  }
 0x3cf   : > { %3110 = vrot.lane.b32.xlu1 %v3069_v21, %s6449_s23  ;;  %v3441_v62 = vld [vmem:[#allocation3 + $0x188] sm:$0xff]  ;;  %v3446_v43 = vld [vmem:[#allocation3 + $0x1b0] sm:$0xff]  ;;  %v6278_v1 = vld [vmem:[%s7325_s20 + $0x2f8] sm:$0xff]   ;;  %5743 = vmatprep.subr.bf16.mxu0 %v6277_v44 }
 0x3d0   : > { %v3581_v53 = vmul.f32 %v3511_v63, %v3441_v62  ;;  %2996 = vrot.lane.b32.xlu0 %v2956_v36, %s6449_s23  ;;  %v3451_v50 = vld [vmem:[#allocation3 + $0x1d8] sm:$0xff]  ;;  %v2957_v38 = vld [vmem:[#allocation2 + $0x69] sm:$0xff]  ;;  %v3586_v3 = vmul.f32 %v3516_v25, %v3446_v43 }
 0x3d1   : > { %v3591_v14 = vmul.f32 %v3521_v26, %v3451_v50  ;;  %v3456_v54 = vld [vmem:[#allocation3 + $0x200] sm:$0xff]  ;;  %v3465_v10 = vld [vmem:[%s9040_s1 + $0x18] sm:$0xff] }
 0x3d2   : > { %v3626_v58 = vpack.c.bf16 %v3581_v53, %v3576_v24  ;;  %v3596_v41 = vmul.f32 %v3526_v51, %v3456_v54  ;;  %5744 = vmatpush3.bf16.msra.mxu0 %v6278_v1  ;;  %v3473_v53 = vld [vmem:[%s9040_s1 + $0x58] sm:$0xff]  ;;  %v3478_v50 = vld [vmem:[%s9040_s1 + $0x80] sm:$0xff]  ;;  %v3472_v1 = vld [vmem:[%s9040_s1 + $0x50] sm:$0xff] }
 0x3d3   : > { %2998 = vrot.lane.b32.xlu1 %v2957_v38, %s6449_s23  ;;  %v3631_v63 = vpack.c.bf16 %v3591_v14, %v3586_v3  ;;  %5942 = vmatprep.subr.bf16.mxu0 (%p8620_p0), %v6446_v0 }
 0x3d4   : > { %3661 = vst.msk [vmem:[#allocation4 + $0xc0] sm:$0xff] %vm53_vm0, %v3626_v58  ;;  %3196 = vrot.lane.b32.xlu0 %v7981_v22, %s6449_s23  ;;  %v3636_v8 = vpack.c.bf16 %v3601_v5, %v3596_v41  ;;  %v3293_v22 = vld [vmem:[#allocation2 + $0x77] sm:$0xff] }
 0x3d5   : > { %3666 = vst.msk [vmem:[#allocation4 + $0xe8] sm:$0xff] %vm53_vm0, %v3631_v63  ;;  %v3477_v63 = vld [vmem:[%s9040_s1 + $0x78] sm:$0xff] }
 0x3d6   : > { %3671 = vst.msk [vmem:[#allocation4 + $0x110] sm:$0xff] %vm53_vm0, %v3636_v8  ;;  %v6271_v8 = vld [vmem:[%s7325_s20 + $0x350] sm:$0xff]  }
 0x3d7   : > { %3198 = vrot.lane.b32.xlu1 %v8009_v56, %s6449_s23 }
 0x3d8   : > { %3312 = vrot.lane.b32.xlu0 %v8005_v37, %s6449_s23  ;;  %v3181_v37 = vld [vmem:[#allocation2 + $0x71] sm:$0xff] }
 0x3db   : > { %3314 = vrot.lane.b32.xlu1 %v8035_v27, %s6449_s23 }
 0x3dc   : > { %3200 = vrot.lane.b32.xlu0 %v8022_v7, %s6449_s23 }
 0x3df   : > { %3202 = vrot.lane.b32.xlu1 %v8048_v2, %s6449_s23  ;;  %v3463_v2 = vld [vmem:[%s9040_s1 + $0x8] sm:$0xff] }
 0x3e0   : > { %3316 = vrot.lane.b32.xlu0 %v8043_v30, %s6449_s23 }
 0x3e3   : > { %3318 = vrot.lane.b32.xlu1 %v8075_v45, %s6449_s23  ;;  %v3468_v45 = vld [vmem:[%s9040_s1 + $0x30] sm:$0xff] }
 0x3e4   : > { %3204 = vrot.lane.b32.xlu0 %v8062_v33, %s6449_s23 }
 0x3e7   : > { %3206 = vrot.lane.b32.xlu1 %v8090_v20, %s6449_s23 }
 0x3e8   : > { %3320 = vrot.lane.b32.xlu0 %v8084_v60, %s6449_s23 }
 0x3eb   : > { %3322 = vrot.lane.b32.xlu1 %v8117_v6, %s6449_s23 }
 0x3ec   : > { %3208 = vrot.lane.b32.xlu0 %v8104_v19, %s6449_s23 }
 0x3ef   : > { %3210 = vrot.lane.b32.xlu1 %v8131_v59, %s6449_s23  ;;  %v3462_v59 = vld [vmem:[%s9040_s1] sm:$0xff] }
 0x3f0   : > { %3324 = vrot.lane.b32.xlu0 %v8126_v57, %s6449_s23 }
 0x3f3   : > { %3326 = vrot.lane.b32.xlu1 %v8154_v29, %s6449_s23  ;;  %v3467_v29 = vld [vmem:[%s9040_s1 + $0x28] sm:$0xff] }
 0x3f4   : > { %3212 = vrot.lane.b32.xlu0 %v8138_v40, %s6449_s23 }
 0x3f7   : > { %3214 = vrot.lane.b32.xlu1 %v8170_v9, %s6449_s23 }
 0x3f8   : > { %3328 = vrot.lane.b32.xlu0 %v8164_v35, %s6449_s23 }
 0x3fb   : > { %3330 = vrot.lane.b32.xlu1 %v8191_v61, %s6449_s23 }
 0x3fc   : > { %3216 = vrot.lane.b32.xlu0 %v8174_v13, %s6449_s23 }
 0x3ff   : > { %3218 = vrot.lane.b32.xlu1 %v2956_v36, %s6449_s23 }
 0x400   : > { %3332 = vrot.lane.b32.xlu0 %v3069_v21, %s6449_s23  ;;  %v3470_v21 = vld [vmem:[%s9040_s1 + $0x40] sm:$0xff] }
 0x403   : > { %3334 = vrot.lane.b32.xlu1 %v3293_v22, %s6449_s23 }
 0x404   : > { %3220 = vrot.lane.b32.xlu0 %v2957_v38, %s6449_s23  ;;  %v6266_v38 = vld [vmem:[%s7325_s20 + $0x348] sm:$0xff]  }
 0x407   : > { %3222 = vrot.lane.b32.xlu1 %v3181_v37, %s6449_s23 }
 0x409   : > { %v3085_v56 = vpop.permute.xlu0 %3084 }
 0x40a   : > { %3126 = vst.msk [vmem:[#allocation3 + $0x8] sm:$0xff] %vm182_vm1, %v3085_v56 }
 0x40c   : > { %v3087_v7 = vpop.permute.xlu1 %3086 }
 0x40d   : > { %3127 = vst.msk [vmem:[#allocation3 + $0x30] sm:$0xff] %vm182_vm1, %v3087_v7  ;;  %v2973_v27 = vpop.permute.xlu0 %2972 }
 0x40e   : > { %3014 = vst.msk [vmem:[#allocation3] sm:$0xff] %vm182_vm1, %v2973_v27 }
 0x410   : > { %v2975_v30 = vpop.permute.xlu1 %2974 }
 0x411   : > { %3015 = vst.msk [vmem:[#allocation3 + $0x28] sm:$0xff] %vm182_vm1, %v2975_v30  ;;  %v3393_v33 = vld [vmem:[#allocation3 + $0x8] sm:$0xff]  ;;  %v3309_v60 = vpop.permute.xlu0 %3308 }
 0x412   : > { %3350 = vst.msk [vmem:[#allocation3 + $0x18] sm:$0xff] %vm182_vm1, %v3309_v60  ;;  %v3533_v6 = vmul.f32 %v3463_v2, %v3393_v33  ;;  %v3483_v30 = vld [vmem:[%s9040_s1 + $0xa8] sm:$0xff]  ;;  %v3488_v33 = vld [vmem:[%s9040_s1 + $0xd0] sm:$0xff]  ;;  %v6276_v60 = vld [vmem:[%s7325_s20 + $0x358] sm:$0xff]  }
 0x414   : > { %v3398_v20 = vld [vmem:[#allocation3 + $0x30] sm:$0xff]  ;;  %v3311_v19 = vpop.permute.xlu1 %3310 }
 0x415   : > { %v3538_v57 = vmul.f32 %v3468_v45, %v3398_v20  ;;  %3351 = vst.msk [vmem:[#allocation3 + $0x40] sm:$0xff] %vm182_vm1, %v3311_v19  ;;  %v3392_v40 = vld [vmem:[#allocation3] sm:$0xff]  ;;  %v3089_v35 = vpop.permute.xlu0 %3088 }
 0x416   : > { %3128 = vst.msk [vmem:[#allocation3 + $0x58] sm:$0xff] %vm182_vm1, %v3089_v35  ;;  %v3532_v25 = vmul.f32 %v3462_v59, %v3392_v40  ;;  %v3482_v40 = vld [vmem:[%s9040_s1 + $0xa0] sm:$0xff]  ;;  %v3487_v35 = vld [vmem:[%s9040_s1 + $0xc8] sm:$0xff] }
 0x417   : > { %v3603_v9 = vpack.c.bf16 %v3538_v57, %v3533_v6 }
 0x418   : > { %v3397_v13 = vld [vmem:[#allocation3 + $0x28] sm:$0xff]  ;;  %v3091_v61 = vpop.permute.xlu1 %3090 }
 0x419   : > { %v3537_v26 = vmul.f32 %v3467_v29, %v3397_v13  ;;  %3129 = vst.msk [vmem:[#allocation3 + $0x80] sm:$0xff] %vm182_vm1, %v3091_v61  ;;  %4059 = vmatprep.mubr.bf16.mxu1 %v3603_v9  ;;  %v3395_v17 = vld [vmem:[#allocation3 + $0x18] sm:$0xff]  ;;  %v2977_v52 = vpop.permute.xlu0 %2976 }
 0x41a   : > { %3016 = vst.msk [vmem:[#allocation3 + $0x50] sm:$0xff] %vm182_vm1, %v2977_v52  ;;  %v3535_v36 = vmul.f32 %v3465_v10, %v3395_v17  ;;  %v3493_v17 = vld [vmem:[%s9040_s1 + $0xf8] sm:$0xff]  ;;  %v3498_v52 = vld [vmem:[%s9040_s1 + $0x120] sm:$0xff] }
 0x41b   : > { %v3602_v46 = vpack.c.bf16 %v3537_v26, %v3532_v25 }
 0x41c   : > { %v3400_v32 = vld [vmem:[#allocation3 + $0x40] sm:$0xff]  ;;  %v2979_v62 = vpop.permute.xlu1 %2978 }
 0x41d   : > { %v3540_v24 = vmul.f32 %v3470_v21, %v3400_v32  ;;  %3017 = vst.msk [vmem:[#allocation3 + $0x78] sm:$0xff] %vm182_vm1, %v2979_v62  ;;  %4060 = vmatmul.mubr.bf16.vlgmr.msra.gmra.mrb[28].mxu1 %v3602_v46  ;;  %v3403_v43 = vld [vmem:[#allocation3 + $0x58] sm:$0xff]  ;;  %v3093_v51 = vpop.permute.xlu0 %3092 }
 0x41e   : > { %5907 = vmatpush3.bf16.msra.mxu1 %v6261_v12  ;;  %3130 = vst.msk [vmem:[#allocation3 + $0xa8] sm:$0xff] %vm182_vm1, %v3093_v51  ;;  %v3543_v14 = vmul.f32 %v3473_v53, %v3403_v43  ;;  %v3492_v53 = vld [vmem:[%s9040_s1 + $0xf0] sm:$0xff] }
 0x41f   : > { %v3605_v44 = vpack.c.bf16 %v3540_v24, %v3535_v36  ;;  %5908 = vmatprep.subr.bf16.mxu1 %v6450_v16 }
 0x420   : > { %v3408_v58 = vld [vmem:[#allocation3 + $0x80] sm:$0xff]  ;;  %v3095_v3 = vpop.permute.xlu1 %3094 }
 0x421   : > { %v3548_v5 = vmul.f32 %v3478_v50, %v3408_v58  ;;  %3131 = vst.msk [vmem:[#allocation3 + $0xd0] sm:$0xff] %vm182_vm1, %v3095_v3  ;;  %4148 = vmatprep.mubr.bf16.mxu0 %v3605_v44  ;;  %v3402_v54 = vld [vmem:[#allocation3 + $0x50] sm:$0xff]  ;;  %v2981_v41 = vpop.permute.xlu0 %2980  ;;  %v3497_v50 = vld [vmem:[%s9040_s1 + $0x118] sm:$0xff] }
 0x422   : > { %5909 = vmatpush3.bf16.msra.mxu1 %v6266_v38  ;;  %3018 = vst.msk [vmem:[#allocation3 + $0xa0] sm:$0xff] %vm182_vm1, %v2981_v41  ;;  %v3542_v7 = vmul.f32 %v3472_v1, %v3402_v54  ;;  %v3508_v54 = vld [vmem:[%s9040_s1 + $0x170] sm:$0xff] }
 0x423   : > { %v3608_v22 = vpack.c.bf16 %v3548_v5, %v3543_v14  ;;  %5910 = vmatprep.subr.bf16.mxu1 %v6450_v16  ;;  %v3503_v5 = vld [vmem:[%s9040_s1 + $0x148] sm:$0xff] }
 0x424   : > { %v3407_v37 = vld [vmem:[#allocation3 + $0x78] sm:$0xff]  ;;  %v2983_v56 = vpop.permute.xlu1 %2982 }
 0x425   : > { %v3547_v27 = vmul.f32 %v3477_v63, %v3407_v37  ;;  %3019 = vst.msk [vmem:[#allocation3 + $0xc8] sm:$0xff] %vm182_vm1, %v2983_v56  ;;  %4067 = vmatprep.mubr.bf16.mxu1 %v3608_v22  ;;  %v3413_v2 = vld [vmem:[#allocation3 + $0xa8] sm:$0xff]  ;;  %v3097_v45 = vpop.permute.xlu0 %3096 }
 0x426   : > { %5911 = vmatpush3.bf16.msra.mxu1 %v6271_v8  ;;  %3132 = vst.msk [vmem:[#allocation3 + $0xf8] sm:$0xff] %vm182_vm1, %v3097_v45  ;;  %v3553_v57 = vmul.f32 %v3483_v30, %v3413_v2  ;;  %v3507_v30 = vld [vmem:[%s9040_s1 + $0x168] sm:$0xff] }
 0x427   : > { %v3607_v20 = vpack.c.bf16 %v3547_v27, %v3542_v7  ;;  %5912 = vmatprep.subr.bf16.mxu1 %v6450_v16  ;;  %v3502_v7 = vld [vmem:[%s9040_s1 + $0x140] sm:$0xff] }
 0x428   : > { %v3418_v19 = vld [vmem:[#allocation3 + $0xd0] sm:$0xff]  ;;  %v3099_v6 = vpop.permute.xlu1 %3098 }
 0x429   : > { %v3558_v59 = vmul.f32 %v3488_v33, %v3418_v19  ;;  %3133 = vst.msk [vmem:[#allocation3 + $0x120] sm:$0xff] %vm182_vm1, %v3099_v6  ;;  %4068 = vmatmul.mubr.bf16.gmra.mrb[32].mxu1 %v3607_v20  ;;  %v3412_v29 = vld [vmem:[#allocation3 + $0xa0] sm:$0xff]  ;;  %v2985_v9 = vpop.permute.xlu0 %2984  ;;  %v3513_v6 = vld [vmem:[%s9040_s1 + $0x198] sm:$0xff] }
 0x42a   : > { %5913 = vmatpush3.bf16.msra.mxu1 %v6276_v60  ;;  %3020 = vst.msk [vmem:[#allocation3 + $0xf0] sm:$0xff] %vm182_vm1, %v2985_v9  ;;  %v3552_v26 = vmul.f32 %v3482_v40, %v3412_v29 }
 0x42b   : > { %v3613_v13 = vpack.c.bf16 %v3558_v59, %v3553_v57  ;;  %v3518_v59 = vld [vmem:[%s9040_s1 + $0x1c0] sm:$0xff]  ;;  %5978 = vmatprep.subr.bf16.mxu1 (%p8620_p0), %v6446_v0 }
 0x42c   : > { %v3417_v61 = vld [vmem:[#allocation3 + $0xc8] sm:$0xff]  ;;  %v2987_v25 = vpop.permute.xlu1 %2986 }
 0x42d   : > { %v3557_v10 = vmul.f32 %v3487_v35, %v3417_v61  ;;  %3021 = vst.msk [vmem:[#allocation3 + $0x118] sm:$0xff] %vm182_vm1, %v2987_v25  ;;  %4075 = vmatprep.mubr.bf16.mxu1 %v3613_v13  ;;  %v3423_v21 = vld [vmem:[#allocation3 + $0xf8] sm:$0xff]  ;;  %v3512_v25 = vld [vmem:[%s9040_s1 + $0x190] sm:$0xff] }
 0x42e   : > { %v3101_v12 = vpop.permute.xlu0 %3100  ;;  %v3563_v36 = vmul.f32 %v3493_v17, %v3423_v21 }
 0x42f   : > { %v3612_v46 = vpack.c.bf16 %v3557_v10, %v3552_v26  ;;  %3134 = vst.msk [vmem:[#allocation3 + $0x148] sm:$0xff] %vm182_vm1, %v3101_v12  ;;  %v3517_v10 = vld [vmem:[%s9040_s1 + $0x1b8] sm:$0xff] }
 0x430   : > { %v3428_v32 = vld [vmem:[#allocation3 + $0x120] sm:$0xff]  ;;  %v3103_v62 = vpop.permute.xlu1 %3102 }
 0x431   : > { %v3568_v24 = vmul.f32 %v3498_v52, %v3428_v32  ;;  %3135 = vst.msk [vmem:[#allocation3 + $0x170] sm:$0xff] %vm182_vm1, %v3103_v62  ;;  %4076 = vmatmul.mubr.bf16.gmra.mrb[36].mxu1 %v3612_v46  ;;  %v3422_v43 = vld [vmem:[#allocation3 + $0xf0] sm:$0xff]  ;;  %v3523_v62 = vld [vmem:[%s9040_s1 + $0x1e8] sm:$0xff] }
 0x432   : > { %v2989_v51 = vpop.permute.xlu0 %2988  ;;  %v3562_v3 = vmul.f32 %v3492_v53, %v3422_v43 }
 0x433   : > { %v3618_v38 = vpack.c.bf16 %v3568_v24, %v3563_v36  ;;  %3022 = vst.msk [vmem:[#allocation3 + $0x140] sm:$0xff] %vm182_vm1, %v2989_v51  ;;  %v3528_v24 = vld [vmem:[%s9040_s1 + $0x210] sm:$0xff] }
 0x434   : > { %v3427_v44 = vld [vmem:[#allocation3 + $0x118] sm:$0xff]  ;;  %v2991_v58 = vpop.permute.xlu1 %2990 }
 0x435   : > { %v3567_v14 = vmul.f32 %v3497_v50, %v3427_v44  ;;  %3023 = vst.msk [vmem:[#allocation3 + $0x168] sm:$0xff] %vm182_vm1, %v2991_v58  ;;  %4083 = vmatprep.mubr.bf16.mxu1 %v3618_v38  ;;  %v3522_v58 = vld [vmem:[%s9040_s1 + $0x1e0] sm:$0xff] }
 0x436   : > { %v3433_v1 = vld [vmem:[#allocation3 + $0x148] sm:$0xff]  ;;  %v3105_v63 = vpop.permute.xlu0 %3104 }
 0x437   : > { %v3617_v41 = vpack.c.bf16 %v3567_v14, %v3562_v3  ;;  %3136 = vst.msk [vmem:[#allocation3 + $0x198] sm:$0xff] %vm182_vm1, %v3105_v63  ;;  %v3573_v37 = vmul.f32 %v3503_v5, %v3433_v1  ;;  %v3527_v14 = vld [vmem:[%s9040_s1 + $0x208] sm:$0xff] }
 0x438   : > { %v3438_v8 = vld [vmem:[#allocation3 + $0x170] sm:$0xff]  ;;  %v3107_v22 = vpop.permute.xlu1 %3106 }
 0x439   : > { %v3578_v56 = vmul.f32 %v3508_v54, %v3438_v8  ;;  %3137 = vst.msk [vmem:[#allocation3 + $0x1c0] sm:$0xff] %vm182_vm1, %v3107_v22  ;;  %4084 = vmatmul.mubr.bf16.gmra.mrb[40].mxu1 %v3617_v41  ;;  %v3464_v22 = vld [vmem:[%s9040_s1 + $0x10] sm:$0xff] }
 0x43a   : > { %v3432_v27 = vld [vmem:[#allocation3 + $0x140] sm:$0xff]  ;;  %v2993_v2 = vpop.permute.xlu0 %2992 }
 0x43b   : > { %v3623_v33 = vpack.c.bf16 %v3578_v56, %v3573_v37  ;;  %3024 = vst.msk [vmem:[#allocation3 + $0x190] sm:$0xff] %vm182_vm1, %v2993_v2  ;;  %v3572_v20 = vmul.f32 %v3502_v7, %v3432_v27  ;;  %v3469_v56 = vld [vmem:[%s9040_s1 + $0x38] sm:$0xff] }
 0x43c   : > { %v3437_v45 = vld [vmem:[#allocation3 + $0x168] sm:$0xff]  ;;  %v2995_v60 = vpop.permute.xlu1 %2994 }
 0x43d   : > { %v3577_v19 = vmul.f32 %v3507_v30, %v3437_v45  ;;  %3025 = vst.msk [vmem:[#allocation3 + $0x1b8] sm:$0xff] %vm182_vm1, %v2995_v60  ;;  %4091 = vmatprep.mubr.bf16.mxu1 %v3623_v33  ;;  %v3475_v60 = vld [vmem:[%s9040_s1 + $0x68] sm:$0xff] }
 0x43e   : > { %v3443_v57 = vld [vmem:[#allocation3 + $0x198] sm:$0xff]  ;;  %v3109_v40 = vpop.permute.xlu0 %3108 }
 0x43f   : > { %v3622_v29 = vpack.c.bf16 %v3577_v19, %v3572_v20  ;;  %3138 = vst.msk [vmem:[#allocation3 + $0x1e8] sm:$0xff] %vm182_vm1, %v3109_v40  ;;  %v3583_v13 = vmul.f32 %v3513_v6, %v3443_v57  ;;  %v3480_v19 = vld [vmem:[%s9040_s1 + $0x90] sm:$0xff] }
 0x440   : > { %v3448_v35 = vld [vmem:[#allocation3 + $0x1c0] sm:$0xff] }
 0x441   : > { %v3111_v9 = vpop.permute.xlu1 %3110  ;;  %v3588_v61 = vmul.f32 %v3518_v59, %v3448_v35  ;;  %4092 = vmatmul.mubr.bf16.gmra.mrb[44].mxu1 %v3622_v29 }
 0x442   : > { %3139 = vst.msk [vmem:[#allocation3 + $0x210] sm:$0xff] %vm182_vm1, %v3111_v9  ;;  %v3442_v26 = vld [vmem:[#allocation3 + $0x190] sm:$0xff]  ;;  %v2997_v17 = vpop.permute.xlu0 %2996  ;;  %v3474_v9 = vld [vmem:[%s9040_s1 + $0x60] sm:$0xff] }
 0x443   : > { %v3628_v21 = vpack.c.bf16 %v3588_v61, %v3583_v13  ;;  %3026 = vst.msk [vmem:[#allocation3 + $0x1e0] sm:$0xff] %vm182_vm1, %v2997_v17  ;;  %v3582_v46 = vmul.f32 %v3512_v25, %v3442_v26  ;;  %v3479_v61 = vld [vmem:[%s9040_s1 + $0x88] sm:$0xff] }
 0x444   : > { %v3447_v52 = vld [vmem:[#allocation3 + $0x1b8] sm:$0xff] }
 0x445   : > { %v2999_v12 = vpop.permute.xlu1 %2998  ;;  %v3587_v32 = vmul.f32 %v3517_v10, %v3447_v52  ;;  %4099 = vmatprep.mubr.bf16.mxu1 %v3628_v21  ;;  %v3676_v21 = vld [vmem:[#allocation4 + $0x20] sm:$0xff] }
 0x446   : > { %3027 = vst.msk [vmem:[#allocation3 + $0x208] sm:$0xff] %vm182_vm1, %v2999_v12  ;;  %v3453_v36 = vld [vmem:[#allocation3 + $0x1e8] sm:$0xff]  ;;  %v3197_v53 = vpop.permute.xlu0 %3196 }
 0x447   : > { %v3627_v43 = vpack.c.bf16 %v3587_v32, %v3582_v46  ;;  %3238 = vst.msk [vmem:[#allocation3 + $0x10] sm:$0xff] %vm182_vm1, %v3197_v53  ;;  %v3593_v38 = vmul.f32 %v3523_v62, %v3453_v36  ;;  %v3485_v46 = vld [vmem:[%s9040_s1 + $0xb8] sm:$0xff]  ;;  %v3490_v62 = vld [vmem:[%s9040_s1 + $0xe0] sm:$0xff] }
 0x449   : > { %v3458_v50 = vld [vmem:[#allocation3 + $0x210] sm:$0xff]  ;;  %v3199_v51 = vpop.permute.xlu1 %3198  ;;  %4100 = vmatmul.mubr.bf16.gmra.mrb[48].mxu1 %v3627_v43 }
 0x44a   : > { %v3598_v44 = vmul.f32 %v3528_v24, %v3458_v50  ;;  %3239 = vst.msk [vmem:[#allocation3 + $0x38] sm:$0xff] %vm182_vm1, %v3199_v51  ;;  %v3452_v3 = vld [vmem:[#allocation3 + $0x1e0] sm:$0xff]  ;;  %v3313_v5 = vpop.permute.xlu0 %3312 }
 0x44b   : > { %3352 = vst.msk [vmem:[#allocation3 + $0x68] sm:$0xff] %vm182_vm1, %v3313_v5  ;;  %v3592_v41 = vmul.f32 %v3522_v58, %v3452_v3  ;;  %v3489_v58 = vld [vmem:[%s9040_s1 + $0xd8] sm:$0xff] }
 0x44c   : > { %v3633_v1 = vpack.c.bf16 %v3598_v44, %v3593_v38  ;;  %v3484_v38 = vld [vmem:[%s9040_s1 + $0xb0] sm:$0xff] }
 0x44d   : > { %v3457_v54 = vld [vmem:[#allocation3 + $0x208] sm:$0xff]  ;;  %v3315_v63 = vpop.permute.xlu1 %3314 }
 0x44e   : > { %v3597_v8 = vmul.f32 %v3527_v14, %v3457_v54  ;;  %3353 = vst.msk [vmem:[#allocation3 + $0x90] sm:$0xff] %vm182_vm1, %v3315_v63  ;;  %4107 = vmatprep.mubr.bf16.mxu1 %v3633_v1  ;;  %v3394_v37 = vld [vmem:[#allocation3 + $0x10] sm:$0xff]  ;;  %v3201_v7 = vpop.permute.xlu0 %3200  ;;  %v3681_v54 = vld [vmem:[#allocation4 + $0x48] sm:$0xff] }
 0x44f   : > { %3240 = vst.msk [vmem:[#allocation3 + $0x60] sm:$0xff] %vm182_vm1, %v3201_v7  ;;  %v3534_v33 = vmul.f32 %v3464_v22, %v3394_v37  ;;  %v3500_v37 = vld [vmem:[%s9040_s1 + $0x130] sm:$0xff] }
 0x450   : > { %v3632_v27 = vpack.c.bf16 %v3597_v8, %v3592_v41  ;;  %v3495_v8 = vld [vmem:[%s9040_s1 + $0x108] sm:$0xff] }
 0x451   : > { %v3399_v30 = vld [vmem:[#allocation3 + $0x38] sm:$0xff]  ;;  %v3203_v2 = vpop.permute.xlu1 %3202 }
 0x452   : > { %v3539_v45 = vmul.f32 %v3469_v56, %v3399_v30  ;;  %3241 = vst.msk [vmem:[#allocation3 + $0x88] sm:$0xff] %vm182_vm1, %v3203_v2  ;;  %4108 = vmatmul.mubr.bf16.gmra.mrb[52].mxu1 %v3632_v27  ;;  %v3405_v20 = vld [vmem:[#allocation3 + $0x68] sm:$0xff]  ;;  %v3317_v6 = vpop.permute.xlu0 %3316 }
 0x453   : > { %5914 = vmatprep.mubr.msk.bf16.mxu1 %vm6451_vm3, %v6450_v16  ;;  %3354 = vst.msk [vmem:[#allocation3 + $0xb8] sm:$0xff] %vm182_vm1, %v3317_v6  ;;  %v3545_v29 = vmul.f32 %v3475_v60, %v3405_v20  ;;  %v3499_v20 = vld [vmem:[%s9040_s1 + $0x128] sm:$0xff] }
 0x454   : > { %v3604_v57 = vpack.c.bf16 %v3539_v45, %v3534_v33  ;;  %v3494_v45 = vld [vmem:[%s9040_s1 + $0x100] sm:$0xff] }
 0x455   : > { %v3410_v59 = vld [vmem:[#allocation3 + $0x90] sm:$0xff]  ;;  %v3319_v40 = vpop.permute.xlu1 %3318 }
 0x456   : > { %v3550_v35 = vmul.f32 %v3480_v19, %v3410_v59  ;;  %3355 = vst.msk [vmem:[#allocation3 + $0xe0] sm:$0xff] %vm182_vm1, %v3319_v40  ;;  %4149 = vmatmul.mubr.bf16.vlgmr.msra.gmra.mrb[56].mxu0 %v3604_v57  ;;  %v3404_v13 = vld [vmem:[#allocation3 + $0x60] sm:$0xff]  ;;  %v3205_v25 = vpop.permute.xlu0 %3204 }
 0x457   : > { %3242 = vst.msk [vmem:[#allocation3 + $0xb0] sm:$0xff] %vm182_vm1, %v3205_v25  ;;  %v3544_v52 = vmul.f32 %v3474_v9, %v3404_v13  ;;  %v3686_v40 = vld [vmem:[#allocation4 + $0x70] sm:$0xff]  ;;  %v3505_v9 = vld [vmem:[%s9040_s1 + $0x158] sm:$0xff] }
 0x458   : > { %v3610_v26 = vpack.c.bf16 %v3550_v35, %v3545_v29 }
 0x459   : > { %v3409_v10 = vld [vmem:[#allocation3 + $0x88] sm:$0xff]  ;;  %v3207_v17 = vpop.permute.xlu1 %3206 }
 0x45a   : > { %v3549_v12 = vmul.f32 %v3479_v61, %v3409_v10  ;;  %3243 = vst.msk [vmem:[#allocation3 + $0xd8] sm:$0xff] %vm182_vm1, %v3207_v17  ;;  %4156 = vmatprep.mubr.bf16.mxu0 %v3610_v26  ;;  %5915 = vmatmul.mubr.msk.bf16.vlgmr.msra.gmra.mrb[56].mxu1 %vm53_vm0, %v3676_v21  ;;  %v3415_v32 = vld [vmem:[#allocation3 + $0xb8] sm:$0xff]  ;;  %v3321_v36 = vpop.permute.xlu0 %3320  ;;  %v3510_v61 = vld [vmem:[%s9040_s1 + $0x180] sm:$0xff] }
 0x45b   : > { %5918 = vmatprep.mubr.msk.bf16.mxu1 %vm6451_vm3, %v6450_v16  ;;  %3356 = vst.msk [vmem:[#allocation3 + $0x108] sm:$0xff] %vm182_vm1, %v3321_v36  ;;  %v3555_v50 = vmul.f32 %v3485_v46, %v3415_v32  ;;  %v3509_v32 = vld [vmem:[%s9040_s1 + $0x178] sm:$0xff] }
 0x45c   : > { %v3609_v24 = vpack.c.bf16 %v3549_v12, %v3544_v52  ;;  %v3504_v12 = vld [vmem:[%s9040_s1 + $0x150] sm:$0xff] }
 0x45d   : > { %v3420_v53 = vld [vmem:[#allocation3 + $0xe0] sm:$0xff]  ;;  %v3323_v43 = vpop.permute.xlu1 %3322 }
 0x45e   : > { %v3560_v51 = vmul.f32 %v3490_v62, %v3420_v53  ;;  %3357 = vst.msk [vmem:[#allocation3 + $0x130] sm:$0xff] %vm182_vm1, %v3323_v43  ;;  %4157 = vmatmul.mubr.bf16.gmra.mrb[60].mxu0 %v3609_v24  ;;  %v3414_v44 = vld [vmem:[#allocation3 + $0xb0] sm:$0xff]  ;;  %v3209_v3 = vpop.permute.xlu0 %3208  ;;  %v3691_v43 = vld [vmem:[#allocation4 + $0x98] sm:$0xff] }
 0x45f   : > { %3244 = vst.msk [vmem:[#allocation3 + $0x100] sm:$0xff] %vm182_vm1, %v3209_v3  ;;  %v3554_v63 = vmul.f32 %v3484_v38, %v3414_v44  ;;  %v3515_v38 = vld [vmem:[%s9040_s1 + $0x1a8] sm:$0xff] }
 0x460   : > { %v3615_v14 = vpack.c.bf16 %v3560_v51, %v3555_v50 }
 0x461   : > { %v3419_v5 = vld [vmem:[#allocation3 + $0xd8] sm:$0xff]  ;;  %v3211_v1 = vpop.permute.xlu1 %3210 }
 0x462   : > { %v3559_v41 = vmul.f32 %v3489_v58, %v3419_v5  ;;  %3245 = vst.msk [vmem:[#allocation3 + $0x128] sm:$0xff] %vm182_vm1, %v3211_v1  ;;  %4164 = vmatprep.mubr.bf16.mxu0 %v3615_v14  ;;  %5919 = vmatmul.mubr.msk.bf16.gmra.mrb[60].mxu1 %vm53_vm0, %v3681_v54  ;;  %v3425_v22 = vld [vmem:[#allocation3 + $0x108] sm:$0xff]  ;;  %v3325_v56 = vpop.permute.xlu0 %3324  ;;  %v3520_v58 = vld [vmem:[%s9040_s1 + $0x1d0] sm:$0xff] }
 0x463   : > { %5922 = vmatprep.mubr.msk.bf16.mxu1 %vm6451_vm3, %v6450_v16  ;;  %3358 = vst.msk [vmem:[#allocation3 + $0x158] sm:$0xff] %vm182_vm1, %v3325_v56  ;;  %v3565_v2 = vmul.f32 %v3495_v8, %v3425_v22  ;;  %v3519_v22 = vld [vmem:[%s9040_s1 + $0x1c8] sm:$0xff] }
 0x464   : > { %v3614_v7 = vpack.c.bf16 %v3559_v41, %v3554_v63  ;;  %v3514_v41 = vld [vmem:[%s9040_s1 + $0x1a0] sm:$0xff] }
 0x465   : > { %v3430_v27 = vld [vmem:[#allocation3 + $0x130] sm:$0xff]  ;;  %v3327_v30 = vpop.permute.xlu1 %3326 }
 0x466   : > { %v3570_v33 = vmul.f32 %v3500_v37, %v3430_v27  ;;  %3359 = vst.msk [vmem:[#allocation3 + $0x180] sm:$0xff] %vm182_vm1, %v3327_v30  ;;  %4165 = vmatmul.mubr.bf16.gmra.mrb[64].mxu0 %v3614_v7  ;;  %v3424_v60 = vld [vmem:[#allocation3 + $0x100] sm:$0xff]  ;;  %v3213_v19 = vpop.permute.xlu0 %3212  ;;  %v3696_v30 = vld [vmem:[#allocation4 + $0xc0] sm:$0xff] }
 0x467   : > { %3246 = vst.msk [vmem:[#allocation3 + $0x150] sm:$0xff] %vm182_vm1, %v3213_v19  ;;  %v3564_v29 = vmul.f32 %v3494_v45, %v3424_v60  ;;  %v3525_v45 = vld [vmem:[%s9040_s1 + $0x1f8] sm:$0xff] }
 0x468   : > { %v3620_v6 = vpack.c.bf16 %v3570_v33, %v3565_v2 }
 0x469   : > { %v3429_v57 = vld [vmem:[#allocation3 + $0x128] sm:$0xff]  ;;  %v3215_v59 = vpop.permute.xlu1 %3214 }
 0x46a   : > { %v3569_v35 = vmul.f32 %v3499_v20, %v3429_v57  ;;  %3247 = vst.msk [vmem:[#allocation3 + $0x178] sm:$0xff] %vm182_vm1, %v3215_v59  ;;  %4172 = vmatprep.mubr.bf16.mxu0 %v3620_v6  ;;  %5923 = vmatmul.mubr.msk.bf16.gmra.mrb[64].mxu1 %vm53_vm0, %v3686_v40  ;;  %v3435_v13 = vld [vmem:[#allocation3 + $0x158] sm:$0xff]  ;;  %v3329_v25 = vpop.permute.xlu0 %3328  ;;  %v3530_v20 = vld [vmem:[%s9040_s1 + $0x220] sm:$0xff]  ;;  %v3524_v40 = vld [vmem:[%s9040_s1 + $0x1f0] sm:$0xff] }
 0x46b   : > { %5926 = vmatprep.mubr.msk.bf16.mxu1 %vm6451_vm3, %v6450_v16  ;;  %3360 = vst.msk [vmem:[#allocation3 + $0x1a8] sm:$0xff] %vm182_vm1, %v3329_v25  ;;  %v3575_v21 = vmul.f32 %v3505_v9, %v3435_v13 }
 0x46c   : > { %v3619_v26 = vpack.c.bf16 %v3569_v35, %v3564_v29  ;;  %v3529_v35 = vld [vmem:[%s9040_s1 + $0x218] sm:$0xff] }
 0x46d   : > { %v3440_v10 = vld [vmem:[#allocation3 + $0x180] sm:$0xff]  ;;  %v3331_v17 = vpop.permute.xlu1 %3330 }
 0x46e   : > { %v3580_v52 = vmul.f32 %v3510_v61, %v3440_v10  ;;  %3361 = vst.msk [vmem:[#allocation3 + $0x1d0] sm:$0xff] %vm182_vm1, %v3331_v17  ;;  %4173 = vmatmul.mubr.bf16.gmra.mrb[68].mxu0 %v3619_v26  ;;  %v3434_v46 = vld [vmem:[#allocation3 + $0x150] sm:$0xff]  ;;  %v3217_v62 = vpop.permute.xlu0 %3216  ;;  %v3701_v61 = vld [vmem:[#allocation4 + $0xe8] sm:$0xff]  ;;  %v3706_v17 = vld [vmem:[#allocation4 + $0x110] sm:$0xff] }
 0x46f   : > { %3248 = vst.msk [vmem:[#allocation3 + $0x1a0] sm:$0xff] %vm182_vm1, %v3217_v62  ;;  %v3574_v50 = vmul.f32 %v3504_v12, %v3434_v46 }
 0x470   : > { %v3625_v36 = vpack.c.bf16 %v3580_v52, %v3575_v21 }
 0x471   : > { %v3439_v24 = vld [vmem:[#allocation3 + $0x178] sm:$0xff]  ;;  %v3219_v53 = vpop.permute.xlu1 %3218 }
 0x472   : > { %v3579_v51 = vmul.f32 %v3509_v32, %v3439_v24  ;;  %3249 = vst.msk [vmem:[#allocation3 + $0x1c8] sm:$0xff] %vm182_vm1, %v3219_v53  ;;  %4180 = vmatprep.mubr.bf16.mxu0 %v3625_v36  ;;  %5927 = vmatmul.mubr.msk.bf16.gmra.mrb[68].mxu1 %vm53_vm0, %v3691_v43  ;;  %v3445_v44 = vld [vmem:[#allocation3 + $0x1a8] sm:$0xff]  ;;  %v3333_v3 = vpop.permute.xlu0 %3332 }
 0x473   : > { %5930 = vmatprep.mubr.msk.bf16.mxu1 %vm6451_vm3, %v6450_v16  ;;  %3362 = vst.msk [vmem:[#allocation3 + $0x1f8] sm:$0xff] %vm182_vm1, %v3333_v3  ;;  %v3585_v54 = vmul.f32 %v3515_v38, %v3445_v44 }
 0x474   : > { %v3624_v14 = vpack.c.bf16 %v3579_v51, %v3574_v50 }
 0x475   : > { %v3450_v5 = vld [vmem:[#allocation3 + $0x1d0] sm:$0xff]  ;;  %v3335_v1 = vpop.permute.xlu1 %3334 }
 0x476   : > { %v3590_v63 = vmul.f32 %v3520_v58, %v3450_v5  ;;  %3363 = vst.msk [vmem:[#allocation3 + $0x220] sm:$0xff] %vm182_vm1, %v3335_v1  ;;  %4181 = vmatmul.mubr.bf16.gmra.mrb[72].mxu0 %v3624_v14  ;;  %v3444_v8 = vld [vmem:[#allocation3 + $0x1a0] sm:$0xff]  ;;  %v3221_v37 = vpop.permute.xlu0 %3220 }
 0x477   : > { %3250 = vst.msk [vmem:[#allocation3 + $0x1f0] sm:$0xff] %vm182_vm1, %v3221_v37  ;;  %v3584_v2 = vmul.f32 %v3514_v41, %v3444_v8 }
 0x478   : > { %v3630_v56 = vpack.c.bf16 %v3590_v63, %v3585_v54 }
 0x479   : > { %v3449_v7 = vld [vmem:[#allocation3 + $0x1c8] sm:$0xff]  ;;  %v3223_v27 = vpop.permute.xlu1 %3222 }
 0x47a   : > { %v3589_v33 = vmul.f32 %v3519_v22, %v3449_v7  ;;  %3251 = vst.msk [vmem:[#allocation3 + $0x218] sm:$0xff] %vm182_vm1, %v3223_v27  ;;  %4188 = vmatprep.mubr.bf16.mxu0 %v3630_v56  ;;  %5931 = vmatmul.mubr.msk.bf16.gmra.mrb[72].mxu1 %vm53_vm0, %v3696_v30  ;;  %v3455_v60 = vld [vmem:[#allocation3 + $0x1f8] sm:$0xff] }
 0x47b   : > { %5934 = vmatprep.mubr.msk.bf16.mxu1 %vm6451_vm3, %v6450_v16  ;;  %v3595_v57 = vmul.f32 %v3525_v45, %v3455_v60 }
 0x47c   : > { %v3629_v19 = vpack.c.bf16 %v3589_v33, %v3584_v2 }
 0x47d   : > { %v3460_v6 = vld [vmem:[#allocation3 + $0x220] sm:$0xff] }
 0x47e   : > { %v3600_v59 = vmul.f32 %v3530_v20, %v3460_v6  ;;  %4189 = vmatmul.mubr.bf16.gmra.mrb[76].mxu0 %v3629_v19  ;;  %v3454_v29 = vld [vmem:[#allocation3 + $0x1f0] sm:$0xff] }
 0x47f   : > { %v3594_v25 = vmul.f32 %v3524_v40, %v3454_v29  ;;  %v8541_v29 = vld [vmem:[%s7937_s19 + $0x2] ss:$0 sm:$0xff] }
 0x480   : > { %v3635_v9 = vpack.c.bf16 %v3600_v59, %v3595_v57 }
 0x481   : > { %v3459_v13 = vld [vmem:[#allocation3 + $0x218] sm:$0xff] }
 0x482   : > { %v3599_v26 = vmul.f32 %v3529_v35, %v3459_v13  ;;  %4196 = vmatprep.mubr.bf16.mxu0 %v3635_v9  ;;  %5935 = vmatmul.mubr.msk.bf16.gmra.mrb[76].mxu1 %vm53_vm0, %v3701_v61 }
 0x483   : > { %5938 = vmatprep.mubr.msk.bf16.mxu1 %vm6451_vm3, %v6450_v16 }
 0x484   : > { %v3634_v10 = vpack.c.bf16 %v3599_v26, %v3594_v25 }
 0x486   : > { %4197 = vmatmul.mubr.bf16.gmra.mrb[80].mxu0 %v3634_v10 }
 0x487   :  { %5950 = vmatprep.mubr.msk.bf16.mxu0 (%p8620_p0), %vm6448_vm2, %v6446_v0 }
 0x48a   : > { %5939 = vmatmul.mubr.msk.bf16.gmra.mrb[80].mxu1 %vm53_vm0, %v3706_v17 }
 0x48b   :  { %5992 = vmatprep.mubr.msk.bf16.mxu1 (%p8620_p0), %vm6448_vm2, %v6446_v0 }
 0x4f0   : > { %v5687_v21 = vpop.f32.mrb[28].mxu1 }
 0x4f1   : > { %v5688_v52 = vpop.f32.mrb[29].mxu1 }
 0x4f2   : > { %v5689_v12 = vadd.f32 %v5688_v52, %v5687_v21  ;;  %v5690_v46 = vpop.f32.mrb[30].mxu1 }
 0x4f3   : > { %v5691_v32 = vpop.f32.mrb[31].mxu1 }
 0x4f4   : > { %v5692_v62 = vadd.f32 %v5691_v32, %v5690_v46  ;;  %v4062_v25 = vadd.f32 %v5689_v12, %v8541_v29 }
 0x4f6   : > { %v4065_v21 = vadd.f32 %v5692_v62, %v8541_v29 }
 0x4fc   : > { %v5693_v36 = vpop.f32.mrb[32].mxu1 }
 0x4fd   : > { %v5694_v24 = vpop.f32.mrb[33].mxu1 }
 0x4fe   : > { %v5695_v53 = vadd.f32 %v5694_v24, %v5693_v36  ;;  %v5696_v43 = vpop.f32.mrb[34].mxu1 }
 0x4ff   : > { %v5697_v50 = vpop.f32.mrb[35].mxu1 }
 0x500   : > { %v5698_v51 = vadd.f32 %v5697_v50, %v5696_v43  ;;  %v4070_v12 = vadd.f32 %v5695_v53, %v8541_v29 }
 0x504   : > { %v5699_v38 = vpop.f32.mrb[36].mxu1 }
 0x505   : > { %v5700_v44 = vpop.f32.mrb[37].mxu1 }
 0x506   : > { %v8522_v16 = vadd.f32 %v5700_v44, %v5699_v38  ;;  %v5702_v58 = vpop.f32.mrb[38].mxu1 }
 0x507   : > { %v5703_v3 = vpop.f32.mrb[39].mxu1 }
 0x508   : > { %v8524_v14 = vadd.f32 %v5703_v3, %v5702_v58 }
 0x50c   : > { %v5705_v5 = vpop.f32.mrb[40].mxu1 }
 0x50d   : > { %v5706_v1 = vpop.f32.mrb[41].mxu1 }
 0x50e   : > { %v8526_v54 = vadd.f32 %v5706_v1, %v5705_v5  ;;  %v5708_v63 = vpop.f32.mrb[42].mxu1 }
 0x50f   : > { %v5709_v41 = vpop.f32.mrb[43].mxu1 }
 0x510   : > { %v8528_v8 = vadd.f32 %v5709_v41, %v5708_v63 }
 0x514   : > { %v5711_v22 = vpop.f32.mrb[44].mxu1 }
 0x515   : > { %v5712_v37 = vpop.f32.mrb[45].mxu1 }
 0x516   : > { %v8530_v56 = vadd.f32 %v5712_v37, %v5711_v22  ;;  %v5714_v7 = vpop.f32.mrb[46].mxu1  ;;  %v4073_v37 = vadd.f32 %v5698_v51, %v8541_v29 }
 0x517   : > { %v5715_v27 = vpop.f32.mrb[47].mxu1 }
 0x518   : > { %v8532_v30 = vadd.f32 %v5715_v27, %v5714_v7 }
 0x51c   : > { %v5717_v2 = vpop.f32.mrb[48].mxu1 }
 0x51d   : > { %v5718_v33 = vpop.f32.mrb[49].mxu1 }
 0x51e   : > { %v8534_v45 = vadd.f32 %v5718_v33, %v5717_v2  ;;  %v5720_v60 = vpop.f32.mrb[50].mxu1 }
 0x51f   : > { %v5721_v20 = vpop.f32.mrb[51].mxu1 }
 0x520   : > { %v8536_v19 = vadd.f32 %v5721_v20, %v5720_v60 }
 0x525   : > { %v5723_v6 = vpop.f32.mrb[52].mxu1 }
 0x526   : > { %v5724_v57 = vpop.f32.mrb[53].mxu1 }
 0x527   : > { %v8538_v59 = vadd.f32 %v5724_v57, %v5723_v6  ;;  %v5726_v40 = vpop.f32.mrb[54].mxu1 }
 0x528   : > { %v5727_v35 = vpop.f32.mrb[55].mxu1 }
 0x529   : > { %v8543_v9 = vadd.f32 %v5727_v35, %v5726_v40  ;;  %v5745_v13 = vpop.f32.mrb[56].mxu0 }
 0x52a   : > { %v5746_v61 = vpop.f32.mrb[57].mxu0 }
 0x52b   : > { %v5747_v26 = vadd.f32 %v5746_v61, %v5745_v13  ;;  %v5748_v10 = vpop.f32.mrb[58].mxu0  ;;  %v4078_v13 = vadd.f32 %v8522_v16, %v8541_v29 }
 0x52c   : > { %v5749_v17 = vpop.f32.mrb[59].mxu0 }
 0x52d   : > { %v5750_v52 = vadd.f32 %v5749_v17, %v5748_v10  ;;  %v4151_v46 = vadd.f32 %v5747_v26, %v4062_v25  ;;  %v4239_v32 = vpop.f32.mrb[56].mxu1  ;;  %v4081_v17 = vadd.f32 %v8524_v14, %v8541_v29 }
 0x52e   : > { %v5916_v36 = vpop.f32.mrb[57].mxu1 }
 0x52f   : > { %v4240_v24 = vadd.f32 %v4239_v32, %v4151_v46  ;;  %v4154_v43 = vadd.f32 %v5750_v52, %v4065_v21  ;;  %v4242_v50 = vpop.f32.mrb[58].mxu1 }
 0x530   : > { %v5917_v38 = vpop.f32.mrb[59].mxu1 }
 0x531   : > { %v8548_v49 = vadd.f32 %v6440_v49, %v4240_v24  ;;  %v4243_v58 = vadd.f32 %v4242_v50, %v4154_v43  ;;  %v5751_v3 = vpop.f32.mrb[60].mxu0 }
 0x532   : > { %v5752_v5 = vpop.f32.mrb[61].mxu0 }
 0x533   : > { %v9045_v44 = vmov %v8548_v49  ;;  %v8553_v55 = vadd.f32 %v6436_v55, %v4243_v58  ;;  %v5753_v63 = vadd.f32 %v5752_v5, %v5751_v3  ;;  %v5754_v41 = vpop.f32.mrb[62].mxu0  ;;  %v4086_v3 = vadd.f32 %v8526_v54, %v8541_v29 }
 0x534   : > { %v4308_v1 = vmax.f32 %v9045_v44, 0.0   ;;  %v5755_v22 = vpop.f32.mrb[63].mxu0 }
 0x535   : > { %v9046_v62 = vmov %v8553_v55  ;;  %v5756_v27 = vadd.f32 %v5755_v22, %v5754_v41  ;;  %v4159_v2 = vadd.f32 %v5753_v63, %v4070_v12  ;;  %v4247_v49 = vpop.f32.mrb[60].mxu1  ;;  %v4089_v22 = vadd.f32 %v8528_v8, %v8541_v29 }
 0x536   : > { %v4309_v7 = vmax.f32 %v9046_v62, 0.0   ;;  %v5920_v33 = vpop.f32.mrb[61].mxu1 }
 0x537   : > { %v4248_v60 = vadd.f32 %v4247_v49, %v4159_v2  ;;  %v4162_v20 = vadd.f32 %v5756_v27, %v4073_v37  ;;  %v4250_v6 = vpop.f32.mrb[62].mxu1 }
 0x538   : > { %v5921_v53 = vpop.f32.mrb[63].mxu1 }
 0x539   : > { %v8558_v4 = vadd.f32 %v6432_v4, %v4248_v60  ;;  %v4251_v40 = vadd.f32 %v4250_v6, %v4162_v20  ;;  %v5757_v55 = vpop.f32.mrb[64].mxu0 }
 0x53a   : > { %v5758_v35 = vpop.f32.mrb[65].mxu0 }
 0x53b   : > { %v9047_v57 = vmov %v8558_v4  ;;  %v8564_v11 = vadd.f32 %v6428_v11, %v4251_v40  ;;  %v5759_v25 = vadd.f32 %v5758_v35, %v5757_v55  ;;  %v5760_v26 = vpop.f32.mrb[66].mxu0  ;;  %v4094_v55 = vadd.f32 %v8530_v56, %v8541_v29 }
 0x53c   : > { %v4310_v51 = vmax.f32 %v9047_v57, 0.0   ;;  %v5761_v10 = vpop.f32.mrb[67].mxu0 }
 0x53d   : > { %v9048_v61 = vmov %v8564_v11  ;;  %v5762_v4 = vadd.f32 %v5761_v10, %v5760_v26  ;;  %v4167_v52 = vadd.f32 %v5759_v25, %v4078_v13  ;;  %v4255_v46 = vpop.f32.mrb[64].mxu1  ;;  %v4097_v10 = vadd.f32 %v8532_v30, %v8541_v29 }
 0x53e   : > { %v4311_v21 = vmax.f32 %v9048_v61, 0.0   ;;  %v5924_v32 = vpop.f32.mrb[65].mxu1  ;;  %v6453_v61 = vmov (%p8620_p0), 0  }
 0x53f   : > { %v4256_v36 = vadd.f32 %v4255_v46, %v4167_v52  ;;  %v4170_v24 = vadd.f32 %v5762_v4, %v4081_v17  ;;  %v4258_v16 = vpop.f32.mrb[66].mxu1  ;;  %6279 = vset.pattern.permute.xlu0 (%p8620_p0), %v6453_v61 }
 0x540   : > { %v5925_v43 = vpop.f32.mrb[67].mxu1 }
 0x541   : > { %v8570_v23 = vadd.f32 %v6424_v23, %v4256_v36  ;;  %v4259_v11 = vadd.f32 %v4258_v16, %v4170_v24  ;;  %v5763_v38 = vpop.f32.mrb[68].mxu0 }
 0x542   : > { %v5764_v58 = vpop.f32.mrb[69].mxu0 }
 0x543   : > { %v9049_v50 = vmov %v8570_v23  ;;  %v8576_v28 = vadd.f32 %v6420_v28, %v4259_v11  ;;  %v5765_v12 = vadd.f32 %v5764_v58, %v5763_v38  ;;  %v5766_v63 = vpop.f32.mrb[70].mxu0  ;;  %v4102_v38 = vadd.f32 %v8534_v45, %v8541_v29 }
 0x544   : > { %v4312_v14 = vmax.f32 %v9049_v50, 0.0   ;;  %v5767_v41 = vpop.f32.mrb[71].mxu0 }
 0x545   : > { %v9050_v5 = vmov %v8576_v28  ;;  %v5768_v23 = vadd.f32 %v5767_v41, %v5766_v63  ;;  %v4175_v27 = vadd.f32 %v5765_v12, %v4086_v3  ;;  %v4263_v2 = vpop.f32.mrb[68].mxu1  ;;  %v4105_v41 = vadd.f32 %v8536_v19, %v8541_v29 }
 0x546   : > { %v4313_v37 = vmax.f32 %v9050_v5, 0.0   ;;  %v5928_v49 = vpop.f32.mrb[69].mxu1 }
 0x547   : > { %v4264_v33 = vadd.f32 %v4263_v2, %v4175_v27  ;;  %v4178_v60 = vadd.f32 %v5768_v23, %v4089_v22  ;;  %v4266_v54 = vpop.f32.mrb[70].mxu1 }
 0x548   : > { %v5929_v20 = vpop.f32.mrb[71].mxu1  ;;  %v4324_v44 = vpack.c.bf16 (%p8620_p0), %v4313_v37, %v4312_v14 }
 0x549   : > { %v8582_v39 = vadd.f32 %v6416_v39, %v4264_v33  ;;  %v4267_v28 = vadd.f32 %v4266_v54, %v4178_v60  ;;  %v5769_v53 = vpop.f32.mrb[72].mxu0 }
 0x54a   : > { %v5770_v40 = vpop.f32.mrb[73].mxu0 }
 0x54b   : > { %v9051_v6 = vmov %v8582_v39  ;;  %v8588_v42 = vadd.f32 %v6412_v42, %v4267_v28  ;;  %v5771_v13 = vadd.f32 %v5770_v40, %v5769_v53  ;;  %v5772_v25 = vpop.f32.mrb[74].mxu0  ;;  %v4110_v53 = vadd.f32 %v8538_v59, %v8541_v29 }
 0x54c   : > { %v4314_v8 = vmax.f32 %v9051_v6, 0.0   ;;  %v5773_v26 = vpop.f32.mrb[75].mxu0 }
 0x54d   : > { %v9052_v35 = vmov %v8588_v42  ;;  %v5774_v39 = vadd.f32 %v5773_v26, %v5772_v25  ;;  %v4183_v4 = vadd.f32 %v5771_v13, %v4094_v55  ;;  %v4271_v52 = vpop.f32.mrb[72].mxu1  ;;  %v4113_v26 = vadd.f32 %v8543_v9, %v8541_v29  ;;  %v6301_v29 = vld [vmem:[%s9026_s4] sm:$0xff] (%p8620_p0)   ;;  %v6302_v9 = vld [vmem:[%s9026_s4 + $0x8] sm:$0xff] (%p8620_p0)  }
 0x54e   : > { %v4315_v17 = vmax.f32 %v9052_v35, 0.0   ;;  %v5932_v46 = vpop.f32.mrb[73].mxu1  ;;  %5943 = vmatpush3.bf16.msra.mxu0 (%p8620_p0), %v6301_v29 }
 0x54f   : > { %v4272_v32 = vadd.f32 %v4271_v52, %v4183_v4  ;;  %v4186_v36 = vadd.f32 %v5774_v39, %v4097_v10  ;;  %v4274_v56 = vpop.f32.mrb[74].mxu1  ;;  %5944 = vmatprep.subr.bf16.mxu0 (%p8620_p0), %v6446_v0 }
 0x550   : > { %v5933_v24 = vpop.f32.mrb[75].mxu1 }
 0x551   : > { %v8594_v15 = vadd.f32 %v6408_v15, %v4272_v32  ;;  %v4275_v42 = vadd.f32 %v4274_v56, %v4186_v36  ;;  %v5775_v43 = vpop.f32.mrb[76].mxu0 }
 0x552   : > { %v5776_v11 = vpop.f32.mrb[77].mxu0  ;;  %5945 = vmatpush3.bf16.msra.mxu0 (%p8620_p0), %v6302_v9 }
 0x553   : > { %v9053_v16 = vmov %v8594_v15  ;;  %v8600_v18 = vadd.f32 %v6404_v18, %v4275_v42  ;;  %v5777_v3 = vadd.f32 %v5776_v11, %v5775_v43  ;;  %v5778_v12 = vpop.f32.mrb[78].mxu0  ;;  %v9064_v42 = vmov %v4315_v17  ;;  %5946 = vmatprep.subr.bf16.mxu0 (%p8620_p0), %v6446_v0 }
 0x554   : > { %v4316_v30 = vmax.f32 %v9053_v16, 0.0   ;;  %v5779_v63 = vpop.f32.mrb[79].mxu0  ;;  %v9068_v11 = vmov %v4311_v21  ;;  %v4322_v42 = vpack.c.bf16 (%p8620_p0), %v4309_v7, %v4308_v1 }
 0x555   : > { %v9054_v58 = vmov %v8600_v18  ;;  %v5780_v15 = vadd.f32 %v5779_v63, %v5778_v12  ;;  %v4191_v23 = vadd.f32 %v5777_v3, %v4102_v38  ;;  %v4279_v27 = vpop.f32.mrb[76].mxu1  ;;  %v4323_v11 = vpack.c.bf16 (%p8620_p0), %v4311_v21, %v4310_v51  ;;  %v8752_v21 = vld [vmem:[%s9027_s5] ss:$0 sm:$0xff] (%p8620_p0) }
 0x556   : > { %v4317_v22 = vmax.f32 %v9054_v58, 0.0   ;;  %v5936_v2 = vpop.f32.mrb[77].mxu1 }
 0x557   : > { %v4280_v49 = vadd.f32 %v4279_v27, %v4191_v23  ;;  %v4194_v33 = vadd.f32 %v5780_v15, %v4105_v41  ;;  %v4282_v45 = vpop.f32.mrb[78].mxu1  ;;  %v9063_v15 = vmov %v4316_v30  ;;  %v9067_v23 = vmov %v4312_v14 }
 0x558   : > { %v5937_v60 = vpop.f32.mrb[79].mxu1  ;;  %v4326_v62 = vpack.c.bf16 (%p8620_p0), %v4317_v22, %v4316_v30 }
 0x559   : > { %v8606_v31 = vadd.f32 %v6400_v31, %v4280_v49  ;;  %v4283_v18 = vadd.f32 %v4282_v45, %v4194_v33  ;;  %v5781_v20 = vpop.f32.mrb[80].mxu0  ;;  %v9071_v49 = vmov %v4308_v1  ;;  %v4325_v1 = vpack.c.bf16 (%p8620_p0), %v4315_v17, %v4314_v8 }
 0x55a   : > { %v5782_v28 = vpop.f32.mrb[81].mxu0 }
 0x55b   : > { %v9055_v54 = vmov %v8606_v31  ;;  %v8612_v34 = vadd.f32 %v6396_v34, %v4283_v18  ;;  %v5783_v55 = vadd.f32 %v5782_v28, %v5781_v20  ;;  %v5784_v13 = vpop.f32.mrb[82].mxu0  ;;  %v9062_v18 = vmov %v4317_v22 }
 0x55c   : > { %v4318_v19 = vmax.f32 %v9055_v54, 0.0   ;;  %v5785_v25 = vpop.f32.mrb[83].mxu0  ;;  %v9066_v28 = vmov %v4313_v37 }
 0x55d   : > { %v9056_v40 = vmov %v8612_v34  ;;  %v5786_v31 = vadd.f32 %v5785_v25, %v5784_v13  ;;  %v4199_v39 = vadd.f32 %v5783_v55, %v4110_v53  ;;  %v4287_v4 = vpop.f32.mrb[80].mxu1  ;;  %v9070_v55 = vmov %v4309_v7 }
 0x55e   : > { %v4319_v10 = vmax.f32 %v9056_v40, 0.0   ;;  %v5940_v52 = vpop.f32.mrb[81].mxu1 }
 0x55f   : > { %v4288_v46 = vadd.f32 %v4287_v4, %v4199_v39  ;;  %v4202_v32 = vadd.f32 %v5786_v31, %v4113_v26  ;;  %v4290_v59 = vpop.f32.mrb[82].mxu1  ;;  %v9061_v31 = vmov %v4318_v19  ;;  %v9065_v39 = vmov %v4314_v8 }
 0x560   : > { %v5941_v36 = vpop.f32.mrb[83].mxu1  ;;  %v9069_v4 = vmov %v4310_v51  ;;  %v4327_v7 = vpack.c.bf16 (%p8620_p0), %v4319_v10, %v4318_v19  ;;  %v6452_v51 = vmov (%p8620_p0), 1  }
 0x561   : > { %v4306_v56 = vadd.f32 %v6392_v47, %v4288_v46  ;;  %v4291_v24 = vadd.f32 %v4290_v59, %v4202_v32  ;;  %1477 = sbr.rel (!%p8620_p0) target bundleno = 494 (0x1ee), region = 99  ;;  %6280 = vset.pattern.permute.xlu1 (%p8620_p0), %v6452_v51 }
 0x563   : > { %v4320_v43 = vmax.f32 %v4306_v56, 0.0   ;;  %v4307_v34 = vadd.f32 %v6388_v48, %v4291_v24 }
 0x565   : > { %v4321_v38 = vmax.f32 %v4307_v34, 0.0   ;;  %v9059_v47 = vmov %v4320_v43  ;;  %v9060_v34 = vmov %v4319_v10 }
 0x566   :  { %v6303_v47 = vld [vmem:[%s9026_s4 + $0x10] sm:$0xff] (%p8620_p0)  }
 0x567   : > { %v9058_v48 = vmov %v4321_v38  ;;  %5947 = vmatpush3.bf16.msra.mxu0 (%p8620_p0), %v6303_v47  ;;  %v4328_v57 = vpack.c.bf16 (%p8620_p0), %v4321_v38, %v4320_v43 }
 0x568   :  { %v6304_v48 = vld [vmem:[%s9026_s4 + $0x18] sm:$0xff]   ;;  %5948 = vmatprep.subr.bf16.mxu0 %v6446_v0 }
 0x56b   :  { %5949 = vmatpush3.bf16.msra.mxu0 %v6304_v48 }
 0x56c   :  { %6014 = vmatprep.subr.bf16.mxu0 %v6446_v0 }
 0x56e   :  { %5951 = vmatmul.mubr.msk.bf16.vlgmr.msra.gmra.mrb[0].mxu0 %vm53_vm0, %v4322_v42 }
 0x56f   :  { %5954 = vmatprep.mubr.msk.bf16.mxu0 %vm6448_vm2, %v6446_v0 }
 0x576   :  { %5955 = vmatmul.mubr.msk.bf16.gmra.mrb[4].mxu0 %vm53_vm0, %v4323_v11  ;;  %v6454_v11 = vmov 4  }
 0x577   :  { %5958 = vmatprep.mubr.msk.bf16.mxu0 %vm6448_vm2, %v6446_v0 }
 0x57e   :  { %5959 = vmatmul.mubr.msk.bf16.gmra.mrb[8].mxu0 %vm53_vm0, %v4324_v44 }
 0x57f   :  { %5962 = vmatprep.mubr.msk.bf16.mxu0 %vm6448_vm2, %v6446_v0 }
 0x586   :  { %5963 = vmatmul.mubr.msk.bf16.gmra.mrb[12].mxu0 %vm53_vm0, %v4325_v1 }
 0x587   :  { %5966 = vmatprep.mubr.msk.bf16.mxu0 %vm6448_vm2, %v6446_v0 }
 0x58e   :  { %5967 = vmatmul.mubr.msk.bf16.gmra.mrb[16].mxu0 %vm53_vm0, %v4326_v62  ;;  %v4592_v62 = vld [vmem:[%s9029_s7] sm:$0xff] }
 0x58f   :  { %5970 = vmatprep.mubr.msk.bf16.mxu0 %vm6448_vm2, %v6446_v0 }
 0x596   :  { %5971 = vmatmul.mubr.msk.bf16.gmra.mrb[20].mxu0 %vm53_vm0, %v4327_v7 }
 0x597   :  { %5974 = vmatprep.mubr.msk.bf16.mxu0 %vm6448_vm2, %v6446_v0 }
 0x59e   :  { %5975 = vmatmul.mubr.msk.bf16.gmra.mrb[24].mxu0 %vm53_vm0, %v4328_v57  ;;  %v4494_v57 = vld [vmem:[%s9028_s6] sm:$0xff] }
 0x59f   :  { %6030 = vmatprep.mubr.msk.bf16.mxu0 %vm6448_vm2, %v6446_v0 }
 0x641   :  { %v4423_v50 = vpop.f32.mrb[0].mxu0 }
 0x642   :  { %v4424_v14 = vadd.f32 %v8752_v21, %v4423_v50  ;;  %v5952_v5 = vpop.f32.mrb[1].mxu0 }
 0x643   :  { %v4426_v37 = vpop.f32.mrb[2].mxu0 }
 0x644   :  { %v8755_v6 = vmax.f32 %v4424_v14, 0.0  ;;  %v4427_v8 = vadd.f32 %v8752_v21, %v4426_v37  ;;  %v5953_v35 = vpop.f32.mrb[3].mxu0 }
 0x646   :  { %4607 = vperm.xlu1 %6280, %v8755_v6   ;;  %4510 = vperm.xlu0 %6279, %v8755_v6   ;;  %v8760_v17 = vmax.f32 %v4427_v8, 0.0 }
 0x649   :  { %v4431_v16 = vpop.f32.mrb[4].mxu0 }
 0x64a   :  { %v4432_v30 = vadd.f32 %v8752_v21, %v4431_v16  ;;  %4611 = vperm.xlu1 %6280, %v8760_v17   ;;  %4515 = vperm.xlu0 %6279, %v8760_v17   ;;  %v5956_v58 = vpop.f32.mrb[5].mxu0 }
 0x64b   :  { %v4434_v3 = vpop.f32.mrb[6].mxu0 }
 0x64c   :  { %v8765_v12 = vmax.f32 %v4432_v30, 0.0  ;;  %v4435_v63 = vadd.f32 %v8752_v21, %v4434_v3  ;;  %v5957_v41 = vpop.f32.mrb[7].mxu0  ;;  %v4594_v3 = vld [vmem:[%s9029_s7 + $0x10] sm:$0xff] }
 0x64e   :  { %v8768_v22 = vmax.f32 %v4435_v63, 0.0  ;;  %4520 = vperm.xlu0 %6279, %v8765_v12   ;;  %6282 = vset.pattern.permute.xlu1 %v6453_v61  ;;  %v4497_v63 = vld [vmem:[%s9028_s6 + $0x18] sm:$0xff] }
 0x650   :  { %4525 = vperm.xlu1 %6282, %v8768_v22  }
 0x651   :  { %v4439_v15 = vpop.f32.mrb[8].mxu0 }
 0x652   :  { %6281 = vset.pattern.permute.xlu0 %v6452_v51  ;;  %v4440_v23 = vadd.f32 %v8752_v21, %v4439_v15  ;;  %v5960_v27 = vpop.f32.mrb[9].mxu0 }
 0x653   :  { %4615 = vperm.xlu0 %6281, %v8765_v12   ;;  %v4442_v2 = vpop.f32.mrb[10].mxu0 }
 0x654   :  { %6283 = vset.pattern.permute.xlu1 %v6452_v51  ;;  %v4443_v49 = vadd.f32 %v8752_v21, %v4442_v2  ;;  %v5961_v33 = vpop.f32.mrb[11].mxu0  ;;  %v8779_v45 = vmax.f32 %v4440_v23, 0.0 }
 0x655   :  { %4619 = vperm.xlu1 %6283, %v8768_v22  }
 0x656   :  { %v8781_v60 = vmax.f32 %v4443_v49, 0.0 }
 0x657   :  { %6286 = vset.pattern.permute.xlu0 %v6453_v61 }
 0x658   :  { %4535 = vperm.xlu0 %6286, %v8781_v60  }
 0x659   :  { %6284 = vset.pattern.permute.xlu1 %v6453_v61  ;;  %v4447_v54 = vpop.f32.mrb[12].mxu0 }
 0x65a   :  { %4530 = vperm.xlu1 %6284, %v8779_v45   ;;  %v4448_v18 = vadd.f32 %v8752_v21, %v4447_v54  ;;  %v5964_v20 = vpop.f32.mrb[13].mxu0 }
 0x65b   :  { %v4450_v28 = vpop.f32.mrb[14].mxu0  ;;  %v4596_v20 = vld [vmem:[%s9029_s7 + $0x20] sm:$0xff] }
 0x65c   :  { %v8788_v53 = vmax.f32 %v4448_v18, 0.0  ;;  %v5965_v19 = vpop.f32.mrb[15].mxu0  ;;  %v4451_v55 = vadd.f32 %v8752_v21, %v4450_v28 }
 0x65d   :  { %v4499_v19 = vld [vmem:[%s9028_s6 + $0x28] sm:$0xff] }
 0x65e   :  { %6285 = vset.pattern.permute.xlu1 %v6452_v51  ;;  %4540 = vperm.xlu0 %6286, %v8788_v53   ;;  %v4485_v31 = vmax.f32 %v4451_v55, 0.0 }
 0x65f   :  { %4623 = vperm.xlu1 %6285, %v8779_v45  }
 0x661   :  { %v4455_v40 = vpop.f32.mrb[16].mxu0 }
 0x662   :  { %6287 = vset.pattern.permute.xlu0 %v6452_v51  ;;  %v5968_v13 = vpop.f32.mrb[17].mxu0  ;;  %v4456_v52 = vadd.f32 %v8752_v21, %v4455_v40  ;;  %v4597_v40 = vld [vmem:[%s9029_s7 + $0x28] sm:$0xff] }
 0x663   :  { %4627 = vperm.xlu1 %6285, %v8781_v60   ;;  %4631 = vperm.xlu0 %6287, %v8788_v53   ;;  %v4458_v25 = vpop.f32.mrb[18].mxu0 }
 0x664   :  { %v4459_v26 = vadd.f32 %v8752_v21, %v4458_v25  ;;  %v5969_v10 = vpop.f32.mrb[19].mxu0  ;;  %v4486_v24 = vmax.f32 %v4456_v52, 0.0 }
 0x666   :  { %v4487_v39 = vmax.f32 %v4459_v26, 0.0 }
 0x667   :  { %6288 = vset.pattern.permute.xlu1 %v6453_v61  ;;  %6292 = vset.pattern.permute.xlu0 %v6453_v61 }
 0x668   :  { %4545 = vperm.xlu1 %6288, %v4485_v31   ;;  %4555 = vperm.xlu0 %6292, %v4487_v39  }
 0x669   :  { %v4463_v4 = vpop.f32.mrb[20].mxu0 }
 0x66a   :  { %v4464_v46 = vadd.f32 %v8752_v21, %v4463_v4  ;;  %v5972_v32 = vpop.f32.mrb[21].mxu0 }
 0x66b   :  { %v4466_v59 = vpop.f32.mrb[22].mxu0  ;;  %v4500_v32 = vld [vmem:[%s9028_s6 + $0x30] sm:$0xff] }
 0x66c   :  { %v4488_v36 = vmax.f32 %v4464_v46, 0.0  ;;  %6289 = vset.pattern.permute.xlu1 %v6452_v51  ;;  %v5973_v56 = vpop.f32.mrb[23].mxu0  ;;  %v4467_v42 = vadd.f32 %v8752_v21, %v4466_v59  ;;  %v4598_v59 = vld [vmem:[%s9029_s7 + $0x30] sm:$0xff] }
 0x66d   :  { %4635 = vperm.xlu1 %6289, %v4485_v31   ;;  %v4501_v56 = vld [vmem:[%s9028_s6 + $0x38] sm:$0xff] }
 0x66e   :  { %4560 = vperm.xlu0 %6292, %v4488_v36   ;;  %v4489_v44 = vmax.f32 %v4467_v42, 0.0 }
 0x671   :  { %6290 = vset.pattern.permute.xlu1 %v6453_v61  ;;  %v4471_v43 = vpop.f32.mrb[24].mxu0 }
 0x672   :  { %v4472_v34 = vadd.f32 %v8752_v21, %v4471_v43  ;;  %4550 = vperm.xlu1 %6290, %v4486_v24   ;;  %6293 = vset.pattern.permute.xlu0 %v6452_v51  ;;  %v5976_v38 = vpop.f32.mrb[25].mxu0 }
 0x673   :  { %4647 = vperm.xlu0 %6293, %v4488_v36   ;;  %v4474_v29 = vpop.f32.mrb[26].mxu0 }
 0x674   :  { %v4475_v9 = vadd.f32 %v8752_v21, %v4474_v29  ;;  %v5977_v47 = vpop.f32.mrb[27].mxu0  ;;  %v4490_v1 = vmax.f32 %v4472_v34, 0.0  ;;  %v4495_v21 = vld [vmem:[%s9028_s6 + $0x8] sm:$0xff] }
 0x676   :  { %v4491_v48 = vmax.f32 %v4475_v9, 0.0  ;;  %6291 = vset.pattern.permute.xlu1 %v6452_v51 }
 0x677   :  { %4639 = vperm.xlu1 %6291, %v4486_v24   ;;  %6298 = vset.pattern.permute.xlu0 %v6453_v61 }
 0x678   :  { %4575 = vperm.xlu0 %6298, %v4491_v48  }
 0x67b   :  { %4643 = vperm.xlu1 %6291, %v4487_v39  }
 0x67c   :  { %6299 = vset.pattern.permute.xlu0 %v6454_v11 }
 0x67d   :  { %4705 = vperm.xlu0 %6299, %v8755_v6  }
 0x67f   :  { %6294 = vset.pattern.permute.xlu1 %v6453_v61 }
 0x680   :  { %4565 = vperm.xlu1 %6294, %v4489_v44  }
 0x681   :  { %4717 = vperm.xlu0 %6299, %v8768_v22   ;;  %v4595_v22 = vld [vmem:[%s9029_s7 + $0x18] sm:$0xff] }
 0x684   :  { %6295 = vset.pattern.permute.xlu1 %v6452_v51 }
 0x685   :  { %4651 = vperm.xlu1 %6295, %v4489_v44   ;;  %4725 = vperm.xlu0 %6299, %v8781_v60  }
 0x689   :  { %6296 = vset.pattern.permute.xlu1 %v6453_v61  ;;  %4733 = vperm.xlu0 %6299, %v4485_v31   ;;  %v4593_v61 = vld [vmem:[%s9029_s7 + $0x8] sm:$0xff] }
 0x68a   :  { %4570 = vperm.xlu1 %6296, %v4490_v1  }
 0x68d   :  { %4741 = vperm.xlu0 %6299, %v4487_v39  }
 0x68e   :  { %6297 = vset.pattern.permute.xlu1 %v6452_v51 }
 0x68f   :  { %4655 = vperm.xlu1 %6297, %v4490_v1  }
 0x691   :  { %4749 = vperm.xlu0 %6299, %v4489_v44  }
 0x693   :  { %4659 = vperm.xlu1 %6297, %v4491_v48  }
 0x695   :  { %4757 = vperm.xlu0 %6299, %v4491_v48  }
 0x697   :  { %6300 = vset.pattern.permute.xlu1 %v6454_v11 }
 0x698   :  { %4709 = vperm.xlu1 %6300, %v8760_v17  }
 0x69c   :  { %4713 = vperm.xlu1 %6300, %v8765_v12   ;;  %v4496_v12 = vld [vmem:[%s9028_s6 + $0x10] sm:$0xff] }
 0x6a0   :  { %4721 = vperm.xlu1 %6300, %v8779_v45  }
 0x6a4   :  { %4729 = vperm.xlu1 %6300, %v8788_v53   ;;  %v4498_v53 = vld [vmem:[%s9028_s6 + $0x20] sm:$0xff] }
 0x6a8   :  { %4737 = vperm.xlu1 %6300, %v4486_v24   ;;  %v4599_v24 = vld [vmem:[%s9029_s7 + $0x38] sm:$0xff] }
 0x6ac   :  { %4745 = vperm.xlu1 %6300, %v4488_v36  }
 0x6b0   :  { %4753 = vperm.xlu1 %6300, %v4490_v1   ;;  %v4600_v1 = vld [vmem:[%s9029_s7 + $0x40] sm:$0xff] }
 0x6c5   :  { %v4608_v7 = vpop.permute.xlu1 %4607  ;;  %v4511_v51 = vpop.permute.xlu0 %4510 }
 0x6c6   :  { %v4662_v50 = vmul.f32 %v4608_v7, %v4592_v62  ;;  %v4578_v14 = vmul.f32 %v4511_v51, %v4494_v57  ;;  %v4503_v57 = vld [vmem:[%s9028_s6 + $0x48] sm:$0xff]  ;;  %v4502_v51 = vld [vmem:[%s9028_s6 + $0x40] sm:$0xff] }
 0x6c8   :  { %v4676_v35 = vadd.f32 %v4662_v50, %v4578_v14 }
 0x6c9   :  { %v4612_v5 = vpop.permute.xlu1 %4611  ;;  %v4516_v37 = vpop.permute.xlu0 %4515 }
 0x6ca   :  { %v4663_v6 = vmul.f32 %v4612_v5, %v4593_v61  ;;  %v4579_v8 = vmul.f32 %v4516_v37, %v4495_v21  ;;  %v4601_v61 = vld [vmem:[%s9029_s7 + $0x48] sm:$0xff] }
 0x6cc   :  { %v4677_v17 = vadd.f32 %v4663_v6, %v4579_v8 }
 0x6cd   :  { %v4521_v16 = vpop.permute.xlu0 %4520 }
 0x6ce   :  { %v4774_v30 = vpack.c.bf16 %v4677_v17, %v4676_v35  ;;  %v4580_v27 = vmul.f32 %v4521_v16, %v4496_v12  ;;  %v4603_v12 = vld [vmem:[%s9029_s7 + $0x58] sm:$0xff] }
 0x6cf   :  { %v4526_v58 = vpop.permute.xlu1 %4525 }
 0x6d0   :  { %5979 = vmatpush3.bf16.msra.mxu1 %v4774_v30  ;;  %v4581_v2 = vmul.f32 %v4526_v58, %v4497_v63  ;;  %v4504_v30 = vld [vmem:[%s9028_s6 + $0x50] sm:$0xff] }
 0x6d1   :  { %5980 = vmatprep.subr.bf16.mxu1 %v6446_v0  ;;  %v4602_v58 = vld [vmem:[%s9029_s7 + $0x50] sm:$0xff] }
 0x6d2   :  { %v4616_v41 = vpop.permute.xlu0 %4615 }
 0x6d3   :  { %v4664_v15 = vmul.f32 %v4616_v41, %v4594_v3  ;;  %v4505_v3 = vld [vmem:[%s9028_s6 + $0x58] sm:$0xff] }
 0x6d4   :  { %v4620_v23 = vpop.permute.xlu1 %4619 }
 0x6d5   :  { %v4665_v49 = vmul.f32 %v4620_v23, %v4595_v22  ;;  %v4678_v33 = vadd.f32 %v4664_v15, %v4580_v27 }
 0x6d7   :  { %v4679_v45 = vadd.f32 %v4665_v49, %v4581_v2  ;;  %v4536_v18 = vpop.permute.xlu0 %4535 }
 0x6d8   :  { %v4583_v10 = vmul.f32 %v4536_v18, %v4499_v19  ;;  %v4605_v19 = vld [vmem:[%s9029_s7 + $0x68] sm:$0xff] }
 0x6d9   :  { %v4531_v60 = vpop.permute.xlu1 %4530  ;;  %v4775_v54 = vpack.c.bf16 %v4679_v45, %v4678_v33 }
 0x6da   :  { %v4582_v26 = vmul.f32 %v4531_v60, %v4498_v53  ;;  %v4506_v53 = vld [vmem:[%s9028_s6 + $0x60] sm:$0xff] }
 0x6db   :  { %5981 = vmatpush3.bf16.msra.mxu1 %v4775_v54  ;;  %v4604_v54 = vld [vmem:[%s9029_s7 + $0x60] sm:$0xff] }
 0x6dc   :  { %5982 = vmatprep.subr.bf16.mxu1 %v6446_v0 }
 0x6dd   :  { %v4541_v13 = vpop.permute.xlu0 %4540 }
 0x6de   :  { %v4624_v28 = vpop.permute.xlu1 %4623  ;;  %v4584_v43 = vmul.f32 %v4541_v13, %v4500_v32 }
 0x6df   :  { %v4666_v55 = vmul.f32 %v4624_v28, %v4596_v20  ;;  %v4507_v28 = vld [vmem:[%s9028_s6 + $0x68] sm:$0xff] }
 0x6e1   :  { %v4680_v39 = vadd.f32 %v4666_v55, %v4582_v26 }
 0x6e2   :  { %v4628_v25 = vpop.permute.xlu1 %4627  ;;  %v4632_v36 = vpop.permute.xlu0 %4631 }
 0x6e3   :  { %v4667_v31 = vmul.f32 %v4628_v25, %v4597_v40  ;;  %v4668_v34 = vmul.f32 %v4632_v36, %v4598_v59 }
 0x6e5   :  { %v4681_v4 = vadd.f32 %v4667_v31, %v4583_v10  ;;  %v4682_v47 = vadd.f32 %v4668_v34, %v4584_v43  ;;  %v4690_v10 = vld [vmem:[%s9030_s8] sm:$0xff]  ;;  %v4692_v43 = vld [vmem:[%s9030_s8 + $0x10] sm:$0xff] }
 0x6e7   :  { %v4546_v52 = vpop.permute.xlu1 %4545  ;;  %v4776_v46 = vpack.c.bf16 %v4681_v4, %v4680_v39  ;;  %v4556_v42 = vpop.permute.xlu0 %4555 }
 0x6e8   :  { %v4585_v29 = vmul.f32 %v4546_v52, %v4501_v56  ;;  %v4587_v14 = vmul.f32 %v4556_v42, %v4503_v57  ;;  %v4691_v52 = vld [vmem:[%s9030_s8 + $0x8] sm:$0xff]  ;;  %v6305_v56 = vld [vmem:[%s9031_s9] sm:$0xff]  }
 0x6e9   :  { %5983 = vmatpush3.bf16.msra.mxu1 %v4776_v46  ;;  %v4694_v42 = vld [vmem:[%s9030_s8 + $0x20] sm:$0xff] }
 0x6ea   :  { %5984 = vmatprep.subr.bf16.mxu1 %v6446_v0 }
 0x6ec   :  { %v4636_v38 = vpop.permute.xlu1 %4635 }
 0x6ed   :  { %v4669_v9 = vmul.f32 %v4636_v38, %v4599_v24  ;;  %v4561_v7 = vpop.permute.xlu0 %4560  ;;  %v4693_v24 = vld [vmem:[%s9030_s8 + $0x18] sm:$0xff] }
 0x6ee   :  { %v4588_v63 = vmul.f32 %v4561_v7, %v4504_v30  ;;  %v4697_v7 = vld [vmem:[%s9030_s8 + $0x38] sm:$0xff] }
 0x6ef   :  { %v4683_v48 = vadd.f32 %v4669_v9, %v4585_v29  ;;  %v4701_v30 = vld [vmem:[%s9030_s8 + $0x58] sm:$0xff] }
 0x6f1   :  { %v4551_v11 = vpop.permute.xlu1 %4550  ;;  %v4777_v44 = vpack.c.bf16 %v4683_v48, %v4682_v47  ;;  %v4695_v48 = vld [vmem:[%s9030_s8 + $0x28] sm:$0xff] }
 0x6f2   :  { %v4586_v5 = vmul.f32 %v4551_v11, %v4502_v51  ;;  %v4648_v6 = vpop.permute.xlu0 %4647  ;;  %v4696_v51 = vld [vmem:[%s9030_s8 + $0x30] sm:$0xff] }
 0x6f3   :  { %5985 = vmatpush3.bf16.msra.mxu1 %v4777_v44  ;;  %v4672_v41 = vmul.f32 %v4648_v6, %v4602_v58  ;;  %v4700_v58 = vld [vmem:[%s9030_s8 + $0x50] sm:$0xff] }
 0x6f4   :  { %5986 = vmatprep.subr.bf16.mxu1 %v6446_v0 }
 0x6f5   :  { %v4686_v2 = vadd.f32 %v4672_v41, %v4588_v63 }
 0x6f6   :  { %v4640_v62 = vpop.permute.xlu1 %4639 }
 0x6f7   :  { %v4670_v21 = vmul.f32 %v4640_v62, %v4600_v1  ;;  %v4576_v22 = vpop.permute.xlu0 %4575 }
 0x6f8   :  { %v4591_v13 = vmul.f32 %v4576_v22, %v4507_v28  ;;  %v4703_v22 = vld [vmem:[%s9030_s8 + $0x68] sm:$0xff]  ;;  %v6310_v28 = vld [vmem:[%s9035_s13 + $0x20] sm:$0xff]  }
 0x6f9   :  { %v4684_v8 = vadd.f32 %v4670_v21, %v4586_v5  ;;  %v4699_v5 = vld [vmem:[%s9030_s8 + $0x48] sm:$0xff] }
 0x6fa   :  { %v4644_v50 = vpop.permute.xlu1 %4643 }
 0x6fb   :  { %v4671_v37 = vmul.f32 %v4644_v50, %v4601_v61 }
 0x6fc   :  { %v4706_v33 = vpop.permute.xlu0 %4705 }
 0x6fd   :  { %v4685_v35 = vadd.f32 %v4671_v37, %v4587_v14  ;;  %v4760_v59 = vmul.f32 %v4706_v33, %v4690_v10  ;;  %v4698_v37 = vld [vmem:[%s9030_s8 + $0x40] sm:$0xff] }
 0x6ff   :  { %v4566_v17 = vpop.permute.xlu1 %4565  ;;  %v4778_v16 = vpack.c.bf16 %v4685_v35, %v4684_v8 }
 0x700   :  { %v4589_v23 = vmul.f32 %v4566_v17, %v4505_v3  ;;  %v4718_v20 = vpop.permute.xlu0 %4717 }
 0x701   :  { %5987 = vmatpush3.bf16.msra.mxu1 %v4778_v16  ;;  %v4763_v9 = vmul.f32 %v4718_v20, %v4693_v24  ;;  %v6309_v20 = vld [vmem:[%s9035_s13 + $0x18] sm:$0xff]  }
 0x702   :  { %5988 = vmatprep.subr.bf16.mxu1 %v6446_v0 }
 0x704   :  { %v4652_v15 = vpop.permute.xlu1 %4651  ;;  %v4726_v31 = vpop.permute.xlu0 %4725 }
 0x705   :  { %v4673_v27 = vmul.f32 %v4652_v15, %v4603_v12  ;;  %v4765_v1 = vmul.f32 %v4726_v31, %v4695_v48 }
 0x707   :  { %v4687_v49 = vadd.f32 %v4673_v27, %v4589_v23  ;;  %v4702_v23 = vld [vmem:[%s9030_s8 + $0x60] sm:$0xff] }
 0x708   :  { %v4734_v38 = vpop.permute.xlu0 %4733 }
 0x709   :  { %v4571_v45 = vpop.permute.xlu1 %4570  ;;  %v4779_v60 = vpack.c.bf16 %v4687_v49, %v4686_v2  ;;  %v4767_v50 = vmul.f32 %v4734_v38, %v4697_v7 }
 0x70a   :  { %v4590_v25 = vmul.f32 %v4571_v45, %v4506_v53  ;;  %v6311_v53 = vld [vmem:[%s9035_s13 + $0x28] sm:$0xff]  }
 0x70b   :  { %5989 = vmatpush3.bf16.msra.mxu1 %v4779_v60  ;;  %v6306_v60 = vld [vmem:[%s9035_s13] sm:$0xff]  }
 0x70c   :  { %5990 = vmatprep.subr.bf16.mxu1 %v6446_v0  ;;  %v4742_v57 = vpop.permute.xlu0 %4741  ;;  %6015 = vmatpush3.bf16.msra.mxu0 %v6306_v60 }
 0x70d   :  { %v4769_v17 = vmul.f32 %v4742_v57, %v4699_v5  ;;  %6016 = vmatprep.subr.bf16.mxu0 %v6446_v0  ;;  %v5408_v57 = vld [vmem:[%s9036_s14] ss:$0 sm:$0xff] }
 0x70e   :  { %v4656_v18 = vpop.permute.xlu1 %4655 }
 0x70f   :  { %v4674_v40 = vmul.f32 %v4656_v18, %v4604_v54  ;;  %v6307_v54 = vld [vmem:[%s9035_s13 + $0x8] sm:$0xff]   ;;  %v6308_v18 = vld [vmem:[%s9035_s13 + $0x10] sm:$0xff]  }
 0x710   :  { %v4750_v8 = vpop.permute.xlu0 %4749  ;;  %6017 = vmatpush3.bf16.msra.mxu0 %v6307_v54 }
 0x711   :  { %v4688_v39 = vadd.f32 %v4674_v40, %v4590_v25  ;;  %v4771_v63 = vmul.f32 %v4750_v8, %v4701_v30  ;;  %6018 = vmatprep.subr.bf16.mxu0 %v6446_v0  ;;  %v6313_v40 = vld [vmem:[%s9035_s13 + $0x38] sm:$0xff]   ;;  %v4838_v25 = vld [vmem:[%s9033_s11] sm:$0xff] }
 0x712   :  { %v4660_v55 = vpop.permute.xlu1 %4659 }
 0x713   :  { %v4675_v26 = vmul.f32 %v4660_v55, %v4605_v19  ;;  %v6312_v19 = vld [vmem:[%s9035_s13 + $0x30] sm:$0xff]   ;;  %v5403_v55 = vld [vmem:[%s9032_s10] ss:$0 sm:$0xff] }
 0x714   :  { %v4758_v15 = vpop.permute.xlu0 %4757  ;;  %6019 = vmatpush3.bf16.msra.mxu0 %v6308_v18 }
 0x715   :  { %v4689_v4 = vadd.f32 %v4675_v26, %v4591_v13  ;;  %v4773_v49 = vmul.f32 %v4758_v15, %v4703_v22  ;;  %6020 = vmatprep.subr.bf16.mxu0 %v6446_v0 }
 0x717   :  { %v4710_v46 = vpop.permute.xlu1 %4709  ;;  %v4780_v32 = vpack.c.bf16 %v4689_v4, %v4688_v39 }
 0x718   :  { %v4761_v36 = vmul.f32 %v4710_v46, %v4691_v52  ;;  %6021 = vmatpush3.bf16.msra.mxu0 %v6309_v20 }
 0x719   :  { %5991 = vmatpush3.bf16.msra.mxu1 %v4780_v32  ;;  %6022 = vmatprep.subr.bf16.mxu0 %v6446_v0  ;;  %v5406_v32 = vld [vmem:[%s9034_s12] ss:$0 sm:$0xff] }
 0x71a   :  { %v4864_v34 = vpack.c.bf16 %v4761_v36, %v4760_v59  ;;  %5996 = vmatprep.subr.bf16.mxu1 %v6446_v0 }
 0x71b   :  { %v4714_v29 = vpop.permute.xlu1 %4713 }
 0x71c   :  { %v4762_v47 = vmul.f32 %v4714_v29, %v4692_v43  ;;  %5993 = vmatmul.mubr.msk.bf16.vlgmr.msra.gmra.mrb[0].mxu1 %vm4793_vm4, %v6305_v56  ;;  %6023 = vmatpush3.bf16.msra.mxu0 %v6310_v28 }
 0x71d   :  { %5997 = vmatpush3.bf16.msra.mxu1 %v4864_v34  ;;  %6010 = vmatprep.mubr.msk.bf16.mxu1 %vm6448_vm2, %v6446_v0 }
 0x71e   :  { %v4865_v11 = vpack.c.bf16 %v4763_v9, %v4762_v47  ;;  %5998 = vmatprep.subr.bf16.mxu1 %v6446_v0  ;;  %6024 = vmatprep.subr.bf16.mxu0 %v6446_v0 }
 0x71f   :  { %v4722_v44 = vpop.permute.xlu1 %4721 }
 0x720   :  { %v4764_v62 = vmul.f32 %v4722_v44, %v4694_v42  ;;  %6025 = vmatpush3.bf16.msra.mxu0 %v6311_v53 }
 0x721   :  { %5999 = vmatpush3.bf16.msra.mxu1 %v4865_v11  ;;  %6026 = vmatprep.subr.bf16.mxu0 %v6446_v0 }
 0x722   :  { %v4866_v61 = vpack.c.bf16 %v4765_v1, %v4764_v62  ;;  %6000 = vmatprep.subr.bf16.mxu1 %v6446_v0 }
 0x723   :  { %v4730_v21 = vpop.permute.xlu1 %4729 }
 0x724   :  { %v4766_v14 = vmul.f32 %v4730_v21, %v4696_v51  ;;  %6027 = vmatpush3.bf16.msra.mxu0 %v6312_v19 }
 0x725   :  { %6001 = vmatpush3.bf16.msra.mxu1 %v4866_v61  ;;  %6028 = vmatprep.subr.bf16.mxu0 %v6446_v0 }
 0x726   :  { %v4867_v6 = vpack.c.bf16 %v4767_v50, %v4766_v14  ;;  %6002 = vmatprep.subr.bf16.mxu1 %v6446_v0 }
 0x727   :  { %v4738_v35 = vpop.permute.xlu1 %4737 }
 0x728   :  { %v4768_v16 = vmul.f32 %v4738_v35, %v4698_v37  ;;  %6029 = vmatpush3.bf16.msra.mxu0 %v6313_v40 }
 0x729   :  { %6003 = vmatpush3.bf16.msra.mxu1 %v4867_v6 }
 0x72a   :  { %v4868_v3 = vpack.c.bf16 %v4769_v17, %v4768_v16  ;;  %6004 = vmatprep.subr.bf16.mxu1 %v6446_v0 }
 0x72b   :  { %v4746_v12 = vpop.permute.xlu1 %4745 }
 0x72c   :  { %v4770_v41 = vmul.f32 %v4746_v12, %v4700_v58 }
 0x72d   :  { %6005 = vmatpush3.bf16.msra.mxu1 %v4868_v3 }
 0x72e   :  { %v4869_v27 = vpack.c.bf16 %v4771_v63, %v4770_v41  ;;  %6006 = vmatprep.subr.bf16.mxu1 %v6446_v0 }
 0x72f   :  { %v4754_v2 = vpop.permute.xlu1 %4753 }
 0x730   :  { %v4772_v33 = vmul.f32 %v4754_v2, %v4702_v23 }
 0x731   :  { %6007 = vmatpush3.bf16.msra.mxu1 %v4869_v27 }
 0x732   :  { %v4870_v45 = vpack.c.bf16 %v4773_v49, %v4772_v33  ;;  %6008 = vmatprep.subr.bf16.mxu1 %v6446_v0  ;;  %v4839_v0 = vld [vmem:[%s9033_s11 + $0x8] sm:$0xff] }
 0x735   :  { %6009 = vmatpush3.bf16.msra.mxu1 %v4870_v45 }
 0x738   :  { %6011 = vmatmul.mubr.msk.bf16.vlgmr.msra.gmra.mrb[4].mxu1 %vm4793_vm4, %v6305_v56 }
 0x7ef   :  { %v4831_v13 = vpop.f32.mrb[0].mxu1 }
 0x7f0   :  { %v4832_v26 = vadd.f32 %v5403_v55, %v4831_v13  ;;  %v5994_v10 = vpop.f32.mrb[1].mxu1 }
 0x7f1   :  { %v4834_v31 = vpop.f32.mrb[2].mxu1 }
 0x7f2   :  { %v4835_v39 = vadd.f32 %v5403_v55, %v4834_v31  ;;  %v5995_v4 = vpop.f32.mrb[3].mxu1  ;;  %v4840_v52 = vadd.f32 %v4838_v25, %v4832_v26 }
 0x7f4   :  { %4842 = vmax.xlane.f32.xlu1 %v4840_v52  ;;  %v4841_v46 = vadd.f32 %v4839_v0, %v4835_v39 }
 0x7f6   :  { %4844 = vmax.xlane.f32.xlu0 %v4841_v46 }
 0x80b   :  { %v4912_v59 = vpop.f32.mrb[4].mxu1 }
 0x80c   :  { %v4913_v36 = vadd.f32 %v5406_v32, %v4912_v59  ;;  %v6012_v56 = vpop.f32.mrb[5].mxu1 }
 0x80d   :  { %v4915_v24 = vpop.f32.mrb[6].mxu1 }
 0x80e   :  { %v4919_v43 = vmax.f32 %v4913_v36, 0.0  ;;  %v4916_v34 = vadd.f32 %v5406_v32, %v4915_v24  ;;  %v6013_v38 = vpop.f32.mrb[7].mxu1 }
 0x810   :  { %v4920_v29 = vmax.f32 %v4916_v34, 0.0 }
 0x812   :  { %v4921_v9 = vpack.c.bf16 %v4920_v29, %v4919_v43 }
 0x814   :  { %6031 = vmatmul.mubr.bf16.vlgmr.msra.gmra.mrb[28].mxu0 %v4921_v9 }
 0x881   :  { %v4843_v47 = vpop.xlane.xlu1 %4842 }
 0x882   :  { %v4846_v48 = vsub.f32 %v4840_v52, %v4843_v47 }
 0x883   :  { %v4845_v42 = vpop.xlane.xlu0 %4844 }
 0x884   :  { %v4848_v11 = vmul.f32 1.442695, %v4846_v48  ;;  %v4847_v44 = vsub.f32 %v4841_v46, %v4845_v42 }
 0x886   :  { %6314 = vpow2.f32 %v4848_v11  ;;  %v4850_v1 = vmul.f32 1.442695, %v4847_v44 }
 0x888   :  { %6316 = vpow2.f32 %v4850_v1 }
 0x890   :  { %v6315_v62 = vpop.eup %6314 }
 0x891   :  { %4852 = vadd.xlane.f32.xlu0 %v6315_v62 }
 0x892   :  { %v6317_v7 = vpop.eup %6316 }
 0x893   :  { %4854 = vadd.xlane.f32.xlu1 %v6317_v7 }
 0x8e7   :  { %v5027_v51 = vpop.f32.mrb[28].mxu0 }
 0x8e8   :  { %v5028_v61 = vadd.f32 %v5408_v57, %v5027_v51  ;;  %v6032_v21 = vpop.f32.mrb[29].mxu0 }
 0x8e9   :  { %v5030_v50 = vpop.f32.mrb[30].mxu0 }
 0x8ea   :  { %6318 = vtanh.f32 %v5028_v61  ;;  %v5031_v14 = vadd.f32 %v5408_v57, %v5030_v50  ;;  %v6033_v5 = vpop.f32.mrb[31].mxu0 }
 0x8ec   :  { %6320 = vtanh.f32 %v5031_v14 }
 0x8f4   :  { %v6319_v37 = vpop.eup %6318 }
 0x8f5   :  { %5036 = vst [vmem:[%s9038_s16] sm:$0xff] %v6319_v37 }
 0x8f6   :  { %v6321_v6 = vpop.eup %6320 }
 0x8f7   :  { %5037 = vst [vmem:[%s9038_s16 + $0x8] sm:$0xff] %v6321_v6 }
 0x91e   :  { %v4853_v8 = vpop.xlane.xlu0 %4852 }
 0x91f   :  { %6322 = vlog2.f32 %v4853_v8 }
 0x920   :  { %v4855_v35 = vpop.xlane.xlu1 %4854 }
 0x921   :  { %6324 = vlog2.f32 %v4855_v35 }
 0x929   :  { %v6323_v17 = vpop.eup %6322 }
 0x92a   :  { %v4857_v16 = vmul.f32 0.6931472, %v6323_v17 }
 0x92b   :  { %v6325_v30 = vpop.eup %6324 }
 0x92c   :  { %v4860_v58 = vsub.f32 %v4846_v48, %v4857_v16  ;;  %v4859_v3 = vmul.f32 0.6931472, %v6325_v30 }
 0x92e   :  { %4862 = vst [vmem:[%s9037_s15] sm:$0xff] %v4860_v58  ;;  %v4861_v12 = vsub.f32 %v4847_v44, %v4859_v3 }
 0x930   :  { %4863 = vst [vmem:[%s9037_s15 + $0x8] sm:$0xff] %v4861_v12 }

</bundles_post_ra>
